<compile_context>
chip_gen: v7x
topology: tpu7x:2x2x1
jax: 0.10.0
libtpu: 0.0.40
codegen_flags: <defaults>
</compile_context>

<pallas_src>
import functools

import jax
import jax.numpy as jnp
from jax import lax
from jax.experimental import pallas as pl
from jax.experimental.pallas import tpu as pltpu


def _round_up(x, m):
    return ((x + m - 1) // m) * m


def _conv3x3_relu(xp, w, b, ho, wo):
    """Single-matmul im2col 3x3 conv + bias + ReLU.

    xp: (Hp, Wp, C)      padded input value (compute dtype)
    w : (9*C, Cout_p)    flattened-tap weights (compute dtype)
    b : (1, Cout_p)      float32 bias
    returns (ho*wo, Cout_p) float32
    """
    c = xp.shape[-1]
    # Stack the 9 shifted taps on the channel (lane) axis -> one K=9*C matmul.
    cols = [xp[dy:dy + ho, dx:dx + wo, :] for dy in range(3) for dx in range(3)]
    patches = jnp.concatenate(cols, axis=-1).reshape(ho * wo, 9 * c)
    acc = jnp.dot(patches, w, preferred_element_type=jnp.float32)
    return jnp.maximum(acc + b, 0.0)


def _fused_block_kernel(x_ref, w1_ref, b1_ref, w2_ref, b2_ref, o_ref,
                        xpad_ref, hpad_ref, *, padding):
    """One batch image per grid step; both convs computed back-to-back.

    x_ref : (1, H, W, Cin)            unpadded input tile (VMEM)
    w1_ref: (9*Cin, Cout_p)           conv1 weights, taps flattened
    b1_ref: (1, Cout_p)               conv1 bias (f32)
    w2_ref: (9*Cout_p, Cout_p)        conv2 weights, taps flattened
    b2_ref: (1, Cout_p)               conv2 bias (f32)
    o_ref : (1, H2o, W2o, Cout_p)     lane-dense output tile
    xpad_ref: (H+2p, W+2p, Cin)       VMEM scratch (input + halo)
    hpad_ref: (H1o+2p, W1o+2p, Cout_p) VMEM scratch (conv1 act + halo)
    """
    p = padding
    hp1, wp1, _cin = xpad_ref.shape
    h1o, w1o = hp1 - 2, wp1 - 2
    hp2, wp2, cout_p = hpad_ref.shape
    h2o, w2o = hp2 - 2, wp2 - 2
    _, h_in, w_in, _ = x_ref.shape

    # Stage input + zero halo entirely in VMEM (no HBM-side jnp.pad). Re-zeroed
    # every grid step so per-core scratch stays correct under megacore sharding.
    if p > 0:
        xpad_ref[...] = jnp.zeros(xpad_ref.shape, xpad_ref.dtype)
        xpad_ref[p:p + h_in, p:p + w_in, :] = x_ref[0]
    else:
        xpad_ref[...] = x_ref[0]

    # Conv1 + ReLU: one (H1o*W1o, 9*Cin) x (9*Cin, Cout_p) MXU matmul.
    h1 = _conv3x3_relu(xpad_ref[...], w1_ref[...], b1_ref[...], h1o, w1o)

    # Intermediate activation (+ its halo for conv2) stays in VMEM scratch —
    # no HBM round trip between the two convolutions.
    if p > 0:
        hpad_ref[...] = jnp.zeros(hpad_ref.shape, hpad_ref.dtype)
        hpad_ref[p:p + h1o, p:p + w1o, :] = (
            h1.reshape(h1o, w1o, cout_p).astype(hpad_ref.dtype))
    else:
        hpad_ref[...] = h1.reshape(h1o, w1o, cout_p).astype(hpad_ref.dtype)

    # Conv2 + ReLU: one (H2o*W2o, 9*Cout_p) x (9*Cout_p, Cout_p) MXU matmul.
    h2 = _conv3x3_relu(hpad_ref[...], w2_ref[...], b2_ref[...], h2o, w2o)
    o_ref[...] = h2.reshape(1, h2o, w2o, cout_p).astype(o_ref.dtype)


@functools.partial(jax.jit, static_argnames=("padding", "compute_dtype"))
def unet_conv_block(x_nchw, w1, b1, w2, b2, padding=1, compute_dtype=None):
    """Forward pass of UNetConvBlock (norm_layer=None). Input/output NCHW.

    w1: (3, 3, Cin, Cout) HWIO, b1: (Cout,)
    w2: (3, 3, Cout, Cout) HWIO, b2: (Cout,)
    compute_dtype: optional (e.g. jnp.bfloat16) for the matmul operands;
    accumulation is always f32.
    """
    p = int(padding)
    n, cin, h, w = x_nchw.shape
    cout = w1.shape[-1]
    cout_p = _round_up(cout, 128)                 # lane-dense channel width

    h1o, w1o = h + 2 * p - 2, w + 2 * p - 2       # conv1 output (k=3, s=1)
    h2o, w2o = h1o + 2 * p - 2, w1o + 2 * p - 2   # conv2 output

    out_dtype = x_nchw.dtype
    cdt = out_dtype if compute_dtype is None else compute_dtype

    x = jnp.transpose(x_nchw, (0, 2, 3, 1)).astype(cdt)   # NCHW -> NHWC

    # Pad channels with zeros up to the 128-lane multiple (zero weights + zero
    # bias + ReLU(0)=0 keeps the math identical) and flatten the 3x3 taps so
    # each conv becomes one matmul with K = 9*C.
    w1p = jnp.pad(w1, ((0, 0), (0, 0), (0, 0), (0, cout_p - cout)))
    w1p = w1p.reshape(9 * cin, cout_p).astype(cdt)
    w2p = jnp.pad(w2, ((0, 0), (0, 0), (0, cout_p - cout), (0, cout_p - cout)))
    w2p = w2p.reshape(9 * cout_p, cout_p).astype(cdt)
    b1p = jnp.pad(b1, (0, cout_p - cout)).reshape(1, cout_p).astype(jnp.float32)
    b2p = jnp.pad(b2, (0, cout_p - cout)).reshape(1, cout_p).astype(jnp.float32)

    kernel = functools.partial(_fused_block_kernel, padding=p)

    # TODO(synk): for realistic UNet sizes (e.g. 256x256x64) add H-row tiling
    # with overlapping halo windows so blocks fit the v7x 64 MiB VMEM budget
    # and each core gets >2 pipeline steps; whole-image blocks are fine here.
    out = pl.pallas_call(
        kernel,
        out_shape=jax.ShapeDtypeStruct((n, h2o, w2o, cout_p), out_dtype),
        grid=(n,),
        in_specs=[
            pl.BlockSpec((1, h, w, cin), lambda i: (i, 0, 0, 0)),
            pl.BlockSpec((9 * cin, cout_p), lambda i: (0, 0)),
            pl.BlockSpec((1, cout_p), lambda i: (0, 0)),
            pl.BlockSpec((9 * cout_p, cout_p), lambda i: (0, 0)),
            pl.BlockSpec((1, cout_p), lambda i: (0, 0)),
        ],
        out_specs=pl.BlockSpec((1, h2o, w2o, cout_p), lambda i: (i, 0, 0, 0)),
        scratch_shapes=[
            pltpu.VMEM((h + 2 * p, w + 2 * p, cin), cdt),
            pltpu.VMEM((h1o + 2 * p, w1o + 2 * p, cout_p), cdt),
        ],
        compiler_params=pltpu.CompilerParams(
            dimension_semantics=("parallel",)),
    )(x, w1p, b1p, w2p, b2p)

    out = out[..., :cout]                          # strip lane padding
    return jnp.transpose(out, (0, 3, 1, 2))        # NHWC -> NCHW


def init_unet_conv_block_params(key, in_planes, out_planes):
    """Deterministic synthetic parameters (shapes match nn.Conv2d(..., 3))."""
    k1, k2, k3, k4 = jax.random.split(key, 4)
    s1 = 1.0 / jnp.sqrt(in_planes * 9.0)
    s2 = 1.0 / jnp.sqrt(out_planes * 9.0)
    # HWIO weight layout for the NHWC kernel.
    w1 = jax.random.uniform(k1, (3, 3, in_planes, out_planes),
                            jnp.float32, -s1, s1)
    b1 = jax.random.uniform(k2, (out_planes,), jnp.float32, -s1, s1)
    w2 = jax.random.uniform(k3, (3, 3, out_planes, out_planes),
                            jnp.float32, -s2, s2)
    b2 = jax.random.uniform(k4, (out_planes,), jnp.float32, -s2, s2)
    return w1, b1, w2, b2


def _reference(x_nchw, w1, b1, w2, b2, padding=1):
    """Plain-JAX reference (lax conv) for a correctness check."""
    def conv(x, w, b):
        y = lax.conv_general_dilated(
            x, w, window_strides=(1, 1),
            padding=[(padding, padding), (padding, padding)],
            dimension_numbers=("NCHW", "HWIO", "NCHW"))
        return jnp.maximum(y + b.reshape(1, -1, 1, 1), 0.0)
    return conv(conv(x_nchw, w1, b1), w2, b2)


if __name__ == "__main__":
    key = jax.random.PRNGKey(0)
    k_x, k_p = jax.random.split(key)

    # Small shapes consistent with the module: batch=2, in=4, out=8, 16x16.
    N, Cin, Cout, H, W = 2, 4, 8, 16, 16
    padding = 1

    x = jax.random.normal(k_x, (N, Cin, H, W), jnp.float32)
    w1, b1, w2, b2 = init_unet_conv_block_params(k_p, Cin, Cout)

    # f32 path (exact-ish vs. reference).
    out = unet_conv_block(x, w1, b1, w2, b2, padding=padding)
    out = jax.block_until_ready(out)

    ref = _reference(x, w1, b1, w2, b2, padding=padding)
    assert out.shape == (N, Cout, H, W)
    assert jnp.allclose(out, ref, atol=1e-4, rtol=1e-4)

    # bf16 compute path (f32 accumulation) — halves HBM/VMEM traffic.
    out_bf16 = unet_conv_block(x, w1, b1, w2, b2, padding=padding,
                               compute_dtype=jnp.bfloat16)
    out_bf16 = jax.block_until_ready(out_bf16)
    assert out_bf16.shape == (N, Cout, H, W)
    assert jnp.allclose(out_bf16, ref, atol=1e-1, rtol=1e-1)

    print("KERNEL_OK")
</pallas_src>

<mosaic_0001>
module attributes {stable_mosaic.version = 11 : i64} {
  func.func @_fused_block_kernel(%arg0: i32, %arg1: memref<1x16x16x4xf32, #tpu.memory_space<vmem>>, %arg2: memref<36x128xf32, #tpu.memory_space<vmem>>, %arg3: memref<1x128xf32, #tpu.memory_space<vmem>>, %arg4: memref<1152x128xf32, #tpu.memory_space<vmem>>, %arg5: memref<1x128xf32, #tpu.memory_space<vmem>>, %arg6: memref<1x16x16x128xf32, #tpu.memory_space<vmem>>, %arg7: memref<18x18x4xf32, #tpu.memory_space<vmem>>, %arg8: memref<18x18x128xf32, #tpu.memory_space<vmem>>) attributes {dimension_semantics = [#tpu.dimension_semantics<parallel>], iteration_bounds = array<i64: 2>, scalar_prefetch = 0 : i64, scratch_operands = 2 : i64, tpu.core_type = #tpu.core_type<tc>, window_params = [{transform_indices = @transform_0, window_bounds = array<i64: 1, 16, 16, 4>}, {pipeline_mode = #tpu.pipeline_mode<synchronous>, transform_indices = @transform_1, window_bounds = array<i64: 36, 128>}, {pipeline_mode = #tpu.pipeline_mode<synchronous>, transform_indices = @transform_2, window_bounds = array<i64: 1, 128>}, {pipeline_mode = #tpu.pipeline_mode<synchronous>, transform_indices = @transform_3, window_bounds = array<i64: 1152, 128>}, {pipeline_mode = #tpu.pipeline_mode<synchronous>, transform_indices = @transform_4, window_bounds = array<i64: 1, 128>}, {transform_indices = @transform_5, window_bounds = array<i64: 1, 16, 16, 128>}]} {
    %cst = arith.constant 0.000000e+00 : f32
    %0 = vector.broadcast %cst : f32 to vector<18x18x4xf32>
    %c0 = arith.constant 0 : index
    %c0_0 = arith.constant 0 : index
    %c0_1 = arith.constant 0 : index
    %1 = vector.load %arg7[%c0, %c0_0, %c0_1] : memref<18x18x4xf32, #tpu.memory_space<vmem>>, vector<18x18x4xf32>
    tpu.vector_store %arg7[%c0, %c0_0, %c0_1], %0 {strides = array<i32>} : memref<18x18x4xf32, #tpu.memory_space<vmem>>, vector<18x18x4xf32>,
    %c0_2 = arith.constant 0 : index
    %c0_3 = arith.constant 0 : index
    %c0_4 = arith.constant 0 : index
    %c0_5 = arith.constant 0 : index
    %2 = vector.load %arg1[%c0_2, %c0_3, %c0_4, %c0_5] : memref<1x16x16x4xf32, #tpu.memory_space<vmem>>, vector<1x16x16x4xf32>
    %3 = vector.shape_cast %2 : vector<1x16x16x4xf32> to vector<16x16x4xf32>
    %c1 = arith.constant 1 : index
    %c1_6 = arith.constant 1 : index
    %c0_7 = arith.constant 0 : index
    %4 = vector.load %arg7[%c1, %c1_6, %c0_7] : memref<18x18x4xf32, #tpu.memory_space<vmem>>, vector<16x16x4xf32>
    tpu.vector_store %arg7[%c1, %c1_6, %c0_7], %3 {strides = array<i32>} : memref<18x18x4xf32, #tpu.memory_space<vmem>>, vector<16x16x4xf32>,
    %c0_8 = arith.constant 0 : index
    %c0_9 = arith.constant 0 : index
    %c0_10 = arith.constant 0 : index
    %5 = vector.load %arg7[%c0_8, %c0_9, %c0_10] : memref<18x18x4xf32, #tpu.memory_space<vmem>>, vector<18x18x4xf32>
    %c0_11 = arith.constant 0 : index
    %c0_12 = arith.constant 0 : index
    %6 = vector.load %arg2[%c0_11, %c0_12] : memref<36x128xf32, #tpu.memory_space<vmem>>, vector<36x128xf32>
    %c0_13 = arith.constant 0 : index
    %c0_14 = arith.constant 0 : index
    %7 = vector.load %arg3[%c0_13, %c0_14] : memref<1x128xf32, #tpu.memory_space<vmem>>, vector<1x128xf32>
    %8 = vector.extract_strided_slice %5 {offsets = [0, 0, 0], sizes = [16, 16, 4], strides = [1, 1, 1]} : vector<18x18x4xf32> to vector<16x16x4xf32>
    %9 = vector.extract_strided_slice %5 {offsets = [0, 1, 0], sizes = [16, 16, 4], strides = [1, 1, 1]} : vector<18x18x4xf32> to vector<16x16x4xf32>
    %10 = vector.extract_strided_slice %5 {offsets = [0, 2, 0], sizes = [16, 16, 4], strides = [1, 1, 1]} : vector<18x18x4xf32> to vector<16x16x4xf32>
    %11 = vector.extract_strided_slice %5 {offsets = [1, 0, 0], sizes = [16, 16, 4], strides = [1, 1, 1]} : vector<18x18x4xf32> to vector<16x16x4xf32>
    %12 = vector.extract_strided_slice %5 {offsets = [1, 1, 0], sizes = [16, 16, 4], strides = [1, 1, 1]} : vector<18x18x4xf32> to vector<16x16x4xf32>
    %13 = vector.extract_strided_slice %5 {offsets = [1, 2, 0], sizes = [16, 16, 4], strides = [1, 1, 1]} : vector<18x18x4xf32> to vector<16x16x4xf32>
    %14 = vector.extract_strided_slice %5 {offsets = [2, 0, 0], sizes = [16, 16, 4], strides = [1, 1, 1]} : vector<18x18x4xf32> to vector<16x16x4xf32>
    %15 = vector.extract_strided_slice %5 {offsets = [2, 1, 0], sizes = [16, 16, 4], strides = [1, 1, 1]} : vector<18x18x4xf32> to vector<16x16x4xf32>
    %16 = vector.extract_strided_slice %5 {offsets = [2, 2, 0], sizes = [16, 16, 4], strides = [1, 1, 1]} : vector<18x18x4xf32> to vector<16x16x4xf32>
    %17 = tpu.concatenate %8, %9, %10, %11, %12, %13, %14, %15, %16 in 2 : vector<16x16x4xf32>, vector<16x16x4xf32>, vector<16x16x4xf32>, vector<16x16x4xf32>, vector<16x16x4xf32>, vector<16x16x4xf32>, vector<16x16x4xf32>, vector<16x16x4xf32>, vector<16x16x4xf32> -> vector<16x16x36xf32>
    %18 = vector.shape_cast %17 : vector<16x16x36xf32> to vector<256x36xf32>
    %cst_15 = arith.constant dense<0.000000e+00> : vector<256x128xf32>
    %19 = tpu.matmul %18, %6, %cst_15 {dimension_numbers = #tpu.dot_dimension_numbers<[1], [0], [0], [1], [0, 0, 1, 1], [], []>} : vector<256x36xf32>, vector<36x128xf32>, vector<256x128xf32> -> vector<256x128xf32>
    %20 = vector.broadcast %7 : vector<1x128xf32> to vector<256x128xf32>
    %21 = arith.addf %19, %20 : vector<256x128xf32>
    %cst_16 = arith.constant 0.000000e+00 : f32
    %22 = vector.broadcast %cst_16 : f32 to vector<256x128xf32>
    %23 = arith.maximumf %21, %22 : vector<256x128xf32>
    %cst_17 = arith.constant 0.000000e+00 : f32
    %24 = vector.broadcast %cst_17 : f32 to vector<18x18x128xf32>
    %c0_18 = arith.constant 0 : index
    %c0_19 = arith.constant 0 : index
    %c0_20 = arith.constant 0 : index
    %25 = vector.load %arg8[%c0_18, %c0_19, %c0_20] : memref<18x18x128xf32, #tpu.memory_space<vmem>>, vector<18x18x128xf32>
    tpu.vector_store %arg8[%c0_18, %c0_19, %c0_20], %24 {strides = array<i32>} : memref<18x18x128xf32, #tpu.memory_space<vmem>>, vector<18x18x128xf32>,
    %26 = vector.shape_cast %23 : vector<256x128xf32> to vector<16x16x128xf32>
    %c1_21 = arith.constant 1 : index
    %c1_22 = arith.constant 1 : index
    %c0_23 = arith.constant 0 : index
    %27 = vector.load %arg8[%c1_21, %c1_22, %c0_23] : memref<18x18x128xf32, #tpu.memory_space<vmem>>, vector<16x16x128xf32>
    tpu.vector_store %arg8[%c1_21, %c1_22, %c0_23], %26 {strides = array<i32>} : memref<18x18x128xf32, #tpu.memory_space<vmem>>, vector<16x16x128xf32>,
    %c0_24 = arith.constant 0 : index
    %c0_25 = arith.constant 0 : index
    %c0_26 = arith.constant 0 : index
    %28 = vector.load %arg8[%c0_24, %c0_25, %c0_26] : memref<18x18x128xf32, #tpu.memory_space<vmem>>, vector<18x18x128xf32>
    %c0_27 = arith.constant 0 : index
    %c0_28 = arith.constant 0 : index
    %29 = vector.load %arg4[%c0_27, %c0_28] : memref<1152x128xf32, #tpu.memory_space<vmem>>, vector<1152x128xf32>
    %c0_29 = arith.constant 0 : index
    %c0_30 = arith.constant 0 : index
    %30 = vector.load %arg5[%c0_29, %c0_30] : memref<1x128xf32, #tpu.memory_space<vmem>>, vector<1x128xf32>
    %31 = vector.extract_strided_slice %28 {offsets = [0, 0, 0], sizes = [16, 16, 128], strides = [1, 1, 1]} : vector<18x18x128xf32> to vector<16x16x128xf32>
    %32 = vector.extract_strided_slice %28 {offsets = [0, 1, 0], sizes = [16, 16, 128], strides = [1, 1, 1]} : vector<18x18x128xf32> to vector<16x16x128xf32>
    %33 = vector.extract_strided_slice %28 {offsets = [0, 2, 0], sizes = [16, 16, 128], strides = [1, 1, 1]} : vector<18x18x128xf32> to vector<16x16x128xf32>
    %34 = vector.extract_strided_slice %28 {offsets = [1, 0, 0], sizes = [16, 16, 128], strides = [1, 1, 1]} : vector<18x18x128xf32> to vector<16x16x128xf32>
    %35 = vector.extract_strided_slice %28 {offsets = [1, 1, 0], sizes = [16, 16, 128], strides = [1, 1, 1]} : vector<18x18x128xf32> to vector<16x16x128xf32>
    %36 = vector.extract_strided_slice %28 {offsets = [1, 2, 0], sizes = [16, 16, 128], strides = [1, 1, 1]} : vector<18x18x128xf32> to vector<16x16x128xf32>
    %37 = vector.extract_strided_slice %28 {offsets = [2, 0, 0], sizes = [16, 16, 128], strides = [1, 1, 1]} : vector<18x18x128xf32> to vector<16x16x128xf32>
    %38 = vector.extract_strided_slice %28 {offsets = [2, 1, 0], sizes = [16, 16, 128], strides = [1, 1, 1]} : vector<18x18x128xf32> to vector<16x16x128xf32>
    %39 = vector.extract_strided_slice %28 {offsets = [2, 2, 0], sizes = [16, 16, 128], strides = [1, 1, 1]} : vector<18x18x128xf32> to vector<16x16x128xf32>
    %40 = tpu.concatenate %31, %32, %33, %34, %35, %36, %37, %38, %39 in 2 : vector<16x16x128xf32>, vector<16x16x128xf32>, vector<16x16x128xf32>, vector<16x16x128xf32>, vector<16x16x128xf32>, vector<16x16x128xf32>, vector<16x16x128xf32>, vector<16x16x128xf32>, vector<16x16x128xf32> -> vector<16x16x1152xf32>
    %41 = vector.shape_cast %40 : vector<16x16x1152xf32> to vector<256x1152xf32>
    %cst_31 = arith.constant dense<0.000000e+00> : vector<256x128xf32>
    %42 = tpu.matmul %41, %29, %cst_31 {dimension_numbers = #tpu.dot_dimension_numbers<[1], [0], [0], [1], [0, 0, 1, 1], [], []>} : vector<256x1152xf32>, vector<1152x128xf32>, vector<256x128xf32> -> vector<256x128xf32>
    %43 = vector.broadcast %30 : vector<1x128xf32> to vector<256x128xf32>
    %44 = arith.addf %42, %43 : vector<256x128xf32>
    %cst_32 = arith.constant 0.000000e+00 : f32
    %45 = vector.broadcast %cst_32 : f32 to vector<256x128xf32>
    %46 = arith.maximumf %44, %45 : vector<256x128xf32>
    %47 = vector.shape_cast %46 : vector<256x128xf32> to vector<1x16x16x128xf32>
    %c0_33 = arith.constant 0 : index
    %c0_34 = arith.constant 0 : index
    %c0_35 = arith.constant 0 : index
    %c0_36 = arith.constant 0 : index
    %48 = vector.load %arg6[%c0_33, %c0_34, %c0_35, %c0_36] : memref<1x16x16x128xf32, #tpu.memory_space<vmem>>, vector<1x16x16x128xf32>
    tpu.vector_store %arg6[%c0_33, %c0_34, %c0_35, %c0_36], %47 {strides = array<i32>} : memref<1x16x16x128xf32, #tpu.memory_space<vmem>>, vector<1x16x16x128xf32>,
    return
  }
  func.func @transform_0(%arg0: i32) -> (i32, i32, i32, i32) {
    %c0_i32 = arith.constant 0 : i32
    %c0_i32_0 = arith.constant 0 : i32
    %c0_i32_1 = arith.constant 0 : i32
    %c0_i32_2 = arith.constant 0 : i32
    return %arg0, %c0_i32, %c0_i32_0, %c0_i32_1 : i32, i32, i32, i32
  }
  func.func @transform_1(%arg0: i32) -> (i32, i32) {
    %c0_i32 = arith.constant 0 : i32
    %c0_i32_0 = arith.constant 0 : i32
    %c0_i32_1 = arith.constant 0 : i32
    return %c0_i32, %c0_i32_0 : i32, i32
  }
  func.func @transform_2(%arg0: i32) -> (i32, i32) {
    %c0_i32 = arith.constant 0 : i32
    %c0_i32_0 = arith.constant 0 : i32
    %c0_i32_1 = arith.constant 0 : i32
    return %c0_i32, %c0_i32_0 : i32, i32
  }
  func.func @transform_3(%arg0: i32) -> (i32, i32) {
    %c0_i32 = arith.constant 0 : i32
    %c0_i32_0 = arith.constant 0 : i32
    %c0_i32_1 = arith.constant 0 : i32
    return %c0_i32, %c0_i32_0 : i32, i32
  }
  func.func @transform_4(%arg0: i32) -> (i32, i32) {
    %c0_i32 = arith.constant 0 : i32
    %c0_i32_0 = arith.constant 0 : i32
    %c0_i32_1 = arith.constant 0 : i32
    return %c0_i32, %c0_i32_0 : i32, i32
  }
  func.func @transform_5(%arg0: i32) -> (i32, i32, i32, i32) {
    %c0_i32 = arith.constant 0 : i32
    %c0_i32_0 = arith.constant 0 : i32
    %c0_i32_1 = arith.constant 0 : i32
    %c0_i32_2 = arith.constant 0 : i32
    return %arg0, %c0_i32, %c0_i32_0, %c0_i32_1 : i32, i32, i32, i32
  }
}

</mosaic_0001>

<bundles_post_ra>
// kernel: unet_conv_block.1
= control target key start
LH: loop header
LB: loop body
LE: loop exit
PB: predicated region body
PF: predicated region fallthrough
CT: control target
= control target key end

     0   :  { %s4682_s18 = smov 0   ;;  %s7525_s0 = inlined_call_operand.vmem [shape: f32[2,16,16,4], index: 0, kind: input, shape index: {}]   ;;  %s7526_s1 = inlined_call_operand.vmem [shape: f32[36,128], index: 1, kind: input, shape index: {}]   ;;  %s7527_s2 = inlined_call_operand.vmem [shape: f32[1,128], index: 2, kind: input, shape index: {}]   ;;  %s7528_s3 = inlined_call_operand.vmem [shape: f32[1152,128], index: 3, kind: input, shape index: {}]   ;;  %s7529_s4 = inlined_call_operand.vmem [shape: f32[1,128], index: 4, kind: input, shape index: {}]   ;;  %s7530_s5 = inlined_call_operand.vmem [shape: f32[2,16,16,128], index: 5, kind: output, shape index: {}]  }
   0x1 LB: > { %s3879_s19 = sadd.s32 4294967295, %s4640_s18   ;;  %p3883_p0 = scmp.ge.s32.totalorder %s4640_s18, 1  ;;  %s4640_s18 = sphi %s4682_s18, %s15_s18  }
   0x2   : > { %p187_p1 = scmp.lt.s32.totalorder %s4640_s18, 3 }
   0x4   : > { %p188_p2 = pnand %p3883_p0, %p187_p1 }
   0x6   : > { %191 = sbr.rel (%p188_p2) target bundleno = 1310 (0x51e), region = 40 }
   0xd   : > { %vm225_vm0 = vcmask 31744   ;;  %v4642_v0 = vmov 0.0   ;;  %vm228_vm1 = vcmask 25600   ;;  %p4815_p3 = scmp.lt.s32.totalorder %s3879_s19, 1  ;;  %vm631_vm2 = vcmask 1045504   ;;  %s4643_s25 = smov 8  }
   0xe   : > { %226 = vst.msk [vmem:[#allocation2] sm:$0xff] %vm225_vm0, %v4642_v0  ;;  %227 = vst.msk [vmem:[#allocation2 + $0x8] sm:$0xff] %vm225_vm0, %v4642_v0  ;;  %vm454_vm3 = vcmask 1046528   ;;  %s4644_s26 = smov 4   ;;  %s4645_s27 = smov 12   ;;  %v400_v41 = vld [vmem:[%s7526_s1] sm:$0xff] }
   0xf   : > { %230 = vst.msk [vmem:[#allocation2 + $0x18] sm:$0xff] %vm225_vm0, %v4642_v0  ;;  %231 = vst.msk [vmem:[#allocation2 + $0x20] sm:$0xff] %vm225_vm0, %v4642_v0  ;;  %s7685_s19 = smov (!%p4815_p3, %s3879_s19), 1  ;;  %s4646_s28 = smov 16   ;;  %v401_v42 = vld [vmem:[%s7526_s1 + $0x8] sm:$0xff]  ;;  %v402_v44 = vld [vmem:[%s7526_s1 + $0x10] sm:$0xff] }
  0x10   : > { %233 = vst.msk [vmem:[#allocation2 + $0x30] sm:$0xff] %vm225_vm0, %v4642_v0  ;;  %234 = vst.msk [vmem:[#allocation2 + $0x38] sm:$0xff] %vm225_vm0, %v4642_v0  ;;  %s3925_s21 = sshll.u32 %s7685_s19, 8  ;;  %v403_v45 = vld [vmem:[%s7526_s1 + $0x18] sm:$0xff]  ;;  %s4647_s12 = smov 20   ;;  %v4150_v46 = vpack.c.bf16 %v401_v42, %v400_v41  ;;  %vm1776_vm4 = vcmask 1043456  }
  0x11   : > { %236 = vst.msk [vmem:[#allocation2 + $0x48] sm:$0xff] %vm225_vm0, %v4642_v0  ;;  %237 = vst.msk [vmem:[#allocation2 + $0x50] sm:$0xff] %vm225_vm0, %v4642_v0  ;;  %s4867_s24 = scalar_lea.vmem %s7525_s0, %s3925_s21  ;;  %v4154_v50 = vpack.c.bf16 %v403_v45, %v402_v44  ;;  %s4648_s13 = smov 24   ;;  %v404_v55 = vld [vmem:[%s7526_s1 + $0x20] sm:$0xf]  ;;  %vm1442_vm5 = vcmask 64512  }
  0x12   : > { %239 = vst.msk [vmem:[#allocation2 + $0x60] sm:$0xff] %vm225_vm0, %v4642_v0  ;;  %240 = vst.msk [vmem:[#allocation2 + $0x68] sm:$0xff] %vm225_vm0, %v4642_v0  ;;  %v281_v1 = vld [vmem:[%s4867_s24] sm:$0xff]  ;;  %v282_v2 = vld [vmem:[%s4867_s24 + $0x8] sm:$0xff]  ;;  %4151 = vmatprep.subr.bf16.mxu0 %v4150_v46  ;;  %s4649_s16 = smov 28   ;;  %s4650_s17 = smov 32  }
  0x13   : > { %242 = vst.msk [vmem:[#allocation2 + $0x78] sm:$0xff] %vm225_vm0, %v4642_v0  ;;  %243 = vst.msk [vmem:[#allocation2 + $0x80] sm:$0xff] %vm225_vm0, %v4642_v0  ;;  %v283_v3 = vld [vmem:[%s4867_s24 + $0x10] sm:$0xff]  ;;  %v284_v6 = vld [vmem:[%s4867_s24 + $0x18] sm:$0xff]  ;;  %4153 = vmatpush3.bf16.msra.mxu0 %v4150_v46  ;;  %vm1475_vm6 = vcmask 97280   ;;  %vm1508_vm7 = vcmask 130048  }
  0x14   : > { %245 = vst.msk [vmem:[#allocation2 + $0x90] sm:$0xff] %vm225_vm0, %v4642_v0  ;;  %246 = vst.msk [vmem:[#allocation2 + $0x98] sm:$0xff] %vm225_vm0, %v4642_v0  ;;  %v285_v14 = vld [vmem:[%s4867_s24 + $0x20] sm:$0xff]  ;;  %v286_v15 = vld [vmem:[%s4867_s24 + $0x28] sm:$0xff]  ;;  %4155 = vmatprep.subr.bf16.mxu0 %v4154_v50  ;;  %vm1541_vm8 = vcmask 162816   ;;  %vm1574_vm9 = vcmask 195584  }
  0x15   : > { %248 = vst.msk [vmem:[#allocation2 + $0xa8] sm:$0xff] %vm225_vm0, %v4642_v0  ;;  %249 = vst.msk [vmem:[#allocation2 + $0xb0] sm:$0xff] %vm225_vm0, %v4642_v0  ;;  %v4872_v4 = vld [vmem:[#allocation2] sm:$0xff]  ;;  %v4874_v5 = vld [vmem:[#allocation2 + $0x8] sm:$0xff]  ;;  %vm1607_vm10 = vcmask 228352   ;;  %vm1640_vm11 = vcmask 261120  }
  0x16   : > { %251 = vst.msk [vmem:[#allocation2 + $0xc0] sm:$0xff] %vm225_vm0, %v4642_v0  ;;  %252 = vst.msk [vmem:[#allocation2 + $0xc8] sm:$0xff] %vm225_vm0, %v4642_v0  ;;  %v632_v7 = vrot.slane %v4872_v4, 2  ;;  %v633_v8 = vrot.slane %v4874_v5, 2  ;;  %v455_v9 = vrot.slane %v4872_v4, 1  ;;  %v456_v10 = vrot.slane %v4874_v5, 1 }
  0x17   : > { %254 = vst.msk [vmem:[#allocation2 + $0xd8] sm:$0xff] %vm225_vm0, %v4642_v0  ;;  %255 = vst.msk [vmem:[#allocation2 + $0xe0] sm:$0xff] %vm225_vm0, %v4642_v0  ;;  %v287_v16 = vld [vmem:[%s4867_s24 + $0x30] sm:$0xff]  ;;  %v288_v19 = vld [vmem:[%s4867_s24 + $0x38] sm:$0xff]  ;;  %4157 = vmatpush3.bf16.msra.mxu0 %v4154_v50  ;;  %vm1679_vm12 = vcmask 293888  }
  0x18   : > { %257 = vst.msk [vmem:[#allocation2 + $0xf0] sm:$0xff] %vm225_vm0, %v4642_v0  ;;  %258 = vst.msk [vmem:[#allocation2 + $0xf8] sm:$0xff] %vm225_vm0, %v4642_v0  ;;  %v634_v17 = vsel %vm631_vm2, %v632_v7, %v633_v8  ;;  %v457_v18 = vsel %vm454_vm3, %v455_v9, %v456_v10  ;;  %v289_v20 = vld [vmem:[%s4867_s24 + $0x40] sm:$0xff]  ;;  %v290_v21 = vld [vmem:[%s4867_s24 + $0x48] sm:$0xff]  ;;  %4020 = vmatprep.subr.msk.mxu0 %vm1776_vm4, %v404_v55 }
  0x19   : > { %260 = vst.msk [vmem:[#allocation2 + $0x108] sm:$0xff] %vm225_vm0, %v4642_v0  ;;  %261 = vst.msk [vmem:[#allocation2 + $0x110] sm:$0xff] %vm225_vm0, %v4642_v0  ;;  %712 = vrot.lane.b32.xlu1 %v634_v17, %s4643_s25  ;;  %535 = vrot.lane.b32.xlu0 %v457_v18, %s4644_s26  ;;  %v291_v36 = vld [vmem:[%s4867_s24 + $0x50] sm:$0xff]  ;;  %v292_v37 = vld [vmem:[%s4867_s24 + $0x58] sm:$0xff] }
  0x1a   : > { %263 = vst.msk [vmem:[#allocation2 + $0x120] sm:$0xff] %vm225_vm0, %v4642_v0  ;;  %264 = vst.msk [vmem:[#allocation2 + $0x128] sm:$0xff] %vm225_vm0, %v4642_v0  ;;  %v293_v59 = vld [vmem:[%s4867_s24 + $0x60] sm:$0xff]  ;;  %v294_v60 = vld [vmem:[%s4867_s24 + $0x68] sm:$0xff] }
  0x1b   : > { %266 = vst.msk [vmem:[#allocation2 + $0x138] sm:$0xff] %vm225_vm0, %v4642_v0  ;;  %267 = vst.msk [vmem:[#allocation2 + $0x140] sm:$0xff] %vm225_vm0, %v4642_v0  ;;  %4021 = vmatpush3.msk.msra.mxu0 %vm1776_vm4, %v404_v55 }
  0x1c   : > { %269 = vst.msk [vmem:[#allocation2 + $0x150] sm:$0xff] %vm225_vm0, %v4642_v0  ;;  %270 = vst.msk [vmem:[#allocation2 + $0x158] sm:$0xff] %vm225_vm0, %v4642_v0 }
  0x1d   : > { %272 = vst.msk [vmem:[#allocation2 + $0x168] sm:$0xff] %vm225_vm0, %v4642_v0  ;;  %273 = vst.msk [vmem:[#allocation2 + $0x170] sm:$0xff] %vm225_vm0, %v4642_v0 }
  0x1e   : > { %275 = vst.msk [vmem:[#allocation2 + $0x180] sm:$0xff] %vm225_vm0, %v4642_v0  ;;  %276 = vst.msk [vmem:[#allocation2 + $0x188] sm:$0xff] %vm225_vm0, %v4642_v0 }
  0x1f   : > { %278 = vst.msk [vmem:[#allocation2 + $0x198] sm:$0xff] %vm225_vm0, %v4642_v0  ;;  %279 = vst.msk [vmem:[#allocation2 + $0x1a0] sm:$0xff] %vm225_vm0, %v4642_v0 }
  0x20   : > { %2037 = vst [vmem:[#allocation3] sm:$0xff] %v4642_v0  ;;  %2039 = vst [vmem:[#allocation3 + $0x10] sm:$0x3] %v4642_v0 }
  0x21   : > { %2040 = vst [vmem:[#allocation3 + $0x18] sm:$0xff] %v4642_v0  ;;  %2041 = vst [vmem:[#allocation3 + $0x20] sm:$0xff] %v4642_v0 }
  0x22   : > { %2042 = vst [vmem:[#allocation3 + $0x28] sm:$0x3] %v4642_v0  ;;  %2043 = vst [vmem:[#allocation3 + $0x30] sm:$0xff] %v4642_v0 }
  0x23   : > { %2044 = vst [vmem:[#allocation3 + $0x38] sm:$0xff] %v4642_v0  ;;  %2045 = vst [vmem:[#allocation3 + $0x40] sm:$0x3] %v4642_v0 }
  0x24   : > { %2046 = vst [vmem:[#allocation3 + $0x48] sm:$0xff] %v4642_v0  ;;  %2047 = vst [vmem:[#allocation3 + $0x50] sm:$0xff] %v4642_v0 }
  0x25   : > { %2048 = vst [vmem:[#allocation3 + $0x58] sm:$0x3] %v4642_v0  ;;  %2049 = vst [vmem:[#allocation3 + $0x60] sm:$0xff] %v4642_v0 }
  0x26   : > { %2050 = vst [vmem:[#allocation3 + $0x68] sm:$0xff] %v4642_v0  ;;  %2051 = vst [vmem:[#allocation3 + $0x70] sm:$0x3] %v4642_v0 }
  0x27   : > { %2052 = vst [vmem:[#allocation3 + $0x78] sm:$0xff] %v4642_v0  ;;  %2053 = vst [vmem:[#allocation3 + $0x80] sm:$0xff] %v4642_v0 }
  0x28   : > { %2054 = vst [vmem:[#allocation3 + $0x88] sm:$0x3] %v4642_v0  ;;  %2055 = vst [vmem:[#allocation3 + $0x90] sm:$0xff] %v4642_v0 }
  0x29   : > { %2056 = vst [vmem:[#allocation3 + $0x98] sm:$0xff] %v4642_v0  ;;  %2057 = vst [vmem:[#allocation3 + $0xa0] sm:$0x3] %v4642_v0 }
  0x2a   : > { %2058 = vst [vmem:[#allocation3 + $0xa8] sm:$0xff] %v4642_v0  ;;  %2059 = vst [vmem:[#allocation3 + $0xb0] sm:$0xff] %v4642_v0 }
  0x2b   : > { %2060 = vst [vmem:[#allocation3 + $0xb8] sm:$0x3] %v4642_v0  ;;  %2061 = vst [vmem:[#allocation3 + $0xc0] sm:$0xff] %v4642_v0 }
  0x2c   : > { %2062 = vst [vmem:[#allocation3 + $0xc8] sm:$0xff] %v4642_v0  ;;  %2063 = vst [vmem:[#allocation3 + $0xd0] sm:$0x3] %v4642_v0 }
  0x2d   : > { %2064 = vst [vmem:[#allocation3 + $0xd8] sm:$0xff] %v4642_v0  ;;  %2065 = vst [vmem:[#allocation3 + $0xe0] sm:$0xff] %v4642_v0 }
  0x2e   : > { %2066 = vst [vmem:[#allocation3 + $0xe8] sm:$0x3] %v4642_v0  ;;  %2067 = vst [vmem:[#allocation3 + $0xf0] sm:$0xff] %v4642_v0 }
  0x2f   : > { %2068 = vst [vmem:[#allocation3 + $0xf8] sm:$0xff] %v4642_v0  ;;  %2069 = vst [vmem:[#allocation3 + $0x100] sm:$0x3] %v4642_v0 }
  0x30   : > { %2070 = vst [vmem:[#allocation3 + $0x108] sm:$0xff] %v4642_v0  ;;  %2071 = vst [vmem:[#allocation3 + $0x110] sm:$0xff] %v4642_v0 }
  0x31   : > { %2072 = vst [vmem:[#allocation3 + $0x118] sm:$0x3] %v4642_v0  ;;  %2073 = vst [vmem:[#allocation3 + $0x120] sm:$0xff] %v4642_v0 }
  0x32   : > { %2074 = vst [vmem:[#allocation3 + $0x128] sm:$0xff] %v4642_v0  ;;  %2075 = vst [vmem:[#allocation3 + $0x130] sm:$0x3] %v4642_v0 }
  0x33   : > { %2076 = vst [vmem:[#allocation3 + $0x138] sm:$0xff] %v4642_v0  ;;  %2077 = vst [vmem:[#allocation3 + $0x140] sm:$0xff] %v4642_v0 }
  0x34   : > { %2078 = vst [vmem:[#allocation3 + $0x148] sm:$0x3] %v4642_v0  ;;  %2079 = vst [vmem:[#allocation3 + $0x150] sm:$0xff] %v4642_v0 }
  0x35   : > { %2080 = vst [vmem:[#allocation3 + $0x158] sm:$0xff] %v4642_v0  ;;  %2081 = vst [vmem:[#allocation3 + $0x160] sm:$0x3] %v4642_v0 }
  0x36   : > { %2082 = vst [vmem:[#allocation3 + $0x168] sm:$0xff] %v4642_v0  ;;  %2083 = vst [vmem:[#allocation3 + $0x170] sm:$0xff] %v4642_v0 }
  0x37   : > { %2084 = vst [vmem:[#allocation3 + $0x178] sm:$0x3] %v4642_v0  ;;  %2085 = vst [vmem:[#allocation3 + $0x180] sm:$0xff] %v4642_v0 }
  0x38   : > { %2086 = vst [vmem:[#allocation3 + $0x188] sm:$0xff] %v4642_v0  ;;  %2087 = vst [vmem:[#allocation3 + $0x190] sm:$0x3] %v4642_v0 }
  0x39   : > { %2090 = vst [vmem:[#allocation3 + $0x1a8] sm:$0x3] %v4642_v0  ;;  %229 = vst.msk [vmem:[#allocation2 + $0x10] sm:$0x3] %vm228_vm1, %v4642_v0 }
  0x3a   : > { %232 = vst.msk [vmem:[#allocation2 + $0x28] sm:$0x3] %vm228_vm1, %v4642_v0  ;;  %235 = vst.msk [vmem:[#allocation2 + $0x40] sm:$0x3] %vm228_vm1, %v4642_v0 }
  0x3b   : > { %238 = vst.msk [vmem:[#allocation2 + $0x58] sm:$0x3] %vm228_vm1, %v4642_v0  ;;  %241 = vst.msk [vmem:[#allocation2 + $0x70] sm:$0x3] %vm228_vm1, %v4642_v0 }
  0x3c   : > { %244 = vst.msk [vmem:[#allocation2 + $0x88] sm:$0x3] %vm228_vm1, %v4642_v0  ;;  %247 = vst.msk [vmem:[#allocation2 + $0xa0] sm:$0x3] %vm228_vm1, %v4642_v0 }
  0x3d   : > { %250 = vst.msk [vmem:[#allocation2 + $0xb8] sm:$0x3] %vm228_vm1, %v4642_v0  ;;  %253 = vst.msk [vmem:[#allocation2 + $0xd0] sm:$0x3] %vm228_vm1, %v4642_v0 }
  0x3e   : > { %256 = vst.msk [vmem:[#allocation2 + $0xe8] sm:$0x3] %vm228_vm1, %v4642_v0  ;;  %259 = vst.msk [vmem:[#allocation2 + $0x100] sm:$0x3] %vm228_vm1, %v4642_v0 }
  0x3f   : > { %262 = vst.msk [vmem:[#allocation2 + $0x118] sm:$0x3] %vm228_vm1, %v4642_v0  ;;  %265 = vst.msk [vmem:[#allocation2 + $0x130] sm:$0x3] %vm228_vm1, %v4642_v0 }
  0x40   : > { %268 = vst.msk [vmem:[#allocation2 + $0x148] sm:$0x3] %vm228_vm1, %v4642_v0  ;;  %271 = vst.msk [vmem:[#allocation2 + $0x160] sm:$0x3] %vm228_vm1, %v4642_v0  ;;  %v348_v11 = vld [vmem:[#allocation2 + $0x10] sm:$0x3] }
  0x41   : > { %274 = vst.msk [vmem:[#allocation2 + $0x178] sm:$0x3] %vm228_vm1, %v4642_v0  ;;  %277 = vst.msk [vmem:[#allocation2 + $0x190] sm:$0x3] %vm228_vm1, %v4642_v0  ;;  %v635_v12 = vrot.slane %v348_v11, 2  ;;  %v458_v13 = vrot.slane %v348_v11, 1 }
  0x42   : > { %280 = vst.msk [vmem:[#allocation2 + $0x1a8] sm:$0x3] %vm228_vm1, %v4642_v0 }
  0x43   : > { %314 = vst.msk [vmem:[#allocation2 + $0x19] sm:$0xff] %vm225_vm0, %v281_v1  ;;  %315 = vst.msk [vmem:[#allocation2 + $0x21] sm:$0xff] %vm225_vm0, %v282_v2  ;;  %v636_v22 = vsel %vm631_vm2, %v633_v8, %v635_v12  ;;  %v459_v23 = vsel %vm454_vm3, %v456_v10, %v458_v13  ;;  %v295_v12 = vld [vmem:[%s4867_s24 + $0x70] sm:$0xff]  ;;  %v296_v13 = vld [vmem:[%s4867_s24 + $0x78] sm:$0xff] }
  0x44   : > { %316 = vst.msk [vmem:[#allocation2 + $0x31] sm:$0xff] %vm225_vm0, %v283_v3  ;;  %317 = vst.msk [vmem:[#allocation2 + $0x39] sm:$0xff] %vm225_vm0, %v284_v6  ;;  %714 = vrot.lane.b32.xlu1 %v636_v22, %s4643_s25  ;;  %537 = vrot.lane.b32.xlu0 %v459_v23, %s4644_s26 }
  0x45   : > { %318 = vst.msk [vmem:[#allocation2 + $0x49] sm:$0xff] %vm225_vm0, %v285_v14  ;;  %319 = vst.msk [vmem:[#allocation2 + $0x51] sm:$0xff] %vm225_vm0, %v286_v15 }
  0x46   : > { %320 = vst.msk [vmem:[#allocation2 + $0x61] sm:$0xff] %vm225_vm0, %v287_v16  ;;  %321 = vst.msk [vmem:[#allocation2 + $0x69] sm:$0xff] %vm225_vm0, %v288_v19 }
  0x47   : > { %322 = vst.msk [vmem:[#allocation2 + $0x79] sm:$0xff] %vm225_vm0, %v289_v20  ;;  %323 = vst.msk [vmem:[#allocation2 + $0x81] sm:$0xff] %vm225_vm0, %v290_v21 }
  0x48   : > { %324 = vst.msk [vmem:[#allocation2 + $0x91] sm:$0xff] %vm225_vm0, %v291_v36  ;;  %325 = vst.msk [vmem:[#allocation2 + $0x99] sm:$0xff] %vm225_vm0, %v292_v37 }
  0x49   : > { %326 = vst.msk [vmem:[#allocation2 + $0xa9] sm:$0xff] %vm225_vm0, %v293_v59  ;;  %327 = vst.msk [vmem:[#allocation2 + $0xb1] sm:$0xff] %vm225_vm0, %v294_v60 }
  0x4a   : > { %v4903_v24 = vld [vmem:[#allocation2 + $0x20] sm:$0xff]  ;;  %v4905_v25 = vld [vmem:[#allocation2 + $0x18] sm:$0xff]  ;;  %v351_v26 = vld [vmem:[#allocation2 + $0x28] sm:$0x3]  ;;  %328 = vst.msk [vmem:[#allocation2 + $0xc1] sm:$0xff] %vm225_vm0, %v295_v12 }
  0x4b   : > { %v461_v27 = vrot.slane %v4903_v24, 1  ;;  %v463_v28 = vrot.slane %v351_v26, 1  ;;  %v460_v29 = vrot.slane %v4905_v25, 1  ;;  %812 = vrot.lane.b32.xlu1 %v4903_v24, %s4645_s27  ;;  %810 = vrot.lane.b32.xlu0 %v4905_v25, %s4645_s27  ;;  %v638_v30 = vrot.slane %v4903_v24, 2  ;;  %v4921_v35 = vld [vmem:[#allocation2 + $0x38] sm:$0xff]  ;;  %v4927_v40 = vld [vmem:[#allocation2 + $0x30] sm:$0xff] }
  0x4c   : > { %v640_v33 = vrot.slane %v351_v26, 2  ;;  %v637_v34 = vrot.slane %v4905_v25, 2  ;;  %v354_v43 = vld [vmem:[#allocation2 + $0x40] sm:$0x3]  ;;  %v466_v47 = vrot.slane %v4921_v35, 1  ;;  %v465_v49 = vrot.slane %v4927_v40, 1 }
  0x4d   : > { %v464_v31 = vsel %vm454_vm3, %v461_v27, %v463_v28  ;;  %v462_v32 = vsel %vm454_vm3, %v460_v29, %v461_v27  ;;  %v468_v48 = vrot.slane %v354_v43, 1  ;;  %v642_v53 = vrot.slane %v4927_v40, 2  ;;  %v4978_v61 = vld [vmem:[#allocation2 + $0x50] sm:$0xff]  ;;  %v4980_v62 = vld [vmem:[#allocation2 + $0x48] sm:$0xff]  ;;  %v357_v63 = vld [vmem:[#allocation2 + $0x58] sm:$0x3] }
  0x4e   : > { %v641_v38 = vsel %vm631_vm2, %v638_v30, %v640_v33  ;;  %v639_v39 = vsel %vm631_vm2, %v637_v34, %v638_v30  ;;  %v467_v52 = vsel %vm454_vm3, %v465_v49, %v466_v47  ;;  %v643_v54 = vrot.slane %v4921_v35, 2  ;;  %329 = vst.msk [vmem:[#allocation2 + $0xc9] sm:$0xff] %vm225_vm0, %v296_v13  ;;  %v5014_v14 = vld [vmem:[#allocation2 + $0x68] sm:$0xff]  ;;  %v5016_v15 = vld [vmem:[#allocation2 + $0x60] sm:$0xff]  ;;  %v360_v16 = vld [vmem:[#allocation2 + $0x70] sm:$0x3] }
  0x4f   : > { %914 = vrot.lane.b32.xlu1 %v464_v31, %s4646_s28  ;;  %912 = vrot.lane.b32.xlu0 %v462_v32, %s4646_s28  ;;  %v469_v51 = vsel %vm454_vm3, %v466_v47, %v468_v48  ;;  %v645_v57 = vrot.slane %v354_v43, 2  ;;  %v471_v0 = vrot.slane %v4978_v61, 1  ;;  %v473_v1 = vrot.slane %v357_v63, 1  ;;  %v297_v29 = vld [vmem:[%s4867_s24 + $0x80] sm:$0xff]  ;;  %v298_v30 = vld [vmem:[%s4867_s24 + $0x88] sm:$0xff]  ;;  %v5112_v12 = vld [vmem:[#allocation2 + $0x98] sm:$0xff] }
  0x50   : > { %v644_v56 = vsel %vm631_vm2, %v642_v53, %v643_v54  ;;  %v470_v2 = vrot.slane %v4980_v62, 1  ;;  %v647_v7 = vrot.slane %v4980_v62, 2  ;;  %v648_v8 = vrot.slane %v4978_v61, 2  ;;  %330 = vst.msk [vmem:[#allocation2 + $0xd9] sm:$0xff] %vm225_vm0, %v297_v29  ;;  %331 = vst.msk [vmem:[#allocation2 + $0xe1] sm:$0xff] %vm225_vm0, %v298_v30  ;;  %v5114_v13 = vld [vmem:[#allocation2 + $0x90] sm:$0xff] }
  0x51   : > { %v646_v58 = vsel %vm631_vm2, %v643_v54, %v645_v57  ;;  %v474_v3 = vsel %vm454_vm3, %v471_v0, %v473_v1  ;;  %v650_v10 = vrot.slane %v357_v63, 2  ;;  %v476_v17 = vrot.slane %v5014_v14, 1  ;;  %v363_v33 = vld [vmem:[#allocation2 + $0x88] sm:$0x3] }
  0x52   : > { %v472_v6 = vsel %vm454_vm3, %v470_v2, %v471_v0  ;;  %v649_v9 = vsel %vm631_vm2, %v647_v7, %v648_v8  ;;  %v478_v18 = vrot.slane %v360_v16, 1  ;;  %v475_v19 = vrot.slane %v5016_v15, 1 }
  0x53   : > { %1015 = vrot.lane.b32.xlu1 %v641_v38, %s4647_s12  ;;  %1013 = vrot.lane.b32.xlu0 %v639_v39, %s4647_s12  ;;  %v651_v11 = vsel %vm631_vm2, %v648_v8, %v650_v10  ;;  %v652_v22 = vrot.slane %v5016_v15, 2  ;;  %v653_v23 = vrot.slane %v5014_v14, 2  ;;  %v655_v27 = vrot.slane %v360_v16, 2  ;;  %v366_v16 = vld [vmem:[#allocation2 + $0xa0] sm:$0x3] }
  0x54   : > { %v479_v20 = vsel %vm454_vm3, %v476_v17, %v478_v18  ;;  %v477_v21 = vsel %vm454_vm3, %v475_v19, %v476_v17  ;;  %v483_v36 = vrot.slane %v363_v33, 1  ;;  %v660_v48 = vrot.slane %v363_v33, 2 }
  0x55   : > { %v654_v26 = vsel %vm631_vm2, %v652_v22, %v653_v23  ;;  %v656_v28 = vsel %vm631_vm2, %v653_v23, %v655_v27  ;;  %v488_v22 = vrot.slane %v366_v16, 1  ;;  %v485_v23 = vrot.slane %v5114_v13, 1 }
  0x57   : > { %1113 = vrot.lane.b32.xlu1 %v4921_v35, %s4648_s13  ;;  %1111 = vrot.lane.b32.xlu0 %v4927_v40, %s4648_s13 }
  0x5b   : > { %1215 = vrot.lane.b32.xlu1 %v469_v51, %s4649_s16  ;;  %1213 = vrot.lane.b32.xlu0 %v467_v52, %s4649_s16 }
  0x5f   : > { %539 = vrot.lane.b32.xlu1 %v462_v32, %s4644_s26  ;;  %1314 = vrot.lane.b32.xlu0 %v644_v56, %s4650_s17  ;;  %v5052_v32 = vld [vmem:[#allocation2 + $0x78] sm:$0xff] }
  0x60   : > { %v480_v37 = vrot.slane %v5052_v32, 1  ;;  %v657_v43 = vrot.slane %v5052_v32, 2 }
  0x63   : > { %541 = vrot.lane.b32.xlu1 %v464_v31, %s4644_s26  ;;  %1316 = vrot.lane.b32.xlu0 %v646_v58, %s4650_s17  ;;  %v5050_v31 = vld [vmem:[#allocation2 + $0x80] sm:$0xff] }
  0x64   : > { %v481_v34 = vrot.slane %v5050_v31, 1  ;;  %v658_v44 = vrot.slane %v5050_v31, 2 }
  0x66   : > { %v5063_v41 = vsel %vm454_vm3, %v481_v34, %v483_v36  ;;  %v5066_v42 = vsel %vm454_vm3, %v480_v37, %v481_v34  ;;  %v5075_v47 = vsel %vm631_vm2, %v657_v43, %v658_v44  ;;  %v662_v34 = vrot.slane %v5114_v13, 2 }
  0x67   : > { %718 = vrot.lane.b32.xlu1 %v641_v38, %s4643_s25  ;;  %716 = vrot.lane.b32.xlu0 %v639_v39, %s4643_s25  ;;  %v663_v36 = vrot.slane %v5112_v12, 2  ;;  %v665_v43 = vrot.slane %v366_v16, 2 }
  0x6b   : > { %816 = vrot.lane.b32.xlu1 %v4921_v35, %s4645_s27  ;;  %814 = vrot.lane.b32.xlu0 %v4927_v40, %s4645_s27 }
  0x6f   : > { %918 = vrot.lane.b32.xlu1 %v469_v51, %s4646_s28  ;;  %916 = vrot.lane.b32.xlu0 %v467_v52, %s4646_s28 }
  0x73   : > { %1019 = vrot.lane.b32.xlu1 %v646_v58, %s4647_s12  ;;  %1017 = vrot.lane.b32.xlu0 %v644_v56, %s4647_s12 }
  0x77   : > { %1117 = vrot.lane.b32.xlu1 %v4978_v61, %s4648_s13  ;;  %1115 = vrot.lane.b32.xlu0 %v4980_v62, %s4648_s13 }
  0x7b   : > { %1219 = vrot.lane.b32.xlu1 %v474_v3, %s4649_s16  ;;  %1217 = vrot.lane.b32.xlu0 %v472_v6, %s4649_s16 }
  0x7f   : > { %543 = vrot.lane.b32.xlu1 %v467_v52, %s4644_s26  ;;  %1318 = vrot.lane.b32.xlu0 %v649_v9, %s4650_s17 }
  0x83   : > { %545 = vrot.lane.b32.xlu1 %v469_v51, %s4644_s26  ;;  %1320 = vrot.lane.b32.xlu0 %v651_v11, %s4650_s17  ;;  %v5081_v51 = vsel %vm631_vm2, %v658_v44, %v660_v48 }
  0x87   : > { %722 = vrot.lane.b32.xlu1 %v646_v58, %s4643_s25  ;;  %720 = vrot.lane.b32.xlu0 %v644_v56, %s4643_s25 }
  0x8b   : > { %820 = vrot.lane.b32.xlu1 %v4978_v61, %s4645_s27  ;;  %818 = vrot.lane.b32.xlu0 %v4980_v62, %s4645_s27  ;;  %v713_v38 = vpop.permute.xlu1 %712  ;;  %v536_v39 = vpop.permute.xlu0 %535 }
  0x8c   : > { %v1410_v56 = vsel %vm225_vm0, %v4872_v4, %v536_v39  ;;  %v5147_v39 = vsel %vm631_vm2, %v662_v34, %v663_v36 }
  0x8d   : > { %v1443_v59 = vsel %vm1442_vm5, %v1410_v56, %v713_v38 }
  0x8f   : > { %922 = vrot.lane.b32.xlu1 %v474_v3, %s4646_s28  ;;  %920 = vrot.lane.b32.xlu0 %v472_v6, %s4646_s28 }
  0x93   : > { %1023 = vrot.lane.b32.xlu1 %v651_v11, %s4647_s12  ;;  %1021 = vrot.lane.b32.xlu0 %v649_v9, %s4647_s12 }
  0x97   : > { %1121 = vrot.lane.b32.xlu1 %v5014_v14, %s4648_s13  ;;  %1119 = vrot.lane.b32.xlu0 %v5016_v15, %s4648_s13 }
  0x9b   : > { %1223 = vrot.lane.b32.xlu1 %v479_v20, %s4649_s16  ;;  %1221 = vrot.lane.b32.xlu0 %v477_v21, %s4649_s16 }
  0x9f   : > { %547 = vrot.lane.b32.xlu1 %v472_v6, %s4644_s26  ;;  %1322 = vrot.lane.b32.xlu0 %v654_v26, %s4650_s17  ;;  %v300_v6 = vld [vmem:[%s4867_s24 + $0x98] sm:$0xff] }
  0xa0   : > { %333 = vst.msk [vmem:[#allocation2 + $0xf9] sm:$0xff] %vm225_vm0, %v300_v6  ;;  %v5192_v6 = vld [vmem:[#allocation2 + $0xa8] sm:$0xff] }
  0xa1   : > { %v490_v16 = vrot.slane %v5192_v6, 1 }
  0xa3   : > { %549 = vrot.lane.b32.xlu1 %v474_v3, %s4644_s26  ;;  %1324 = vrot.lane.b32.xlu0 %v656_v28, %s4650_s17  ;;  %v299_v3 = vld [vmem:[%s4867_s24 + $0x90] sm:$0xff] }
  0xa4   : > { %332 = vst.msk [vmem:[#allocation2 + $0xf1] sm:$0xff] %vm225_vm0, %v299_v3 }
  0xa7   : > { %726 = vrot.lane.b32.xlu1 %v651_v11, %s4643_s25  ;;  %724 = vrot.lane.b32.xlu0 %v649_v9, %s4643_s25 }
  0xab   : > { %824 = vrot.lane.b32.xlu1 %v5014_v14, %s4645_s27  ;;  %822 = vrot.lane.b32.xlu0 %v5016_v15, %s4645_s27 }
  0xaf   : > { %926 = vrot.lane.b32.xlu1 %v479_v20, %s4646_s28  ;;  %924 = vrot.lane.b32.xlu0 %v477_v21, %s4646_s28 }
  0xb3   : > { %1027 = vrot.lane.b32.xlu1 %v656_v28, %s4647_s12  ;;  %1025 = vrot.lane.b32.xlu0 %v654_v26, %s4647_s12 }
  0xb6   : > { %v715_v45 = vpop.permute.xlu1 %714  ;;  %v538_v46 = vpop.permute.xlu0 %537 }
  0xb7   : > { %1125 = vrot.lane.b32.xlu1 %v5050_v31, %s4648_s13  ;;  %1123 = vrot.lane.b32.xlu0 %v5052_v32, %s4648_s13  ;;  %v1411_v60 = vsel %vm225_vm0, %v4874_v5, %v538_v46  ;;  %v5154_v46 = vsel %vm631_vm2, %v663_v36, %v665_v43  ;;  %v7531_v36 = vmov 0.0|0.0  }
  0xb8   : > { %v1444_v5 = vsel %vm1442_vm5, %v1411_v60, %v715_v45  ;;  %4206 = vmatprep.subr.bf16.mxu1 %v7531_v36  ;;  %4158 = vmatprep.subr.bf16.mxu0 %v7531_v36 }
  0xbb   : > { %1227 = vrot.lane.b32.xlu1 %v5063_v41, %s4649_s16  ;;  %1225 = vrot.lane.b32.xlu0 %v5066_v42, %s4649_s16 }
  0xbd   : > { %v813_v49 = vpop.permute.xlu1 %812  ;;  %v811_v50 = vpop.permute.xlu0 %810 }
  0xbe   : > { %v1476_v4 = vsel %vm1475_vm6, %v1443_v59, %v811_v50  ;;  %v1477_v8 = vsel %vm1475_vm6, %v1444_v5, %v813_v49  ;;  %v302_v59 = vld [vmem:[%s4867_s24 + $0xa8] sm:$0xff] }
  0xbf   : > { %551 = vrot.lane.b32.xlu1 %v477_v21, %s4644_s26  ;;  %1326 = vrot.lane.b32.xlu0 %v5075_v47, %s4650_s17  ;;  %v486_v21 = vrot.slane %v5112_v12, 1  ;;  %335 = vst.msk [vmem:[#allocation2 + $0x111] sm:$0xff] %vm225_vm0, %v302_v59 }
  0xc1   : > { %v915_v52 = vpop.permute.xlu1 %914  ;;  %v913_v53 = vpop.permute.xlu0 %912  ;;  %v5135_v30 = vsel %vm454_vm3, %v486_v21, %v488_v22  ;;  %v5138_v33 = vsel %vm454_vm3, %v485_v23, %v486_v21  ;;  %v667_v23 = vrot.slane %v5192_v6, 2 }
  0xc2   : > { %v1509_v1 = vsel %vm1508_vm7, %v1476_v4, %v913_v53  ;;  %v1510_v17 = vsel %vm1508_vm7, %v1477_v8, %v915_v52 }
  0xc3   : > { %553 = vrot.lane.b32.xlu1 %v479_v20, %s4644_s26  ;;  %1328 = vrot.lane.b32.xlu0 %v5081_v51, %s4650_s17 }
  0xc5   : > { %v1016_v54 = vpop.permute.xlu1 %1015  ;;  %v1014_v55 = vpop.permute.xlu0 %1013 }
  0xc6   : > { %v1542_v2 = vsel %vm1541_vm8, %v1509_v1, %v1014_v55  ;;  %v1543_v19 = vsel %vm1541_vm8, %v1510_v17, %v1016_v54 }
  0xc7   : > { %730 = vrot.lane.b32.xlu1 %v656_v28, %s4643_s25  ;;  %728 = vrot.lane.b32.xlu0 %v654_v26, %s4643_s25 }
  0xc9   : > { %v1114_v57 = vpop.permute.xlu1 %1113  ;;  %v1112_v58 = vpop.permute.xlu0 %1111 }
  0xca   : > { %v1575_v7 = vsel %vm1574_vm9, %v1542_v2, %v1112_v58  ;;  %v1576_v20 = vsel %vm1574_vm9, %v1543_v19, %v1114_v57 }
  0xcb   : > { %828 = vrot.lane.b32.xlu1 %v5050_v31, %s4645_s27  ;;  %826 = vrot.lane.b32.xlu0 %v5052_v32, %s4645_s27 }
  0xcd   : > { %v1216_v63 = vpop.permute.xlu1 %1215  ;;  %v1214_v0 = vpop.permute.xlu0 %1213 }
  0xce   : > { %v1608_v9 = vsel %vm1607_vm10, %v1575_v7, %v1214_v0  ;;  %v1609_v26 = vsel %vm1607_vm10, %v1576_v20, %v1216_v63  ;;  %v5184_v63 = vld [vmem:[#allocation2 + $0xb0] sm:$0xff]  ;;  %v369_v0 = vld [vmem:[#allocation2 + $0xb8] sm:$0x3] }
  0xcf   : > { %930 = vrot.lane.b32.xlu1 %v5063_v41, %s4646_s28  ;;  %928 = vrot.lane.b32.xlu0 %v5066_v42, %s4646_s28  ;;  %v670_v43 = vrot.slane %v369_v0, 2 }
  0xd1   : > { %v540_v10 = vpop.permute.xlu1 %539  ;;  %v1315_v11 = vpop.permute.xlu0 %1314 }
  0xd2   : > { %v1641_v18 = vsel %vm1640_vm11, %v1608_v9, %v1315_v11  ;;  %v1412_v54 = vsel %vm225_vm0, %v4905_v25, %v540_v10  ;;  %v301_v25 = vld [vmem:[%s4867_s24 + $0xa0] sm:$0xff]  ;;  %v491_v9 = vrot.slane %v5184_v63, 1  ;;  %v493_v10 = vrot.slane %v369_v0, 1  ;;  %v2221_v0 = vld [vmem:[%s7528_s3 + $0x158] sm:$0xff] }
  0xd3   : > { %1031 = vrot.lane.b32.xlu1 %v5081_v51, %s4647_s12  ;;  %1029 = vrot.lane.b32.xlu0 %v5075_v47, %s4647_s12  ;;  %334 = vst.msk [vmem:[#allocation2 + $0x109] sm:$0xff] %vm225_vm0, %v301_v25 }
  0xd4   : > { %4022 = vmatprep.mubr.msk.f32.mxu0 %vm1679_vm12, %v1641_v18  ;;  %v5214_v21 = vsel %vm454_vm3, %v491_v9, %v493_v10  ;;  %v5218_v22 = vsel %vm454_vm3, %v490_v16, %v491_v9  ;;  %v304_v9 = vld [vmem:[%s4867_s24 + $0xb8] sm:$0xff]  ;;  %v2223_v16 = vld [vmem:[%s7528_s3 + $0x168] sm:$0xff] }
  0xd5   : > { %v542_v27 = vpop.permute.xlu1 %541  ;;  %v1317_v28 = vpop.permute.xlu0 %1316  ;;  %337 = vst.msk [vmem:[#allocation2 + $0x129] sm:$0xff] %vm225_vm0, %v304_v9  ;;  %v2233_v9 = vld [vmem:[%s7528_s3 + $0x1b8] sm:$0xff] }
  0xd6   : > { %v1642_v29 = vsel %vm1640_vm11, %v1609_v26, %v1317_v28  ;;  %v1413_v57 = vsel %vm225_vm0, %v4903_v24, %v542_v27  ;;  %v668_v26 = vrot.slane %v5184_v63, 2  ;;  %v2210_v27 = vld [vmem:[%s7528_s3 + $0x100] sm:$0xff]  ;;  %v2211_v28 = vld [vmem:[%s7528_s3 + $0x108] sm:$0xff] }
  0xd7   : > { %1129 = vrot.lane.b32.xlu1 %v5112_v12, %s4648_s13  ;;  %1127 = vrot.lane.b32.xlu0 %v5114_v13, %s4648_s13 }
  0xd8   : > { %4023 = vmatmul.mubr.msk.f32.vlgmr.msra.gmra.mrb[0].mxu0 %vm1679_vm12, %v1642_v29 }
  0xd9   : > { %v719_v37 = vpop.permute.xlu1 %718  ;;  %v717_v38 = vpop.permute.xlu0 %716 }
  0xda   : > { %v1446_v60 = vsel %vm1442_vm5, %v1413_v57, %v719_v37  ;;  %v4207_v37 = vpack.c.bf16 %v2211_v28, %v2210_v27  ;;  %v372_v27 = vld [vmem:[#allocation2 + $0xd0] sm:$0x3] }
  0xdb   : > { %1231 = vrot.lane.b32.xlu1 %v5135_v30, %s4649_s16  ;;  %1229 = vrot.lane.b32.xlu0 %v5138_v33, %s4649_s16 }
  0xdc   : > { %4208 = vmatpush1.bf16.msra.mxu1 %v4207_v37 }
  0xdd   : > { %v817_v44 = vpop.permute.xlu1 %816  ;;  %v815_v45 = vpop.permute.xlu0 %814  ;;  %4209 = vmatprep.subr.bf16.mxu1 %v7531_v36 }
  0xde   : > { %v1479_v24 = vsel %vm1475_vm6, %v1446_v60, %v817_v44  ;;  %v2212_v44 = vld [vmem:[%s7528_s3 + $0x110] sm:$0xff] }
  0xdf   : > { %555 = vrot.lane.b32.xlu1 %v5066_v42, %s4644_s26  ;;  %1330 = vrot.lane.b32.xlu0 %v5147_v39, %s4650_s17 }
  0xe1   : > { %v919_v48 = vpop.permute.xlu1 %918  ;;  %v917_v49 = vpop.permute.xlu0 %916 }
  0xe2   : > { %v1512_v5 = vsel %vm1508_vm7, %v1479_v24, %v919_v48 }
  0xe3   : > { %557 = vrot.lane.b32.xlu1 %v5063_v41, %s4644_s26  ;;  %1332 = vrot.lane.b32.xlu0 %v5154_v46, %s4650_s17  ;;  %v1445_v41 = vsel %vm1442_vm5, %v1412_v54, %v717_v38  ;;  %v5237_v38 = vsel %vm631_vm2, %v667_v23, %v668_v26  ;;  %v5324_v23 = vld [vmem:[#allocation2 + $0xc8] sm:$0xff] }
  0xe5   : > { %v1020_v50 = vpop.permute.xlu1 %1019  ;;  %v1018_v52 = vpop.permute.xlu0 %1017 }
  0xe6   : > { %v1545_v8 = vsel %vm1541_vm8, %v1512_v5, %v1020_v50 }
  0xe7   : > { %734 = vrot.lane.b32.xlu1 %v5081_v51, %s4643_s25  ;;  %732 = vrot.lane.b32.xlu0 %v5075_v47, %s4643_s25  ;;  %v1478_v51 = vsel %vm1475_vm6, %v1445_v41, %v815_v45  ;;  %v2213_v45 = vld [vmem:[%s7528_s3 + $0x118] sm:$0xff] }
  0xe8   : > { %v1511_v47 = vsel %vm1508_vm7, %v1478_v51, %v917_v49  ;;  %v4210_v50 = vpack.c.bf16 %v2213_v45, %v2212_v44  ;;  %v2216_v51 = vld [vmem:[%s7528_s3 + $0x130] sm:$0xff]  ;;  %v496_v44 = vrot.slane %v5324_v23, 1  ;;  %v498_v45 = vrot.slane %v372_v27, 1 }
  0xe9   : > { %v1118_v42 = vpop.permute.xlu1 %1117  ;;  %v1116_v53 = vpop.permute.xlu0 %1115  ;;  %v1544_v58 = vsel %vm1541_vm8, %v1511_v47, %v1018_v52  ;;  %v5251_v52 = vsel %vm631_vm2, %v668_v26, %v670_v43  ;;  %v5326_v26 = vld [vmem:[#allocation2 + $0xc0] sm:$0xff] }
  0xea   : > { %v1577_v4 = vsel %vm1574_vm9, %v1544_v58, %v1116_v53  ;;  %v1578_v11 = vsel %vm1574_vm9, %v1545_v8, %v1118_v42  ;;  %4211 = vmatpush1.bf16.msra.mxu1 %v4210_v50  ;;  %v2214_v42 = vld [vmem:[%s7528_s3 + $0x120] sm:$0xff]  ;;  %v2215_v53 = vld [vmem:[%s7528_s3 + $0x128] sm:$0xff]  ;;  %v303_v8 = vld [vmem:[%s4867_s24 + $0xb0] sm:$0xff] }
  0xeb   : > { %832 = vrot.lane.b32.xlu1 %v5112_v12, %s4645_s27  ;;  %830 = vrot.lane.b32.xlu0 %v5114_v13, %s4645_s27  ;;  %v2219_v58 = vld [vmem:[%s7528_s3 + $0x148] sm:$0xff]  ;;  %336 = vst.msk [vmem:[#allocation2 + $0x121] sm:$0xff] %vm225_vm0, %v303_v8  ;;  %v2225_v50 = vld [vmem:[%s7528_s3 + $0x178] sm:$0xff] }
  0xec   : > { %4212 = vmatprep.subr.bf16.mxu1 %v7531_v36  ;;  %v2232_v8 = vld [vmem:[%s7528_s3 + $0x1b0] sm:$0xff] }
  0xed   : > { %v1220_v55 = vpop.permute.xlu1 %1219  ;;  %v1218_v56 = vpop.permute.xlu0 %1217 }
  0xee   : > { %v1610_v1 = vsel %vm1607_vm10, %v1577_v4, %v1218_v56  ;;  %v1611_v17 = vsel %vm1607_vm10, %v1578_v11, %v1220_v55  ;;  %v2217_v55 = vld [vmem:[%s7528_s3 + $0x138] sm:$0xff]  ;;  %v2220_v4 = vld [vmem:[%s7528_s3 + $0x150] sm:$0xff] }
  0xef   : > { %934 = vrot.lane.b32.xlu1 %v5135_v30, %s4646_s28  ;;  %932 = vrot.lane.b32.xlu0 %v5138_v33, %s4646_s28  ;;  %v4216_v57 = vpack.c.bf16 %v2217_v55, %v2216_v51  ;;  %v5357_v51 = vsel %vm454_vm3, %v496_v44, %v498_v45  ;;  %v305_v45 = vld [vmem:[%s4867_s24 + $0xc0] sm:$0xff] }
  0xf0   : > { %338 = vst.msk [vmem:[#allocation2 + $0x139] sm:$0xff] %vm225_vm0, %v305_v45  ;;  %v308_v45 = vld [vmem:[%s4867_s24 + $0xd8] sm:$0xff] }
  0xf1   : > { %v5190_v2 = vpop.permute.xlu1 %543  ;;  %v1319_v3 = vpop.permute.xlu0 %1318  ;;  %341 = vst.msk [vmem:[#allocation2 + $0x159] sm:$0xff] %vm225_vm0, %v308_v45  ;;  %v379_v45 = vld [vmem:[#allocation2 + $0x108] sm:$0xff] }
  0xf2   : > { %v1643_v7 = vsel %vm1640_vm11, %v1610_v1, %v1319_v3 }
  0xf3   : > { %1035 = vrot.lane.b32.xlu1 %v5154_v46, %s4647_s12  ;;  %1033 = vrot.lane.b32.xlu0 %v5147_v39, %s4647_s12 }
  0xf4   : > { %4025 = vmatprep.mubr.msk.f32.mxu0 %vm1679_vm12, %v1643_v7 }
  0xf5   : > { %v5206_v18 = vpop.permute.xlu1 %545  ;;  %v1321_v19 = vpop.permute.xlu0 %1320 }
  0xf6   : > { %v1644_v20 = vsel %vm1640_vm11, %v1611_v17, %v1321_v19  ;;  %v1415_v5 = vsel %vm225_vm0, %v4921_v35, %v5206_v18  ;;  %v2222_v35 = vld [vmem:[%s7528_s3 + $0x160] sm:$0xff] }
  0xf7   : > { %1133 = vrot.lane.b32.xlu1 %v5184_v63, %s4648_s13  ;;  %1131 = vrot.lane.b32.xlu0 %v5192_v6, %s4648_s13  ;;  %v4225_v28 = vpack.c.bf16 %v2223_v16, %v2222_v35  ;;  %v4240_v35 = vpack.c.bf16 %v2233_v9, %v2232_v8  ;;  %v2235_v16 = vld [vmem:[%s7528_s3 + $0x1c8] sm:$0xff] }
  0xf8   : > { %4026 = vmatmul.mubr.msk.f32.gmra.mrb[2].mxu0 %vm1679_vm12, %v1644_v20 }
  0xf9   : > { %v5228_v29 = vpop.permute.xlu1 %722  ;;  %v721_v34 = vpop.permute.xlu0 %720 }
  0xfa   : > { %v1448_v10 = vsel %vm1442_vm5, %v1415_v5, %v5228_v29 }
  0xfb   : > { %1235 = vrot.lane.b32.xlu1 %v5214_v21, %s4649_s16  ;;  %1233 = vrot.lane.b32.xlu0 %v5218_v22, %s4649_s16 }
  0xfd   : > { %v821_v48 = vpop.permute.xlu1 %820  ;;  %v819_v49 = vpop.permute.xlu0 %818 }
  0xfe   : > { %v1481_v17 = vsel %vm1475_vm6, %v1448_v10, %v821_v48  ;;  %v495_v48 = vrot.slane %v5326_v26, 1 }
  0xff   : > { %559 = vrot.lane.b32.xlu1 %v5138_v33, %s4644_s26  ;;  %1334 = vrot.lane.b32.xlu0 %v5237_v38, %s4650_s17  ;;  %v4213_v33 = vpack.c.bf16 %v2215_v53, %v2214_v42 }
 0x100   : > { %v5360_v55 = vsel %vm454_vm3, %v495_v48, %v496_v44  ;;  %v306_v48 = vld [vmem:[%s4867_s24 + $0xc8] sm:$0xff] }
 0x101   : > { %v923_v54 = vpop.permute.xlu1 %922  ;;  %v921_v41 = vpop.permute.xlu0 %920  ;;  %4214 = vmatpush1.bf16.msra.mxu1 %v4213_v33  ;;  %339 = vst.msk [vmem:[#allocation2 + $0x141] sm:$0xff] %vm225_vm0, %v306_v48 }
 0x102   : > { %4215 = vmatprep.subr.bf16.mxu1 %v7531_v36  ;;  %v1514_v29 = vsel %vm1508_vm7, %v1481_v17, %v923_v54 }
 0x103   : > { %561 = vrot.lane.b32.xlu1 %v5135_v30, %s4644_s26  ;;  %1336 = vrot.lane.b32.xlu0 %v5251_v52, %s4650_s17  ;;  %v2218_v30 = vld [vmem:[%s7528_s3 + $0x140] sm:$0xff] }
 0x104   : > { %v4219_v60 = vpack.c.bf16 %v2219_v58, %v2218_v30  ;;  %v2227_v30 = vld [vmem:[%s7528_s3 + $0x188] sm:$0xff] }
 0x105   : > { %v1024_v56 = vpop.permute.xlu1 %1023  ;;  %v1022_v47 = vpop.permute.xlu0 %1021  ;;  %4217 = vmatpush1.bf16.msra.mxu1 %v4216_v57  ;;  %v2226_v57 = vld [vmem:[%s7528_s3 + $0x180] sm:$0xff] }
 0x106   : > { %4218 = vmatprep.subr.bf16.mxu1 %v7531_v36  ;;  %v1547_v37 = vsel %vm1541_vm8, %v1514_v29, %v1024_v56  ;;  %v672_v56 = vrot.slane %v5326_v26, 2 }
 0x107   : > { %738 = vrot.lane.b32.xlu1 %v5154_v46, %s4643_s25  ;;  %736 = vrot.lane.b32.xlu0 %v5147_v39, %s4643_s25  ;;  %v1414_v46 = vsel %vm225_vm0, %v4927_v40, %v5190_v2  ;;  %v4222_v2 = vpack.c.bf16 %v2221_v0, %v2220_v4  ;;  %v2229_v4 = vld [vmem:[%s7528_s3 + $0x198] sm:$0xff] }
 0x108   : > { %v1447_v39 = vsel %vm1442_vm5, %v1414_v46, %v721_v34  ;;  %v675_v46 = vrot.slane %v372_v27, 2  ;;  %v2236_v27 = vld [vmem:[%s7528_s3 + $0x1d0] sm:$0xff] }
 0x109   : > { %v1122_v25 = vpop.permute.xlu1 %1121  ;;  %v1120_v59 = vpop.permute.xlu0 %1119  ;;  %4220 = vmatpush1.bf16.msra.mxu1 %v4219_v60  ;;  %v1480_v40 = vsel %vm1475_vm6, %v1447_v39, %v819_v49  ;;  %v2224_v49 = vld [vmem:[%s7528_s3 + $0x170] sm:$0xff] }
 0x10a   : > { %4221 = vmatprep.subr.bf16.mxu1 %v7531_v36  ;;  %v1513_v3 = vsel %vm1508_vm7, %v1480_v40, %v921_v41  ;;  %v1580_v43 = vsel %vm1574_vm9, %v1547_v37, %v1122_v25  ;;  %v4228_v41 = vpack.c.bf16 %v2225_v50, %v2224_v49  ;;  %v2228_v39 = vld [vmem:[%s7528_s3 + $0x190] sm:$0xff] }
 0x10b   : > { %836 = vrot.lane.b32.xlu1 %v5184_v63, %s4645_s27  ;;  %834 = vrot.lane.b32.xlu0 %v5192_v6, %s4645_s27  ;;  %v1546_v7 = vsel %vm1541_vm8, %v1513_v3, %v1022_v47  ;;  %v673_v47 = vrot.slane %v5324_v23, 2  ;;  %v2231_v3 = vld [vmem:[%s7528_s3 + $0x1a8] sm:$0xff] }
 0x10c   : > { %v1579_v11 = vsel %vm1574_vm9, %v1546_v7, %v1120_v59  ;;  %v4231_v59 = vpack.c.bf16 %v2227_v30, %v2226_v57  ;;  %v375_v57 = vld [vmem:[#allocation2 + $0xe8] sm:$0x3] }
 0x10d   : > { %v1224_v24 = vpop.permute.xlu1 %1223  ;;  %v1222_v1 = vpop.permute.xlu0 %1221  ;;  %4223 = vmatpush1.bf16.msra.mxu1 %v4222_v2  ;;  %v5378_v60 = vsel %vm631_vm2, %v672_v56, %v673_v47  ;;  %v2230_v2 = vld [vmem:[%s7528_s3 + $0x1a0] sm:$0xff] }
 0x10e   : > { %v1612_v18 = vsel %vm1607_vm10, %v1579_v11, %v1222_v1  ;;  %4224 = vmatprep.subr.bf16.mxu1 %v7531_v36  ;;  %v1613_v42 = vsel %vm1607_vm10, %v1580_v43, %v1224_v24  ;;  %v4234_v24 = vpack.c.bf16 %v2229_v4, %v2228_v39  ;;  %v5392_v1 = vsel %vm631_vm2, %v673_v47, %v675_v46  ;;  %v5463_v56 = vld [vmem:[#allocation2 + $0xe0] sm:$0xff]  ;;  %v5465_v47 = vld [vmem:[#allocation2 + $0xd8] sm:$0xff] }
 0x10f   : > { %938 = vrot.lane.b32.xlu1 %v5214_v21, %s4646_s28  ;;  %936 = vrot.lane.b32.xlu0 %v5218_v22, %s4646_s28  ;;  %v501_v39 = vrot.slane %v5463_v56, 1  ;;  %v503_v4 = vrot.slane %v375_v57, 1 }
 0x111   : > { %v5322_v19 = vpop.permute.xlu1 %547  ;;  %v1323_v20 = vpop.permute.xlu0 %1322  ;;  %4226 = vmatpush1.bf16.msra.mxu1 %v4225_v28  ;;  %v2237_v28 = vld [vmem:[%s7528_s3 + $0x1d8] sm:$0xff]  ;;  %v5494_v8 = vsel %vm454_vm3, %v501_v39, %v503_v4 }
 0x112   : > { %v1645_v34 = vsel %vm1640_vm11, %v1612_v18, %v1323_v20  ;;  %4227 = vmatprep.subr.bf16.mxu1 %v7531_v36 }
 0x113   : > { %1039 = vrot.lane.b32.xlu1 %v5251_v52, %s4647_s12  ;;  %1037 = vrot.lane.b32.xlu0 %v5237_v38, %s4647_s12 }
 0x114   : > { %4028 = vmatprep.mubr.msk.f32.mxu0 %vm1679_vm12, %v1645_v34  ;;  %v4246_v34 = vpack.c.bf16 %v2237_v28, %v2236_v27 }
 0x115   : > { %v5347_v53 = vpop.permute.xlu1 %549  ;;  %v1325_v54 = vpop.permute.xlu0 %1324  ;;  %4229 = vmatpush1.bf16.msra.mxu1 %v4228_v41 }
 0x116   : > { %v1646_v33 = vsel %vm1640_vm11, %v1613_v42, %v1325_v54  ;;  %4230 = vmatprep.subr.bf16.mxu1 %v7531_v36  ;;  %v1417_v43 = vsel %vm225_vm0, %v4978_v61, %v5347_v53  ;;  %v2238_v61 = vld [vmem:[%s7528_s3 + $0x1e0] sm:$0xff]  ;;  %v2239_v42 = vld [vmem:[%s7528_s3 + $0x1e8] sm:$0xff] }
 0x117   : > { %1137 = vrot.lane.b32.xlu1 %v5324_v23, %s4648_s13  ;;  %1135 = vrot.lane.b32.xlu0 %v5326_v26, %s4648_s13  ;;  %v4249_v30 = vpack.c.bf16 %v2239_v42, %v2238_v61 }
 0x118   : > { %4029 = vmatmul.mubr.msk.f32.gmra.mrb[4].mxu0 %vm1679_vm12, %v1646_v33 }
 0x119   : > { %v5370_v58 = vpop.permute.xlu1 %726  ;;  %v725_v25 = vpop.permute.xlu0 %724  ;;  %4232 = vmatpush1.bf16.msra.mxu1 %v4231_v59 }
 0x11a   : > { %4233 = vmatprep.subr.bf16.mxu1 %v7531_v36  ;;  %v1450_v49 = vsel %vm1442_vm5, %v1417_v43, %v5370_v58 }
 0x11b   : > { %1239 = vrot.lane.b32.xlu1 %v5357_v51, %s4649_s16  ;;  %1237 = vrot.lane.b32.xlu0 %v5360_v55, %s4649_s16 }
 0x11d   : > { %v825_v0 = vpop.permute.xlu1 %824  ;;  %v823_v40 = vpop.permute.xlu0 %822  ;;  %4235 = vmatpush1.bf16.msra.mxu1 %v4234_v24  ;;  %v2241_v24 = vld [vmem:[%s7528_s3 + $0x1f8] sm:$0xff] }
 0x11e   : > { %4236 = vmatprep.subr.bf16.mxu1 %v7531_v36  ;;  %v1483_v53 = vsel %vm1475_vm6, %v1450_v49, %v825_v0  ;;  %v500_v0 = vrot.slane %v5465_v47, 1 }
 0x11f   : > { %563 = vrot.lane.b32.xlu1 %v5218_v22, %s4644_s26  ;;  %1338 = vrot.lane.b32.xlu0 %v5378_v60, %s4650_s17  ;;  %v4237_v22 = vpack.c.bf16 %v2231_v3, %v2230_v2 }
 0x120   : > { %v5497_v9 = vsel %vm454_vm3, %v500_v0, %v501_v39 }
 0x121   : > { %v927_v5 = vpop.permute.xlu1 %926  ;;  %v925_v7 = vpop.permute.xlu0 %924  ;;  %4238 = vmatpush1.bf16.msra.mxu1 %v4237_v22 }
 0x122   : > { %4239 = vmatprep.subr.bf16.mxu1 %v7531_v36  ;;  %v1516_v58 = vsel %vm1508_vm7, %v1483_v53, %v927_v5  ;;  %v5548_v53 = vld [vmem:[#allocation2 + $0xf8] sm:$0xff] }
 0x123   : > { %565 = vrot.lane.b32.xlu1 %v5214_v21, %s4644_s26  ;;  %1340 = vrot.lane.b32.xlu0 %v5392_v1, %s4650_s17  ;;  %v2234_v21 = vld [vmem:[%s7528_s3 + $0x1c0] sm:$0xff] }
 0x124   : > { %v4243_v20 = vpack.c.bf16 %v2235_v16, %v2234_v21 }
 0x125   : > { %v1028_v10 = vpop.permute.xlu1 %1027  ;;  %v1026_v11 = vpop.permute.xlu0 %1025  ;;  %4241 = vmatpush1.bf16.msra.mxu1 %v4240_v35 }
 0x126   : > { %4242 = vmatprep.subr.bf16.mxu1 %v7531_v36  ;;  %v1549_v59 = vsel %vm1541_vm8, %v1516_v58, %v1028_v10  ;;  %v677_v10 = vrot.slane %v5465_v47, 2 }
 0x127   : > { %742 = vrot.lane.b32.xlu1 %v5251_v52, %s4643_s25  ;;  %740 = vrot.lane.b32.xlu0 %v5237_v38, %s4643_s25  ;;  %v1416_v52 = vsel %vm225_vm0, %v4980_v62, %v5322_v19 }
 0x128   : > { %v1449_v38 = vsel %vm1442_vm5, %v1416_v52, %v725_v25 }
 0x129   : > { %v1126_v17 = vpop.permute.xlu1 %1125  ;;  %v1124_v18 = vpop.permute.xlu0 %1123  ;;  %4244 = vmatpush1.bf16.msra.mxu1 %v4243_v20  ;;  %v1482_v62 = vsel %vm1475_vm6, %v1449_v38, %v823_v40  ;;  %v2240_v40 = vld [vmem:[%s7528_s3 + $0x1f0] sm:$0xff] }
 0x12a   : > { %4245 = vmatprep.subr.bf16.mxu1 %v7531_v36  ;;  %v1515_v37 = vsel %vm1508_vm7, %v1482_v62, %v925_v7  ;;  %v1582_v46 = vsel %vm1574_vm9, %v1549_v59, %v1126_v17  ;;  %v4252_v7 = vpack.c.bf16 %v2241_v24, %v2240_v40  ;;  %v680_v17 = vrot.slane %v375_v57, 2 }
 0x12b   : > { %840 = vrot.lane.b32.xlu1 %v5324_v23, %s4645_s27  ;;  %838 = vrot.lane.b32.xlu0 %v5326_v26, %s4645_s27  ;;  %v1548_v44 = vsel %vm1541_vm8, %v1515_v37, %v1026_v11  ;;  %v678_v11 = vrot.slane %v5463_v56, 2 }
 0x12c   : > { %v1581_v50 = vsel %vm1574_vm9, %v1548_v44, %v1124_v18 }
 0x12d   : > { %v1228_v19 = vpop.permute.xlu1 %1227  ;;  %v1226_v29 = vpop.permute.xlu0 %1225  ;;  %4247 = vmatpush1.bf16.msra.mxu1 %v4246_v34  ;;  %v5507_v16 = vsel %vm631_vm2, %v677_v10, %v678_v11  ;;  %v5514_v52 = vsel %vm631_vm2, %v678_v11, %v680_v17 }
 0x12e   : > { %v1614_v54 = vsel %vm1607_vm10, %v1581_v50, %v1226_v29  ;;  %4248 = vmatprep.subr.bf16.mxu1 %v7531_v36  ;;  %v1615_v2 = vsel %vm1607_vm10, %v1582_v46, %v1228_v19 }
 0x12f   : > { %942 = vrot.lane.b32.xlu1 %v5357_v51, %s4646_s28  ;;  %940 = vrot.lane.b32.xlu0 %v5360_v55, %s4646_s28 }
 0x131   : > { %v552_v41 = vpop.permute.xlu1 %551  ;;  %v1327_v33 = vpop.permute.xlu0 %1326  ;;  %4250 = vmatpush1.bf16.msra.mxu1 %v4249_v30 }
 0x132   : > { %v1647_v25 = vsel %vm1640_vm11, %v1614_v54, %v1327_v33  ;;  %4251 = vmatprep.subr.bf16.mxu1 %v7531_v36  ;;  %v1418_v29 = vsel %vm225_vm0, %v5016_v15, %v552_v41  ;;  %v307_v15 = vld [vmem:[%s4867_s24 + $0xd0] sm:$0xff]  ;;  %v378_v41 = vld [vmem:[#allocation2 + $0x100] sm:$0x3] }
 0x133   : > { %1043 = vrot.lane.b32.xlu1 %v5392_v1, %s4647_s12  ;;  %1041 = vrot.lane.b32.xlu0 %v5378_v60, %s4647_s12  ;;  %340 = vst.msk [vmem:[#allocation2 + $0x151] sm:$0xff] %vm225_vm0, %v307_v15  ;;  %v5550_v54 = vld [vmem:[#allocation2 + $0xf0] sm:$0xff]  ;;  %v508_v59 = vrot.slane %v378_v41, 1  ;;  %v685_v11 = vrot.slane %v378_v41, 2 }
 0x134   : > { %4031 = vmatprep.mubr.msk.f32.mxu0 %vm1679_vm12, %v1647_v25  ;;  %v506_v25 = vrot.slane %v5548_v53, 1  ;;  %v505_v46 = vrot.slane %v5550_v54, 1  ;;  %v380_v15 = vld [vmem:[#allocation2 + $0x110] sm:$0xff] }
 0x135   : > { %v554_v3 = vpop.permute.xlu1 %553  ;;  %v1329_v5 = vpop.permute.xlu0 %1328  ;;  %4253 = vmatpush1.bf16.msra.mxu1 %v4252_v7 }
 0x136   : > { %v1648_v22 = vsel %vm1640_vm11, %v1615_v2, %v1329_v5  ;;  %4254 = vmatprep.subr.bf16.mxu1 %v7531_v36  ;;  %v1419_v43 = vsel %vm225_vm0, %v5014_v14, %v554_v3  ;;  %v5571_v24 = vsel %vm454_vm3, %v506_v25, %v508_v59  ;;  %v5574_v2 = vsel %vm454_vm3, %v505_v46, %v506_v25 }
 0x137   : > { %1141 = vrot.lane.b32.xlu1 %v5463_v56, %s4648_s13  ;;  %1139 = vrot.lane.b32.xlu0 %v5465_v47, %s4648_s13  ;;  %v682_v3 = vrot.slane %v5550_v54, 2  ;;  %v683_v5 = vrot.slane %v5548_v53, 2 }
 0x138   : > { %4032 = vmatmul.mubr.msk.f32.gmra.mrb[6].mxu0 %vm1679_vm12, %v1648_v22 }
 0x139   : > { %v731_v35 = vpop.permute.xlu1 %730  ;;  %v729_v21 = vpop.permute.xlu0 %728  ;;  %v5583_v10 = vsel %vm631_vm2, %v682_v3, %v683_v5  ;;  %v5590_v17 = vsel %vm631_vm2, %v683_v5, %v685_v11 }
 0x13a   : > { %v1452_v48 = vsel %vm1442_vm5, %v1419_v43, %v731_v35 }
 0x13b   : > { %1243 = vrot.lane.b32.xlu1 %v5494_v8, %s4649_s16  ;;  %1241 = vrot.lane.b32.xlu0 %v5497_v9, %s4649_s16 }
 0x13d   : > { %v829_v18 = vpop.permute.xlu1 %828  ;;  %v827_v20 = vpop.permute.xlu0 %826 }
 0x13e   : > { %v1485_v14 = vsel %vm1475_vm6, %v1452_v48, %v829_v18  ;;  %v381_v48 = vld [vmem:[#allocation2 + $0x118] sm:$0x3] }
 0x13f   : > { %567 = vrot.lane.b32.xlu1 %v5360_v55, %s4644_s26  ;;  %1342 = vrot.lane.b32.xlu0 %v5507_v16, %s4650_s17  ;;  %v513_v41 = vrot.slane %v381_v48, 1  ;;  %v690_v5 = vrot.slane %v381_v48, 2 }
 0x141   : > { %v931_v38 = vpop.permute.xlu1 %930  ;;  %v929_v27 = vpop.permute.xlu0 %928 }
 0x142   : > { %v1518_v33 = vsel %vm1508_vm7, %v1485_v14, %v931_v38 }
 0x143   : > { %569 = vrot.lane.b32.xlu1 %v5357_v51, %s4644_s26  ;;  %1344 = vrot.lane.b32.xlu0 %v5514_v52, %s4650_s17  ;;  %v1451_v51 = vsel %vm1442_vm5, %v1418_v29, %v729_v21 }
 0x145   : > { %v1032_v28 = vpop.permute.xlu1 %1031  ;;  %v1030_v62 = vpop.permute.xlu0 %1029 }
 0x146   : > { %v1551_v30 = vsel %vm1541_vm8, %v1518_v33, %v1032_v28  ;;  %v510_v33 = vrot.slane %v379_v45, 1 }
 0x147   : > { %746 = vrot.lane.b32.xlu1 %v5392_v1, %s4643_s25  ;;  %744 = vrot.lane.b32.xlu0 %v5378_v60, %s4643_s25  ;;  %v1484_v1 = vsel %vm1475_vm6, %v1451_v51, %v827_v20 }
 0x148   : > { %v1517_v60 = vsel %vm1508_vm7, %v1484_v1, %v929_v27  ;;  %v310_v1 = vld [vmem:[%s4867_s24 + $0xe8] sm:$0xff] }
 0x149   : > { %v1130_v55 = vpop.permute.xlu1 %1129  ;;  %v1128_v19 = vpop.permute.xlu0 %1127  ;;  %v1550_v44 = vsel %vm1541_vm8, %v1517_v60, %v1030_v62  ;;  %343 = vst.msk [vmem:[#allocation2 + $0x171] sm:$0xff] %vm225_vm0, %v310_v1  ;;  %v382_v1 = vld [vmem:[#allocation2 + $0x120] sm:$0xff] }
 0x14a   : > { %v1583_v49 = vsel %vm1574_vm9, %v1550_v44, %v1128_v19  ;;  %v1584_v58 = vsel %vm1574_vm9, %v1551_v30, %v1130_v55 }
 0x14b   : > { %844 = vrot.lane.b32.xlu1 %v5463_v56, %s4645_s27  ;;  %842 = vrot.lane.b32.xlu0 %v5465_v47, %s4645_s27 }
 0x14d   : > { %v1232_v34 = vpop.permute.xlu1 %1231  ;;  %v1230_v37 = vpop.permute.xlu0 %1229 }
 0x14e   : > { %v1616_v50 = vsel %vm1607_vm10, %v1583_v49, %v1230_v37  ;;  %v1617_v39 = vsel %vm1607_vm10, %v1584_v58, %v1232_v34 }
 0x14f   : > { %946 = vrot.lane.b32.xlu1 %v5494_v8, %s4646_s28  ;;  %944 = vrot.lane.b32.xlu0 %v5497_v9, %s4646_s28 }
 0x151   : > { %v556_v61 = vpop.permute.xlu1 %555  ;;  %v1331_v42 = vpop.permute.xlu0 %1330 }
 0x152   : > { %v1649_v57 = vsel %vm1640_vm11, %v1616_v50, %v1331_v42  ;;  %v1420_v62 = vsel %vm225_vm0, %v5052_v32, %v556_v61  ;;  %v309_v32 = vld [vmem:[%s4867_s24 + $0xe0] sm:$0xff]  ;;  %v511_v42 = vrot.slane %v380_v15, 1 }
 0x153   : > { %1047 = vrot.lane.b32.xlu1 %v5514_v52, %s4647_s12  ;;  %1045 = vrot.lane.b32.xlu0 %v5507_v16, %s4647_s12  ;;  %342 = vst.msk [vmem:[#allocation2 + $0x169] sm:$0xff] %vm225_vm0, %v309_v32  ;;  %v383_v32 = vld [vmem:[#allocation2 + $0x128] sm:$0xff] }
 0x154   : > { %4034 = vmatprep.mubr.msk.f32.mxu0 %vm1679_vm12, %v1649_v57  ;;  %v5639_v59 = vsel %vm454_vm3, %v511_v42, %v513_v41  ;;  %v5642_v46 = vsel %vm454_vm3, %v510_v33, %v511_v42  ;;  %v692_v41 = vrot.slane %v382_v1, 2  ;;  %v693_v33 = vrot.slane %v383_v32, 2 }
 0x155   : > { %v558_v4 = vpop.permute.xlu1 %557  ;;  %v1333_v0 = vpop.permute.xlu0 %1332 }
 0x156   : > { %v1650_v40 = vsel %vm1640_vm11, %v1617_v39, %v1333_v0  ;;  %v1421_v29 = vsel %vm225_vm0, %v5050_v31, %v558_v4  ;;  %v687_v39 = vrot.slane %v379_v45, 2  ;;  %v688_v4 = vrot.slane %v380_v15, 2 }
 0x157   : > { %1145 = vrot.lane.b32.xlu1 %v5548_v53, %s4648_s13  ;;  %1143 = vrot.lane.b32.xlu0 %v5550_v54, %s4648_s13 }
 0x158   : > { %4035 = vmatmul.mubr.msk.f32.gmra.mrb[8].mxu0 %vm1679_vm12, %v1650_v40  ;;  %v5649_v3 = vsel %vm631_vm2, %v687_v39, %v688_v4  ;;  %v5656_v11 = vsel %vm631_vm2, %v688_v4, %v690_v5 }
 0x159   : > { %v735_v7 = vpop.permute.xlu1 %734  ;;  %v733_v22 = vpop.permute.xlu0 %732 }
 0x15a   : > { %v1454_v34 = vsel %vm1442_vm5, %v1421_v29, %v735_v7 }
 0x15b   : > { %1247 = vrot.lane.b32.xlu1 %v5571_v24, %s4649_s16  ;;  %1245 = vrot.lane.b32.xlu0 %v5574_v2, %s4649_s16 }
 0x15d   : > { %v833_v35 = vpop.permute.xlu1 %832  ;;  %v831_v21 = vpop.permute.xlu0 %830 }
 0x15e   : > { %v1487_v31 = vsel %vm1475_vm6, %v1454_v34, %v833_v35  ;;  %v384_v34 = vld [vmem:[#allocation2 + $0x130] sm:$0x3] }
 0x15f   : > { %571 = vrot.lane.b32.xlu1 %v5497_v9, %s4644_s26  ;;  %1346 = vrot.lane.b32.xlu0 %v5583_v10, %s4650_s17 }
 0x161   : > { %v935_v18 = vpop.permute.xlu1 %934  ;;  %v933_v20 = vpop.permute.xlu0 %932 }
 0x162   : > { %v1520_v49 = vsel %vm1508_vm7, %v1487_v31, %v935_v18 }
 0x163   : > { %573 = vrot.lane.b32.xlu1 %v5494_v8, %s4644_s26  ;;  %1348 = vrot.lane.b32.xlu0 %v5590_v17, %s4650_s17  ;;  %v1453_v8 = vsel %vm1442_vm5, %v1420_v62, %v733_v22 }
 0x165   : > { %v1036_v38 = vpop.permute.xlu1 %1035  ;;  %v1034_v27 = vpop.permute.xlu0 %1033 }
 0x166   : > { %v1553_v50 = vsel %vm1541_vm8, %v1520_v49, %v1036_v38 }
 0x167   : > { %750 = vrot.lane.b32.xlu1 %v5514_v52, %s4643_s25  ;;  %748 = vrot.lane.b32.xlu0 %v5507_v16, %s4643_s25  ;;  %v1486_v52 = vsel %vm1475_vm6, %v1453_v8, %v831_v21 }
 0x168   : > { %v1519_v16 = vsel %vm1508_vm7, %v1486_v52, %v933_v20  ;;  %v312_v52 = vld [vmem:[%s4867_s24 + $0xf8] sm:$0xff] }
 0x169   : > { %v1134_v9 = vpop.permute.xlu1 %1133  ;;  %v1132_v28 = vpop.permute.xlu0 %1131  ;;  %v1552_v51 = vsel %vm1541_vm8, %v1519_v16, %v1034_v27  ;;  %345 = vst.msk [vmem:[#allocation2 + $0x189] sm:$0xff] %vm225_vm0, %v312_v52 }
 0x16a   : > { %v1585_v37 = vsel %vm1574_vm9, %v1552_v51, %v1132_v28  ;;  %v1586_v61 = vsel %vm1574_vm9, %v1553_v50, %v1134_v9 }
 0x16b   : > { %848 = vrot.lane.b32.xlu1 %v5548_v53, %s4645_s27  ;;  %846 = vrot.lane.b32.xlu0 %v5550_v54, %s4645_s27 }
 0x16d   : > { %v1236_v55 = vpop.permute.xlu1 %1235  ;;  %v1234_v19 = vpop.permute.xlu0 %1233 }
 0x16e   : > { %v1618_v60 = vsel %vm1607_vm10, %v1585_v37, %v1234_v19  ;;  %v1619_v57 = vsel %vm1607_vm10, %v1586_v61, %v1236_v55 }
 0x16f   : > { %950 = vrot.lane.b32.xlu1 %v5571_v24, %s4646_s28  ;;  %948 = vrot.lane.b32.xlu0 %v5574_v2, %s4646_s28 }
 0x171   : > { %v560_v43 = vpop.permute.xlu1 %559  ;;  %v1335_v44 = vpop.permute.xlu0 %1334 }
 0x172   : > { %v1651_v14 = vsel %vm1640_vm11, %v1618_v60, %v1335_v44  ;;  %v1422_v27 = vsel %vm225_vm0, %v5114_v13, %v560_v43  ;;  %v311_v13 = vld [vmem:[%s4867_s24 + $0xf0] sm:$0xff]  ;;  %v516_v44 = vrot.slane %v383_v32, 1 }
 0x173   : > { %1051 = vrot.lane.b32.xlu1 %v5590_v17, %s4647_s12  ;;  %1049 = vrot.lane.b32.xlu0 %v5583_v10, %s4647_s12  ;;  %344 = vst.msk [vmem:[#allocation2 + $0x181] sm:$0xff] %vm225_vm0, %v311_v13 }
 0x174   : > { %4037 = vmatprep.mubr.msk.f32.mxu0 %vm1679_vm12, %v1651_v14 }
 0x175   : > { %v562_v30 = vpop.permute.xlu1 %561  ;;  %v1337_v58 = vpop.permute.xlu0 %1336 }
 0x176   : > { %v1652_v25 = vsel %vm1640_vm11, %v1619_v57, %v1337_v58  ;;  %v5713_v58 = vsel %vm631_vm2, %v692_v41, %v693_v33 }
 0x177   : > { %1149 = vrot.lane.b32.xlu1 %v380_v15, %s4648_s13  ;;  %1147 = vrot.lane.b32.xlu0 %v379_v45, %s4648_s13 }
 0x178   : > { %4038 = vmatmul.mubr.msk.f32.gmra.mrb[10].mxu0 %vm1679_vm12, %v1652_v25  ;;  %v695_v25 = vrot.slane %v384_v34, 2 }
 0x179   : > { %v739_v0 = vpop.permute.xlu1 %738  ;;  %v737_v40 = vpop.permute.xlu0 %736 }
 0x17b   : > { %1251 = vrot.lane.b32.xlu1 %v5639_v59, %s4649_s16  ;;  %1249 = vrot.lane.b32.xlu0 %v5642_v46, %s4649_s16 }
 0x17d   : > { %v837_v7 = vpop.permute.xlu1 %836  ;;  %v835_v22 = vpop.permute.xlu0 %834 }
 0x17f   : > { %575 = vrot.lane.b32.xlu1 %v5574_v2, %s4644_s26  ;;  %1350 = vrot.lane.b32.xlu0 %v5649_v3, %s4650_s17 }
 0x181   : > { %v939_v35 = vpop.permute.xlu1 %938  ;;  %v937_v21 = vpop.permute.xlu0 %936 }
 0x183   : > { %577 = vrot.lane.b32.xlu1 %v5571_v24, %s4644_s26  ;;  %1352 = vrot.lane.b32.xlu0 %v5656_v11, %s4650_s17  ;;  %v1455_v24 = vsel %vm1442_vm5, %v1422_v27, %v737_v40 }
 0x184   : > { %v1488_v9 = vsel %vm1475_vm6, %v1455_v24, %v835_v22 }
 0x185   : > { %v1040_v18 = vpop.permute.xlu1 %1039  ;;  %v1038_v20 = vpop.permute.xlu0 %1037  ;;  %v1521_v62 = vsel %vm1508_vm7, %v1488_v9, %v937_v21  ;;  %v5733_v21 = vld [vmem:[%s7527_s2] ss:$0 sm:$0xff] }
 0x186   : > { %v1554_v8 = vsel %vm1541_vm8, %v1521_v62, %v1038_v20 }
 0x187   : > { %754 = vrot.lane.b32.xlu1 %v5590_v17, %s4643_s25  ;;  %752 = vrot.lane.b32.xlu0 %v5583_v10, %s4643_s25  ;;  %v1423_v10 = vsel %vm225_vm0, %v5112_v12, %v562_v30 }
 0x188   : > { %v1456_v55 = vsel %vm1442_vm5, %v1423_v10, %v739_v0  ;;  %v5720_v0 = vsel %vm631_vm2, %v693_v33, %v695_v25 }
 0x189   : > { %v1138_v2 = vpop.permute.xlu1 %1137  ;;  %v1136_v38 = vpop.permute.xlu0 %1135  ;;  %v1489_v12 = vsel %vm1475_vm6, %v1456_v55, %v837_v7 }
 0x18a   : > { %v1587_v19 = vsel %vm1574_vm9, %v1554_v8, %v1136_v38  ;;  %v1522_v37 = vsel %vm1508_vm7, %v1489_v12, %v939_v35  ;;  %v387_v12 = vld [vmem:[#allocation2 + $0x148] sm:$0x3] }
 0x18b   : > { %852 = vrot.lane.b32.xlu1 %v380_v15, %s4645_s27  ;;  %850 = vrot.lane.b32.xlu0 %v379_v45, %s4645_s27  ;;  %v1555_v60 = vsel %vm1541_vm8, %v1522_v37, %v1040_v18  ;;  %v518_v15 = vrot.slane %v384_v34, 1  ;;  %v515_v45 = vrot.slane %v382_v1, 1 }
 0x18c   : > { %v1588_v43 = vsel %vm1574_vm9, %v1555_v60, %v1138_v2  ;;  %v523_v60 = vrot.slane %v387_v12, 1 }
 0x18d   : > { %v1240_v28 = vpop.permute.xlu1 %1239  ;;  %v1238_v17 = vpop.permute.xlu0 %1237  ;;  %v5703_v61 = vsel %vm454_vm3, %v516_v44, %v518_v15  ;;  %v5706_v42 = vsel %vm454_vm3, %v515_v45, %v516_v44 }
 0x18e   : > { %v1620_v16 = vsel %vm1607_vm10, %v1587_v19, %v1238_v17  ;;  %v1621_v48 = vsel %vm1607_vm10, %v1588_v43, %v1240_v28  ;;  %v386_v19 = vld [vmem:[#allocation2 + $0x140] sm:$0xff] }
 0x18f   : > { %954 = vrot.lane.b32.xlu1 %v5639_v59, %s4646_s28  ;;  %952 = vrot.lane.b32.xlu0 %v5642_v46, %s4646_s28  ;;  %v2126_v43 = vld [vmem:[#allocation3 + $0x10] sm:$0x3] }
 0x191   : > { %v564_v29 = vpop.permute.xlu1 %563  ;;  %v1339_v51 = vpop.permute.xlu0 %1338 }
 0x192   : > { %v1653_v31 = vsel %vm1640_vm11, %v1620_v16, %v1339_v51  ;;  %v385_v51 = vld [vmem:[#allocation2 + $0x138] sm:$0xff] }
 0x193   : > { %1055 = vrot.lane.b32.xlu1 %v5656_v11, %s4647_s12  ;;  %1053 = vrot.lane.b32.xlu0 %v5649_v3, %s4647_s12  ;;  %v697_v25 = vrot.slane %v385_v51, 2 }
 0x194   : > { %4040 = vmatprep.mubr.msk.f32.mxu0 %vm1679_vm12, %v1653_v31  ;;  %v521_v31 = vrot.slane %v386_v19, 1 }
 0x195   : > { %v566_v49 = vpop.permute.xlu1 %565  ;;  %v1341_v14 = vpop.permute.xlu0 %1340 }
 0x196   : > { %v1654_v50 = vsel %vm1640_vm11, %v1621_v48, %v1341_v14  ;;  %v520_v48 = vrot.slane %v385_v51, 1  ;;  %v2486_v14 = vrot.slane %v2126_v43, 2  ;;  %v5772_v41 = vsel %vm454_vm3, %v521_v31, %v523_v60 }
 0x197   : > { %1153 = vrot.lane.b32.xlu1 %v383_v32, %s4648_s13  ;;  %1151 = vrot.lane.b32.xlu0 %v382_v1, %s4648_s13 }
 0x198   : > { %4041 = vmatmul.mubr.msk.f32.gmra.mrb[12].mxu0 %vm1679_vm12, %v1654_v50 }
 0x199   : > { %v743_v57 = vpop.permute.xlu1 %742  ;;  %v741_v30 = vpop.permute.xlu0 %740 }
 0x19b   : > { %1255 = vrot.lane.b32.xlu1 %v5703_v61, %s4649_s16  ;;  %1253 = vrot.lane.b32.xlu0 %v5706_v42, %s4649_s16 }
 0x19d   : > { %v841_v39 = vpop.permute.xlu1 %840  ;;  %v839_v4 = vpop.permute.xlu0 %838 }
 0x19f   : > { %579 = vrot.lane.b32.xlu1 %v5642_v46, %s4644_s26  ;;  %1354 = vrot.lane.b32.xlu0 %v5713_v58, %s4650_s17 }
 0x1a1   : > { %v943_v40 = vpop.permute.xlu1 %942  ;;  %v941_v5 = vpop.permute.xlu0 %940 }
 0x1a3   : > { %581 = vrot.lane.b32.xlu1 %v5639_v59, %s4644_s26  ;;  %1356 = vrot.lane.b32.xlu0 %v5720_v0, %s4650_s17  ;;  %v1424_v59 = vsel %vm225_vm0, %v5192_v6, %v564_v29  ;;  %v1425_v6 = vsel %vm225_vm0, %v5184_v63, %v566_v49 }
 0x1a4   : > { %v1458_v10 = vsel %vm1442_vm5, %v1425_v6, %v743_v57 }
 0x1a5   : > { %v1044_v7 = vpop.permute.xlu1 %1043  ;;  %v1042_v22 = vpop.permute.xlu0 %1041  ;;  %v1491_v13 = vsel %vm1475_vm6, %v1458_v10, %v841_v39  ;;  %v698_v39 = vrot.slane %v386_v19, 2 }
 0x1a6   : > { %v1524_v16 = vsel %vm1508_vm7, %v1491_v13, %v943_v40 }
 0x1a7   : > { %758 = vrot.lane.b32.xlu1 %v5656_v11, %s4643_s25  ;;  %756 = vrot.lane.b32.xlu0 %v5649_v3, %s4643_s25  ;;  %v1457_v11 = vsel %vm1442_vm5, %v1424_v59, %v741_v30  ;;  %v5776_v30 = vsel %vm454_vm3, %v520_v48, %v521_v31 }
 0x1a8   : > { %v1490_v2 = vsel %vm1475_vm6, %v1457_v11, %v839_v4 }
 0x1a9   : > { %v1142_v46 = vpop.permute.xlu1 %1141  ;;  %v1140_v35 = vpop.permute.xlu0 %1139  ;;  %v1523_v9 = vsel %vm1508_vm7, %v1490_v2, %v941_v5 }
 0x1aa   : > { %v1556_v17 = vsel %vm1541_vm8, %v1523_v9, %v1042_v22  ;;  %v5787_v22 = vsel %vm631_vm2, %v697_v25, %v698_v39 }
 0x1ab   : > { %v4024_v18 = vpop.f32.mrb[0].mxu0  ;;  %856 = vrot.lane.b32.xlu1 %v383_v32, %s4645_s27  ;;  %854 = vrot.lane.b32.xlu0 %v382_v1, %s4645_s27  ;;  %v1589_v8 = vsel %vm1574_vm9, %v1556_v17, %v1140_v35  ;;  %v1557_v32 = vsel %vm1541_vm8, %v1524_v16, %v1044_v7  ;;  %v4602_v1 = vld [vmem:[#allocation3] sm:$0xff]  ;;  %v390_v16 = vld [vmem:[#allocation2 + $0x160] sm:$0x3] }
 0x1ac   : > { %v1852_v20 = vadd.f32 %v4024_v18, %v5733_v21  ;;  %v1846_v3 = vpop.f32.mrb[1].mxu0  ;;  %v2483_v34 = vrot.slane %v4602_v1, 2  ;;  %v1590_v37 = vsel %vm1574_vm9, %v1557_v32, %v1142_v46  ;;  %v700_v46 = vrot.slane %v387_v12, 2  ;;  %v5826_v12 = vld [vmem:[#allocation2 + $0x150] sm:$0xff] }
 0x1ad   : > { %v1847_v38 = vadd.f32 %v5733_v21, %v1846_v3  ;;  %v1244_v27 = vpop.permute.xlu1 %1243  ;;  %v1242_v24 = vpop.permute.xlu0 %1241  ;;  %v525_v31 = vrot.slane %v5826_v12, 1 }
 0x1ae   : > { %v2006_v28 = vmax.f32 %v1852_v20, 0.0  ;;  %v1622_v52 = vsel %vm1607_vm10, %v1589_v8, %v1242_v24  ;;  %v1623_v44 = vsel %vm1607_vm10, %v1590_v37, %v1244_v27  ;;  %v2487_v40 = vsel %vm631_vm2, %v2483_v34, %v2486_v14 }
 0x1af   : > { %v2005_v62 = vmax.f32 %v1847_v38, 0.0  ;;  %958 = vrot.lane.b32.xlu1 %v5703_v61, %s4646_s28  ;;  %956 = vrot.lane.b32.xlu0 %v5706_v42, %s4646_s28  ;;  %v5794_v18 = vsel %vm631_vm2, %v698_v39, %v700_v46  ;;  %v528_v37 = vrot.slane %v390_v16, 1 }
 0x1b0   : > { %2093 = vst [vmem:[#allocation3 + $0x21] sm:$0xff] %v2006_v28 }
 0x1b1   : > { %2092 = vst [vmem:[#allocation3 + $0x19] sm:$0xff] %v2005_v62  ;;  %v568_v63 = vpop.permute.xlu1 %567  ;;  %v1343_v55 = vpop.permute.xlu0 %1342 }
 0x1b2   : > { %v1655_v29 = vsel %vm1640_vm11, %v1622_v52, %v1343_v55  ;;  %v1426_v2 = vsel %vm225_vm0, %v5326_v26, %v568_v63 }
 0x1b3   : > { %1059 = vrot.lane.b32.xlu1 %v5720_v0, %s4647_s12  ;;  %1057 = vrot.lane.b32.xlu0 %v5713_v58, %s4647_s12 }
 0x1b4   : > { %4043 = vmatprep.mubr.msk.f32.mxu0 %vm1679_vm12, %v1655_v29 }
 0x1b5   : > { %v570_v15 = vpop.permute.xlu1 %569  ;;  %v1345_v45 = vpop.permute.xlu0 %1344 }
 0x1b6   : > { %v1656_v49 = vsel %vm1640_vm11, %v1623_v44, %v1345_v45  ;;  %v1427_v26 = vsel %vm225_vm0, %v5324_v23, %v570_v15 }
 0x1b7   : > { %1157 = vrot.lane.b32.xlu1 %v386_v19, %s4648_s13  ;;  %1155 = vrot.lane.b32.xlu0 %v385_v51, %s4648_s13 }
 0x1b8   : > { %4044 = vmatmul.mubr.msk.f32.gmra.mrb[14].mxu0 %vm1679_vm12, %v1656_v49  ;;  %v5769_v50 = vld [vmem:[#allocation3 + $0x18] sm:$0xff]  ;;  %v5778_v4 = vld [vmem:[#allocation3 + $0x20] sm:$0xff]  ;;  %v2129_v49 = vld [vmem:[#allocation3 + $0x28] sm:$0x3] }
 0x1b9   : > { %2924 = vmatprep.mubr.f32.mxu1 %v5769_v50  ;;  %v747_v33 = vpop.permute.xlu1 %746  ;;  %v745_v57 = vpop.permute.xlu0 %744  ;;  %v2488_v15 = vrot.slane %v5769_v50, 2  ;;  %v2489_v45 = vrot.slane %v5778_v4, 2 }
 0x1ba   : > { %2925 = vmatmul.mubr.f32.vlgmr.msra.gmra.mrb[0].mxu1 %v2483_v34  ;;  %v1460_v8 = vsel %vm1442_vm5, %v1427_v26, %v747_v33 }
 0x1bb   : > { %2929 = vmatprep.mubr.f32.mxu1 %v5778_v4  ;;  %1259 = vrot.lane.b32.xlu1 %v5772_v41, %s4649_s16  ;;  %v5858_v25 = vsel %vm631_vm2, %v2488_v15, %v2489_v45  ;;  %v2491_v4 = vrot.slane %v2129_v49, 2 }
 0x1bc   : > { %1257 = vrot.lane.b32.xlu0 %v5776_v30, %s4649_s16 }
 0x1bd   : > { %v845_v5 = vpop.permute.xlu1 %844  ;;  %v843_v7 = vpop.permute.xlu0 %842 }
 0x1be   : > { %2930 = vmatmul.mubr.f32.gmra.mrb[2].mxu1 %v2487_v40  ;;  %v1493_v52 = vsel %vm1475_vm6, %v1460_v8, %v845_v5  ;;  %v702_v40 = vrot.slane %v5826_v12, 2 }
 0x1bf   : > { %583 = vrot.lane.b32.xlu1 %v5706_v42, %s4644_s26 }
 0x1c0   : > { %1358 = vrot.lane.b32.xlu0 %v5787_v22, %s4650_s17 }
 0x1c1   : > { %v947_v35 = vpop.permute.xlu1 %946  ;;  %v945_v59 = vpop.permute.xlu0 %944 }
 0x1c2   : > { %v1526_v29 = vsel %vm1508_vm7, %v1493_v52, %v947_v35  ;;  %v5871_v35 = vsel %vm631_vm2, %v2489_v45, %v2491_v4  ;;  %v2179_v4 = vld [vmem:[%s7528_s3 + $0x8] sm:$0xff] }
 0x1c3   : > { %585 = vrot.lane.b32.xlu1 %v5703_v61, %s4644_s26  ;;  %v1459_v61 = vsel %vm1442_vm5, %v1426_v2, %v745_v57 }
 0x1c4   : > { %1360 = vrot.lane.b32.xlu0 %v5794_v18, %s4650_s17 }
 0x1c5   : > { %v1048_v11 = vpop.permute.xlu1 %1047  ;;  %v1046_v20 = vpop.permute.xlu0 %1045 }
 0x1c6   : > { %v1559_v32 = vsel %vm1541_vm8, %v1526_v29, %v1048_v11  ;;  %v393_v29 = vld [vmem:[#allocation2 + $0x178] sm:$0x3] }
 0x1c7   : > { %762 = vrot.lane.b32.xlu1 %v5720_v0, %s4643_s25  ;;  %v1492_v0 = vsel %vm1475_vm6, %v1459_v61, %v843_v7 }
 0x1c8   : > { %760 = vrot.lane.b32.xlu0 %v5713_v58, %s4643_s25  ;;  %v1525_v6 = vsel %vm1508_vm7, %v1492_v0, %v945_v59 }
 0x1c9   : > { %v1146_v42 = vpop.permute.xlu1 %1145  ;;  %v1144_v3 = vpop.permute.xlu0 %1143  ;;  %v1558_v62 = vsel %vm1541_vm8, %v1525_v6, %v1046_v20  ;;  %v705_v20 = vrot.slane %v390_v16, 2  ;;  %v5918_v16 = vld [vmem:[#allocation2 + $0x168] sm:$0xff] }
 0x1ca   : > { %v1591_v13 = vsel %vm1574_vm9, %v1558_v62, %v1144_v3  ;;  %v1592_v1 = vsel %vm1574_vm9, %v1559_v32, %v1146_v42 }
 0x1cb   : > { %v4027_v38 = vpop.f32.mrb[2].mxu0  ;;  %860 = vrot.lane.b32.xlu1 %v386_v19, %s4645_s27  ;;  %v5824_v19 = vld [vmem:[#allocation2 + $0x158] sm:$0xff] }
 0x1cc   : > { %v1862_v27 = vadd.f32 %v4027_v38, %v5733_v21  ;;  %v1856_v24 = vpop.f32.mrb[3].mxu0  ;;  %858 = vrot.lane.b32.xlu0 %v385_v51, %s4645_s27  ;;  %v526_v34 = vrot.slane %v5824_v19, 1  ;;  %v703_v5 = vrot.slane %v5824_v19, 2 }
 0x1cd   : > { %v1857_v9 = vadd.f32 %v5733_v21, %v1856_v24  ;;  %v1248_v58 = vpop.permute.xlu1 %1247  ;;  %v1246_v28 = vpop.permute.xlu0 %1245 }
 0x1ce   : > { %v2008_v17 = vmax.f32 %v1862_v27, 0.0  ;;  %v1624_v63 = vsel %vm1607_vm10, %v1591_v13, %v1246_v28  ;;  %v1625_v60 = vsel %vm1607_vm10, %v1592_v1, %v1248_v58  ;;  %v5851_v33 = vsel %vm454_vm3, %v526_v34, %v528_v37 }
 0x1cf   : > { %v2007_v10 = vmax.f32 %v1857_v9, 0.0  ;;  %962 = vrot.lane.b32.xlu1 %v5772_v41, %s4646_s28  ;;  %v5854_v50 = vsel %vm454_vm3, %v525_v31, %v526_v34  ;;  %v5874_v11 = vsel %vm631_vm2, %v702_v40, %v703_v5  ;;  %v5882_v2 = vsel %vm631_vm2, %v703_v5, %v705_v20 }
 0x1d0   : > { %2095 = vst [vmem:[#allocation3 + $0x39] sm:$0xff] %v2008_v17  ;;  %960 = vrot.lane.b32.xlu0 %v5776_v30, %s4646_s28  ;;  %v533_v31 = vrot.slane %v393_v29, 1 }
 0x1d1   : > { %2094 = vst [vmem:[#allocation3 + $0x31] sm:$0xff] %v2007_v10  ;;  %v572_v23 = vpop.permute.xlu1 %571  ;;  %v1347_v55 = vpop.permute.xlu0 %1346 }
 0x1d2   : > { %v1657_v51 = vsel %vm1640_vm11, %v1624_v63, %v1347_v55  ;;  %v1428_v24 = vsel %vm225_vm0, %v5465_v47, %v572_v23  ;;  %v5916_v55 = vld [vmem:[#allocation2 + $0x170] sm:$0xff] }
 0x1d3   : > { %1063 = vrot.lane.b32.xlu1 %v5794_v18, %s4647_s12  ;;  %4046 = vmatprep.mubr.msk.f32.mxu0 %vm1679_vm12, %v1657_v51  ;;  %v531_v37 = vrot.slane %v5916_v55, 1 }
 0x1d4   : > { %1061 = vrot.lane.b32.xlu0 %v5787_v22, %s4647_s12 }
 0x1d5   : > { %v574_v43 = vpop.permute.xlu1 %573  ;;  %v1349_v44 = vpop.permute.xlu0 %1348  ;;  %v5951_v40 = vsel %vm454_vm3, %v531_v37, %v533_v31 }
 0x1d6   : > { %v1658_v48 = vsel %vm1640_vm11, %v1625_v60, %v1349_v44  ;;  %v1429_v26 = vsel %vm225_vm0, %v5463_v56, %v574_v43  ;;  %v530_v60 = vrot.slane %v5918_v16, 1 }
 0x1d7   : > { %1161 = vrot.lane.b32.xlu1 %v5824_v19, %s4648_s13  ;;  %4047 = vmatmul.mubr.msk.f32.gmra.mrb[16].mxu0 %vm1679_vm12, %v1658_v48 }
 0x1d8   : > { %1159 = vrot.lane.b32.xlu0 %v5826_v12, %s4648_s13  ;;  %v5848_v14 = vld [vmem:[#allocation3 + $0x30] sm:$0xff]  ;;  %v5863_v7 = vld [vmem:[#allocation3 + $0x38] sm:$0xff]  ;;  %v5954_v5 = vsel %vm454_vm3, %v530_v60, %v531_v37 }
 0x1d9   : > { %2934 = vmatprep.mubr.f32.mxu1 %v5848_v14  ;;  %v751_v57 = vpop.permute.xlu1 %750  ;;  %v749_v39 = vpop.permute.xlu0 %748  ;;  %v2493_v45 = vrot.slane %v5848_v14, 2  ;;  %v2494_v48 = vrot.slane %v5863_v7, 2 }
 0x1da   : > { %2935 = vmatmul.mubr.f32.gmra.mrb[4].mxu1 %v5858_v25  ;;  %v1462_v8 = vsel %vm1442_vm5, %v1429_v26, %v751_v57  ;;  %v2132_v57 = vld [vmem:[#allocation3 + $0x40] sm:$0x3] }
 0x1db   : > { %2939 = vmatprep.mubr.f32.mxu1 %v5863_v7  ;;  %1263 = vrot.lane.b32.xlu1 %v5851_v33, %s4649_s16 }
 0x1dc   : > { %1261 = vrot.lane.b32.xlu0 %v5854_v50, %s4649_s16 }
 0x1dd   : > { %v849_v46 = vpop.permute.xlu1 %848  ;;  %v847_v59 = vpop.permute.xlu0 %846 }
 0x1de   : > { %2940 = vmatmul.mubr.f32.gmra.mrb[6].mxu1 %v5871_v35  ;;  %v1495_v52 = vsel %vm1475_vm6, %v1462_v8, %v849_v46 }
 0x1df   : > { %587 = vrot.lane.b32.xlu1 %v5776_v30, %s4644_s26 }
 0x1e0   : > { %1362 = vrot.lane.b32.xlu0 %v5874_v11, %s4650_s17 }
 0x1e1   : > { %v951_v42 = vpop.permute.xlu1 %950  ;;  %v949_v3 = vpop.permute.xlu0 %948 }
 0x1e2   : > { %v1528_v51 = vsel %vm1508_vm7, %v1495_v52, %v951_v42  ;;  %v2496_v42 = vrot.slane %v2132_v57, 2  ;;  %v2187_v52 = vld [vmem:[%s7528_s3 + $0x48] sm:$0xff] }
 0x1e3   : > { %589 = vrot.lane.b32.xlu1 %v5772_v41, %s4644_s26  ;;  %v1461_v41 = vsel %vm1442_vm5, %v1428_v24, %v749_v39  ;;  %v2178_v39 = vld [vmem:[%s7528_s3] sm:$0xff] }
 0x1e4   : > { %1364 = vrot.lane.b32.xlu0 %v5882_v2, %s4650_s17  ;;  %v4159_v7 = vpack.c.bf16 %v2179_v4, %v2178_v39  ;;  %v2190_v39 = vld [vmem:[%s7528_s3 + $0x60] sm:$0xff]  ;;  %v2191_v4 = vld [vmem:[%s7528_s3 + $0x68] sm:$0xff] }
 0x1e5   : > { %v1052_v38 = vpop.permute.xlu1 %1051  ;;  %v1050_v61 = vpop.permute.xlu0 %1049 }
 0x1e6   : > { %v1561_v1 = vsel %vm1541_vm8, %v1528_v51, %v1052_v38  ;;  %v708_v38 = vrot.slane %v5916_v55, 2  ;;  %4160 = vmatpush1.bf16.msra.mxu0 %v4159_v7 }
 0x1e7   : > { %766 = vrot.lane.b32.xlu1 %v5794_v18, %s4643_s25  ;;  %v1494_v18 = vsel %vm1475_vm6, %v1461_v41, %v847_v59  ;;  %v5960_v59 = vsel %vm631_vm2, %v2493_v45, %v2494_v48  ;;  %4161 = vmatprep.subr.bf16.mxu0 %v7531_v36  ;;  %v5982_v41 = vsel %vm631_vm2, %v2494_v48, %v2496_v42 }
 0x1e8   : > { %764 = vrot.lane.b32.xlu0 %v5787_v22, %s4643_s25  ;;  %v1527_v47 = vsel %vm1508_vm7, %v1494_v18, %v949_v3  ;;  %v707_v3 = vrot.slane %v5918_v16, 2  ;;  %v710_v18 = vrot.slane %v393_v29, 2 }
 0x1e9   : > { %v1150_v30 = vpop.permute.xlu1 %1149  ;;  %v1148_v27 = vpop.permute.xlu0 %1147  ;;  %v1560_v62 = vsel %vm1541_vm8, %v1527_v47, %v1050_v61 }
 0x1ea   : > { %v1593_v13 = vsel %vm1574_vm9, %v1560_v62, %v1148_v27  ;;  %v1594_v34 = vsel %vm1574_vm9, %v1561_v1, %v1150_v30  ;;  %v2180_v30 = vld [vmem:[%s7528_s3 + $0x10] sm:$0xff]  ;;  %v2181_v27 = vld [vmem:[%s7528_s3 + $0x18] sm:$0xff]  ;;  %v6000_v26 = vsel %vm631_vm2, %v708_v38, %v710_v18 }
 0x1eb   : > { %v4030_v0 = vpop.f32.mrb[4].mxu0  ;;  %864 = vrot.lane.b32.xlu1 %v5824_v19, %s4645_s27  ;;  %v4162_v24 = vpack.c.bf16 %v2181_v27, %v2180_v30  ;;  %v2185_v62 = vld [vmem:[%s7528_s3 + $0x38] sm:$0xff]  ;;  %v6066_v30 = vld [vmem:[#allocation2 + $0x188] sm:$0xff]  ;;  %v6068_v27 = vld [vmem:[#allocation2 + $0x190] sm:$0x3] }
 0x1ec   : > { %v1872_v9 = vadd.f32 %v4030_v0, %v5733_v21  ;;  %v1866_v58 = vpop.f32.mrb[5].mxu0  ;;  %862 = vrot.lane.b32.xlu0 %v5826_v12, %s4645_s27 }
 0x1ed   : > { %v1867_v22 = vadd.f32 %v5733_v21, %v1866_v58  ;;  %v1252_v28 = vpop.permute.xlu1 %1251  ;;  %v1250_v6 = vpop.permute.xlu0 %1249  ;;  %v5985_v58 = vsel %vm631_vm2, %v707_v3, %v708_v38  ;;  %4163 = vmatpush1.bf16.msra.mxu0 %v4162_v24 }
 0x1ee   : > { %v2010_v17 = vmax.f32 %v1872_v9, 0.0  ;;  %v1626_v63 = vsel %vm1607_vm10, %v1593_v13, %v1250_v6  ;;  %v1627_v43 = vsel %vm1607_vm10, %v1594_v34, %v1252_v28  ;;  %4164 = vmatprep.subr.bf16.mxu0 %v7531_v36  ;;  %v2183_v28 = vld [vmem:[%s7528_s3 + $0x28] sm:$0xff] }
 0x1ef   : > { %v2009_v10 = vmax.f32 %v1867_v22, 0.0  ;;  %966 = vrot.lane.b32.xlu1 %v5851_v33, %s4646_s28  ;;  %v2182_v22 = vld [vmem:[%s7528_s3 + $0x20] sm:$0xff] }
 0x1f0   : > { %2097 = vst [vmem:[#allocation3 + $0x51] sm:$0xff] %v2010_v17  ;;  %964 = vrot.lane.b32.xlu0 %v5854_v50, %s4646_s28  ;;  %v4165_v6 = vpack.c.bf16 %v2183_v28, %v2182_v22  ;;  %v2193_v22 = vld [vmem:[%s7528_s3 + $0x78] sm:$0xff] }
 0x1f1   : > { %2096 = vst [vmem:[#allocation3 + $0x49] sm:$0xff] %v2009_v10  ;;  %v5914_v56 = vpop.permute.xlu1 %575  ;;  %v1351_v23 = vpop.permute.xlu0 %1350 }
 0x1f2   : > { %v1659_v32 = vsel %vm1640_vm11, %v1626_v63, %v1351_v23  ;;  %4166 = vmatpush1.bf16.msra.mxu0 %v4165_v6  ;;  %v908_v6 = vrot.slane %v6066_v30, 1 }
 0x1f3   : > { %1067 = vrot.lane.b32.xlu1 %v5882_v2, %s4647_s12  ;;  %4049 = vmatprep.mubr.msk.f32.mxu0 %vm1679_vm12, %v1659_v32  ;;  %v2188_v32 = vld [vmem:[%s7528_s3 + $0x50] sm:$0xff] }
 0x1f4   : > { %1065 = vrot.lane.b32.xlu0 %v5874_v11, %s4647_s12  ;;  %4167 = vmatprep.subr.bf16.mxu0 %v7531_v36 }
 0x1f5   : > { %v5932_v44 = vpop.permute.xlu1 %577  ;;  %v1353_v15 = vpop.permute.xlu0 %1352 }
 0x1f6   : > { %v1660_v49 = vsel %vm1640_vm11, %v1627_v43, %v1353_v15  ;;  %v1431_v48 = vsel %vm225_vm0, %v5548_v53, %v5932_v44  ;;  %v4177_v44 = vpack.c.bf16 %v2191_v4, %v2190_v39  ;;  %v2198_v39 = vld [vmem:[%s7528_s3 + $0xa0] sm:$0xff]  ;;  %v2199_v4 = vld [vmem:[%s7528_s3 + $0xa8] sm:$0xff] }
 0x1f7   : > { %1165 = vrot.lane.b32.xlu1 %v5916_v55, %s4648_s13  ;;  %4050 = vmatmul.mubr.msk.f32.gmra.mrb[18].mxu0 %vm1679_vm12, %v1660_v49 }
 0x1f8   : > { %1163 = vrot.lane.b32.xlu0 %v5918_v16, %s4648_s13  ;;  %v5948_v14 = vld [vmem:[#allocation3 + $0x48] sm:$0xff]  ;;  %v5965_v61 = vld [vmem:[#allocation3 + $0x50] sm:$0xff] }
 0x1f9   : > { %2944 = vmatprep.mubr.f32.mxu1 %v5948_v14  ;;  %v5957_v46 = vpop.permute.xlu1 %754  ;;  %v753_v20 = vpop.permute.xlu0 %752 }
 0x1fa   : > { %2945 = vmatmul.mubr.f32.gmra.mrb[8].mxu1 %v5960_v59  ;;  %v1464_v7 = vsel %vm1442_vm5, %v1431_v48, %v5957_v46 }
 0x1fb   : > { %2949 = vmatprep.mubr.f32.mxu1 %v5965_v61  ;;  %1267 = vrot.lane.b32.xlu1 %v5951_v40, %s4649_s16 }
 0x1fc   : > { %1265 = vrot.lane.b32.xlu0 %v5954_v5, %s4649_s16 }
 0x1fd   : > { %v5979_v0 = vpop.permute.xlu1 %852  ;;  %v851_v9 = vpop.permute.xlu0 %850 }
 0x1fe   : > { %2950 = vmatmul.mubr.f32.gmra.mrb[10].mxu1 %v5982_v41 }
 0x1ff   : > { %591 = vrot.lane.b32.xlu1 %v5854_v50, %s4644_s26  ;;  %v2184_v50 = vld [vmem:[%s7528_s3 + $0x30] sm:$0xff] }
 0x200   : > { %1366 = vrot.lane.b32.xlu0 %v5985_v58, %s4650_s17  ;;  %v4168_v10 = vpack.c.bf16 %v2185_v62, %v2184_v50 }
 0x201   : > { %v955_v47 = vpop.permute.xlu1 %954  ;;  %v953_v17 = vpop.permute.xlu0 %952 }
 0x202   : > { %4169 = vmatpush1.bf16.msra.mxu0 %v4168_v10 }
 0x203   : > { %593 = vrot.lane.b32.xlu1 %v5851_v33, %s4644_s26  ;;  %4170 = vmatprep.subr.bf16.mxu0 %v7531_v36  ;;  %v2186_v33 = vld [vmem:[%s7528_s3 + $0x40] sm:$0xff] }
 0x204   : > { %1368 = vrot.lane.b32.xlu0 %v6000_v26, %s4650_s17  ;;  %v4171_v63 = vpack.c.bf16 %v2187_v52, %v2186_v33  ;;  %v2499_v33 = vrot.slane %v5965_v61, 2  ;;  %v1009_v61 = vrot.slane %v6066_v30, 2 }
 0x205   : > { %v1056_v8 = vpop.permute.xlu1 %1055  ;;  %v1054_v13 = vpop.permute.xlu0 %1053 }
 0x206   : > { %4172 = vmatpush1.bf16.msra.mxu0 %v4171_v63  ;;  %v6097_v63 = vld [vmem:[#allocation3 + $0x58] sm:$0x3] }
 0x207   : > { %770 = vrot.lane.b32.xlu1 %v5882_v2, %s4643_s25  ;;  %v1430_v2 = vsel %vm225_vm0, %v5550_v54, %v5914_v56  ;;  %4173 = vmatprep.subr.bf16.mxu0 %v7531_v36 }
 0x208   : > { %768 = vrot.lane.b32.xlu0 %v5874_v11, %s4643_s25  ;;  %v2189_v11 = vld [vmem:[%s7528_s3 + $0x58] sm:$0xff]  ;;  %v1463_v1 = vsel %vm1442_vm5, %v1430_v2, %v753_v20  ;;  %v1497_v20 = vsel %vm1475_vm6, %v1464_v7, %v5979_v0  ;;  %v2192_v0 = vld [vmem:[%s7528_s3 + $0x70] sm:$0xff]  ;;  %v4189_v7 = vpack.c.bf16 %v2199_v4, %v2198_v39 }
 0x209   : > { %v1154_v23 = vpop.permute.xlu1 %1153  ;;  %v1152_v29 = vpop.permute.xlu0 %1151  ;;  %v4174_v54 = vpack.c.bf16 %v2189_v11, %v2188_v32  ;;  %v1496_v56 = vsel %vm1475_vm6, %v1463_v1, %v851_v9  ;;  %v1530_v46 = vsel %vm1508_vm7, %v1497_v20, %v955_v47  ;;  %v6072_v9 = vld [vmem:[#allocation2 + $0x180] sm:$0xff]  ;;  %v910_v47 = vrot.slane %v6068_v27, 1  ;;  %v397_v4 = vld [vmem:[#allocation2 + $0x198] sm:$0xff] }
 0x20a   : > { %v1529_v15 = vsel %vm1508_vm7, %v1496_v56, %v953_v17  ;;  %v1563_v18 = vsel %vm1541_vm8, %v1530_v46, %v1056_v8  ;;  %v4180_v17 = vpack.c.bf16 %v2193_v22, %v2192_v0  ;;  %v907_v8 = vrot.slane %v6072_v9, 1 }
 0x20b   : > { %v4033_v51 = vpop.f32.mrb[6].mxu0  ;;  %868 = vrot.lane.b32.xlu1 %v5916_v55, %s4645_s27  ;;  %4175 = vmatpush1.bf16.msra.mxu0 %v4174_v54  ;;  %v1562_v49 = vsel %vm1541_vm8, %v1529_v15, %v1054_v13  ;;  %v1596_v28 = vsel %vm1574_vm9, %v1563_v18, %v1154_v23  ;;  %v2498_v13 = vrot.slane %v5948_v14, 2  ;;  %v2194_v23 = vld [vmem:[%s7528_s3 + $0x80] sm:$0xff]  ;;  %v2195_v14 = vld [vmem:[%s7528_s3 + $0x88] sm:$0xff]  ;;  %v6114_v2 = vsel %vm454_vm3, %v908_v6, %v910_v47 }
 0x20c   : > { %v1882_v34 = vadd.f32 %v4033_v51, %v5733_v21  ;;  %v1876_v37 = vpop.f32.mrb[7].mxu0  ;;  %866 = vrot.lane.b32.xlu0 %v5918_v16, %s4645_s27  ;;  %4176 = vmatprep.subr.bf16.mxu0 %v7531_v36  ;;  %v1595_v53 = vsel %vm1574_vm9, %v1562_v49, %v1152_v29  ;;  %v4183_v51 = vpack.c.bf16 %v2195_v14, %v2194_v23  ;;  %v1008_v32 = vrot.slane %v6072_v9, 2  ;;  %v4603_v47 = vld [vmem:[#allocation2 + $0x108] sm:$0xff] }
 0x20d   : > { %v1877_v31 = vadd.f32 %v5733_v21, %v1876_v37  ;;  %v1256_v60 = vpop.permute.xlu1 %1255  ;;  %v1254_v43 = vpop.permute.xlu0 %1253  ;;  %v6122_v1 = vsel %vm631_vm2, %v2498_v13, %v2499_v33  ;;  %v6125_v37 = vsel %vm454_vm3, %v907_v8, %v908_v6  ;;  %v2501_v54 = vrot.slane %v6097_v63, 2  ;;  %v2205_v6 = vld [vmem:[%s7528_s3 + $0xd8] sm:$0xff] }
 0x20e   : > { %v2012_v45 = vmax.f32 %v1882_v34, 0.0  ;;  %v1628_v42 = vsel %vm1607_vm10, %v1595_v53, %v1254_v43  ;;  %v1629_v50 = vsel %vm1607_vm10, %v1596_v28, %v1256_v60  ;;  %v2197_v60 = vld [vmem:[%s7528_s3 + $0x98] sm:$0xff]  ;;  %v6149_v49 = vsel %vm631_vm2, %v1008_v32, %v1009_v61 }
 0x20f   : > { %v2011_v57 = vmax.f32 %v1877_v31, 0.0  ;;  %970 = vrot.lane.b32.xlu1 %v5951_v40, %s4646_s28  ;;  %4178 = vmatpush1.bf16.msra.mxu0 %v4177_v44  ;;  %v2196_v31 = vld [vmem:[%s7528_s3 + $0x90] sm:$0xff] }
 0x210   : > { %2099 = vst [vmem:[#allocation3 + $0x69] sm:$0xff] %v2012_v45  ;;  %968 = vrot.lane.b32.xlu0 %v5954_v5, %s4646_s28  ;;  %4179 = vmatprep.subr.bf16.mxu0 %v7531_v36  ;;  %v4186_v43 = vpack.c.bf16 %v2197_v60, %v2196_v31  ;;  %v6146_v45 = vsel %vm631_vm2, %v2499_v33, %v2501_v54 }
 0x211   : > { %2098 = vst [vmem:[#allocation3 + $0x61] sm:$0xff] %v2011_v57  ;;  %v6064_v3 = vpop.permute.xlu1 %579  ;;  %v1355_v38 = vpop.permute.xlu0 %1354  ;;  %v1011_v57 = vrot.slane %v6068_v27, 2 }
 0x212   : > { %v1661_v24 = vsel %vm1640_vm11, %v1628_v42, %v1355_v38  ;;  %v2201_v42 = vld [vmem:[%s7528_s3 + $0xb8] sm:$0xff] }
 0x213   : > { %1071 = vrot.lane.b32.xlu1 %v6000_v26, %s4647_s12  ;;  %4052 = vmatprep.mubr.msk.f32.mxu0 %vm1679_vm12, %v1661_v24  ;;  %v6167_v20 = vsel %vm631_vm2, %v1009_v61, %v1011_v57  ;;  %v2203_v24 = vld [vmem:[%s7528_s3 + $0xc8] sm:$0xff] }
 0x214   : > { %1069 = vrot.lane.b32.xlu0 %v5985_v58, %s4647_s12  ;;  %4181 = vmatpush1.bf16.msra.mxu0 %v4180_v17  ;;  %v2207_v61 = vld [vmem:[%s7528_s3 + $0xe8] sm:$0xff] }
 0x215   : > { %v6091_v62 = vpop.permute.xlu1 %581  ;;  %v1357_v10 = vpop.permute.xlu0 %1356  ;;  %4182 = vmatprep.subr.bf16.mxu0 %v7531_v36 }
 0x216   : > { %v1662_v52 = vsel %vm1640_vm11, %v1629_v50, %v1357_v10 }
 0x217   : > { %1169 = vrot.lane.b32.xlu1 %v6066_v30, %s4648_s13  ;;  %4053 = vmatmul.mubr.msk.f32.gmra.mrb[20].mxu0 %vm1679_vm12, %v1662_v52 }
 0x218   : > { %1167 = vrot.lane.b32.xlu0 %v6072_v9, %s4648_s13  ;;  %v6111_v29 = vld [vmem:[#allocation3 + $0x60] sm:$0xff]  ;;  %v6129_v56 = vld [vmem:[#allocation3 + $0x68] sm:$0xff]  ;;  %4184 = vmatpush1.bf16.msra.mxu0 %v4183_v51 }
 0x219   : > { %2954 = vmatprep.mubr.f32.mxu1 %v6111_v29  ;;  %v6119_v11 = vpop.permute.xlu1 %758  ;;  %v757_v34 = vpop.permute.xlu0 %756  ;;  %4185 = vmatprep.subr.bf16.mxu0 %v7531_v36  ;;  %v4604_v51 = vld [vmem:[#allocation2 + $0x110] sm:$0xff] }
 0x21a   : > { %2955 = vmatmul.mubr.f32.gmra.mrb[12].mxu1 %v6122_v1  ;;  %v1433_v32 = vsel %vm225_vm0, %v4604_v51, %v6091_v62 }
 0x21b   : > { %2959 = vmatprep.mubr.f32.mxu1 %v6129_v56  ;;  %1271 = vrot.lane.b32.xlu1 %v6114_v2, %s4649_s16  ;;  %v1466_v54 = vsel %vm1442_vm5, %v1433_v32, %v6119_v11 }
 0x21c   : > { %1269 = vrot.lane.b32.xlu0 %v6125_v37, %s4649_s16  ;;  %4187 = vmatpush1.bf16.msra.mxu0 %v4186_v43  ;;  %v398_v43 = vld [vmem:[#allocation2 + $0x1a0] sm:$0xff] }
 0x21d   : > { %v6143_v15 = vpop.permute.xlu1 %856  ;;  %v855_v48 = vpop.permute.xlu0 %854  ;;  %4188 = vmatprep.subr.bf16.mxu0 %v7531_v36 }
 0x21e   : > { %2960 = vmatmul.mubr.f32.gmra.mrb[14].mxu1 %v6146_v45  ;;  %v1499_v62 = vsel %vm1475_vm6, %v1466_v54, %v6143_v15  ;;  %v2209_v15 = vld [vmem:[%s7528_s3 + $0xf8] sm:$0xff]  ;;  %v4605_v54 = vld [vmem:[#allocation2 + $0x120] sm:$0xff] }
 0x21f   : > { %595 = vrot.lane.b32.xlu1 %v5954_v5, %s4644_s26  ;;  %v2200_v5 = vld [vmem:[%s7528_s3 + $0xb0] sm:$0xff] }
 0x220   : > { %1370 = vrot.lane.b32.xlu0 %v6149_v49, %s4650_s17  ;;  %4190 = vmatpush1.bf16.msra.mxu0 %v4189_v7  ;;  %v4192_v38 = vpack.c.bf16 %v2201_v42, %v2200_v5  ;;  %v2208_v7 = vld [vmem:[%s7528_s3 + $0xf0] sm:$0xff] }
 0x221   : > { %v6164_v53 = vpop.permute.xlu1 %958  ;;  %v957_v44 = vpop.permute.xlu0 %956  ;;  %4191 = vmatprep.subr.bf16.mxu0 %v7531_v36 }
 0x223   : > { %597 = vrot.lane.b32.xlu1 %v5951_v40, %s4644_s26  ;;  %v2202_v40 = vld [vmem:[%s7528_s3 + $0xc0] sm:$0xff] }
 0x224   : > { %1372 = vrot.lane.b32.xlu0 %v6167_v20, %s4650_s17  ;;  %4193 = vmatpush1.bf16.msra.mxu0 %v4192_v38  ;;  %v4195_v18 = vpack.c.bf16 %v2203_v24, %v2202_v40  ;;  %v2503_v40 = vrot.slane %v6111_v29, 2  ;;  %v2504_v24 = vrot.slane %v6129_v56, 2 }
 0x225   : > { %v1060_v27 = vpop.permute.xlu1 %1059  ;;  %v1058_v46 = vpop.permute.xlu0 %1057  ;;  %4194 = vmatprep.subr.bf16.mxu0 %v7531_v36 }
 0x227   : > { %774 = vrot.lane.b32.xlu1 %v6000_v26, %s4643_s25  ;;  %v2204_v26 = vld [vmem:[%s7528_s3 + $0xd0] sm:$0xff] }
 0x228   : > { %772 = vrot.lane.b32.xlu0 %v5985_v58, %s4643_s25  ;;  %4196 = vmatpush1.bf16.msra.mxu0 %v4195_v18  ;;  %v1432_v58 = vsel %vm225_vm0, %v4603_v47, %v6064_v3  ;;  %v1309_v47 = vrot.slane %v397_v4, 2  ;;  %s7426_s25 = scalar_lea.vmem %s7530_s5, %s3925_s21 }
 0x229   : > { %v1158_v0 = vpop.permute.xlu1 %1157  ;;  %v1156_v22 = vpop.permute.xlu0 %1155  ;;  %4197 = vmatprep.subr.bf16.mxu0 %v7531_v36  ;;  %v1465_v10 = vsel %vm1442_vm5, %v1432_v58, %v757_v34 }
 0x22a   : > { %v1498_v33 = vsel %vm1475_vm6, %v1465_v10, %v855_v48  ;;  %v399_v48 = vld [vmem:[#allocation2 + $0x1a8] sm:$0x3] }
 0x22b   : > { %v4036_v28 = vpop.f32.mrb[8].mxu0  ;;  %872 = vrot.lane.b32.xlu1 %v6066_v30, %s4645_s27  ;;  %v4198_v30 = vpack.c.bf16 %v2205_v6, %v2204_v26  ;;  %v1531_v14 = vsel %vm1508_vm7, %v1498_v33, %v957_v44  ;;  %v1211_v5 = vrot.slane %v399_v48, 1  ;;  %v1312_v6 = vrot.slane %v399_v48, 2 }
 0x22c   : > { %v1892_v17 = vadd.f32 %v4036_v28, %v5733_v21  ;;  %v1886_v50 = vpop.f32.mrb[9].mxu0  ;;  %870 = vrot.lane.b32.xlu0 %v6072_v9, %s4645_s27  ;;  %v2206_v9 = vld [vmem:[%s7528_s3 + $0xe0] sm:$0xff]  ;;  %v1564_v34 = vsel %vm1541_vm8, %v1531_v14, %v1058_v46  ;;  %v1208_v46 = vrot.slane %v397_v4, 1  ;;  %v1310_v28 = vrot.slane %v398_v43, 2 }
 0x22d   : > { %v1887_v8 = vadd.f32 %v5733_v21, %v1886_v50  ;;  %v1260_v13 = vpop.permute.xlu1 %1259  ;;  %4199 = vmatpush1.bf16.msra.mxu0 %v4198_v30  ;;  %v1597_v31 = vsel %vm1574_vm9, %v1564_v34, %v1156_v22 }
 0x22e   : > { %v2014_v52 = vmax.f32 %v1892_v17, 0.0  ;;  %v1258_v23 = vpop.permute.xlu0 %1257  ;;  %4200 = vmatprep.subr.bf16.mxu0 %v7531_v36  ;;  %v6263_v17 = vsel %vm631_vm2, %v2503_v40, %v2504_v24 }
 0x22f   : > { %v2013_v3 = vmax.f32 %v1887_v8, 0.0  ;;  %974 = vrot.lane.b32.xlu1 %v6114_v2, %s4646_s28  ;;  %v4201_v2 = vpack.c.bf16 %v2207_v61, %v2206_v9  ;;  %v1630_v57 = vsel %vm1607_vm10, %v1597_v31, %v1258_v23  ;;  %v1311_v23 = vsel %vm631_vm2, %v1309_v47, %v1310_v28 }
 0x230   : > { %2101 = vst [vmem:[#allocation3 + $0x81] sm:$0xff] %v2014_v52  ;;  %972 = vrot.lane.b32.xlu0 %v6125_v37, %s4646_s28  ;;  %v1532_v37 = vsel %vm1508_vm7, %v1499_v62, %v6164_v53  ;;  %v1209_v53 = vrot.slane %v398_v43, 1 }
 0x231   : > { %2100 = vst [vmem:[#allocation3 + $0x79] sm:$0xff] %v2013_v3  ;;  %v6226_v60 = vpop.permute.xlu1 %583  ;;  %4202 = vmatpush1.bf16.msra.mxu0 %v4201_v2  ;;  %v1565_v44 = vsel %vm1541_vm8, %v1532_v37, %v1060_v27  ;;  %v6251_v27 = vld [vmem:[#allocation3 + $0x70] sm:$0x3] }
 0x232   : > { %v1359_v39 = vpop.permute.xlu0 %1358  ;;  %4203 = vmatprep.subr.bf16.mxu0 %v7531_v36  ;;  %v1598_v42 = vsel %vm1574_vm9, %v1565_v44, %v1158_v0  ;;  %v1212_v26 = vsel %vm454_vm3, %v1209_v53, %v1211_v5  ;;  %v1210_v50 = vsel %vm454_vm3, %v1208_v46, %v1209_v53  ;;  %v2506_v30 = vrot.slane %v6251_v27, 2  ;;  %v4606_v44 = vld [vmem:[#allocation2 + $0x128] sm:$0xff] }
 0x233   : > { %v1663_v11 = vsel %vm1640_vm11, %v1630_v57, %v1359_v39  ;;  %1075 = vrot.lane.b32.xlu1 %v6167_v20, %s4647_s12  ;;  %v4204_v20 = vpack.c.bf16 %v2209_v15, %v2208_v7  ;;  %v1631_v18 = vsel %vm1607_vm10, %v1598_v42, %v1260_v13  ;;  %v1313_v13 = vsel %vm631_vm2, %v1310_v28, %v1312_v6 }
 0x234   : > { %1073 = vrot.lane.b32.xlu0 %v6149_v49, %s4647_s12  ;;  %4055 = vmatprep.mubr.msk.f32.mxu0 %vm1679_vm12, %v1663_v11  ;;  %v6275_v52 = vsel %vm631_vm2, %v2504_v24, %v2506_v30  ;;  %v1434_v31 = vsel %vm225_vm0, %v4605_v54, %v6226_v60 }
 0x235   : > { %v586_v38 = vpop.permute.xlu1 %585  ;;  %4205 = vmatpush1.bf16.msra.mxu0 %v4204_v20 }
 0x236   : > { %v1361_v22 = vpop.permute.xlu0 %1360  ;;  %4302 = vmatprep.subr.bf16.mxu0 %v7531_v36  ;;  %v1435_v53 = vsel %vm225_vm0, %v4606_v44, %v586_v38 }
 0x237   : > { %v1664_v49 = vsel %vm1640_vm11, %v1631_v18, %v1361_v22  ;;  %1173 = vrot.lane.b32.xlu1 %v398_v43, %s4648_s13 }
 0x238   : > { %1171 = vrot.lane.b32.xlu0 %v397_v4, %s4648_s13  ;;  %4056 = vmatmul.mubr.msk.f32.gmra.mrb[22].mxu0 %vm1679_vm12, %v1664_v49  ;;  %v6258_v0 = vld [vmem:[#allocation3 + $0x78] sm:$0xff]  ;;  %v6268_v8 = vld [vmem:[#allocation3 + $0x80] sm:$0xff] }
 0x239   : > { %2964 = vmatprep.mubr.f32.mxu1 %v6258_v0  ;;  %v763_v58 = vpop.permute.xlu1 %762  ;;  %v2508_v28 = vrot.slane %v6258_v0, 2 }
 0x23a   : > { %2965 = vmatmul.mubr.f32.gmra.mrb[16].mxu1 %v6263_v17  ;;  %v761_v10 = vpop.permute.xlu0 %760  ;;  %v1468_v5 = vsel %vm1442_vm5, %v1435_v53, %v763_v58  ;;  %v6302_v58 = vld [vmem:[#allocation3 + $0x88] sm:$0x3] }
 0x23b   : > { %2969 = vmatprep.mubr.f32.mxu1 %v6268_v8  ;;  %1275 = vrot.lane.b32.xlu1 %v1212_v26, %s4649_s16  ;;  %v1467_v62 = vsel %vm1442_vm5, %v1434_v31, %v761_v10  ;;  %v2509_v26 = vrot.slane %v6268_v8, 2 }
 0x23c   : > { %1273 = vrot.lane.b32.xlu0 %v1210_v50, %s4649_s16 }
 0x23d   : > { %v861_v33 = vpop.permute.xlu1 %860 }
 0x23e   : > { %2970 = vmatmul.mubr.f32.gmra.mrb[18].mxu1 %v6275_v52  ;;  %v859_v14 = vpop.permute.xlu0 %858  ;;  %v1501_v42 = vsel %vm1475_vm6, %v1468_v5, %v861_v33  ;;  %v2511_v33 = vrot.slane %v6302_v58, 2 }
 0x23f   : > { %1376 = vrot.lane.b32.xlu1 %v1313_v13, %s4650_s17  ;;  %v1500_v4 = vsel %vm1475_vm6, %v1467_v62, %v859_v14  ;;  %v6310_v13 = vsel %vm631_vm2, %v2508_v28, %v2509_v26 }
 0x240   : > { %1374 = vrot.lane.b32.xlu0 %v1311_v23, %s4650_s17 }
 0x241   : > { %v963_v3 = vpop.permute.xlu1 %962 }
 0x242   : > { %v961_v9 = vpop.permute.xlu0 %960  ;;  %v1534_v24 = vsel %vm1508_vm7, %v1501_v42, %v963_v3 }
 0x243   : > { %v1533_v7 = vsel %vm1508_vm7, %v1500_v4, %v961_v9  ;;  %v6318_v9 = vsel %vm631_vm2, %v2509_v26, %v2511_v33 }
 0x245   : > { %v1064_v61 = vpop.permute.xlu1 %1063 }
 0x246   : > { %v1062_v51 = vpop.permute.xlu0 %1061  ;;  %v1567_v38 = vsel %vm1541_vm8, %v1534_v24, %v1064_v61 }
 0x247   : > { %v1566_v60 = vsel %vm1541_vm8, %v1533_v7, %v1062_v51 }
 0x249   : > { %v1162_v32 = vpop.permute.xlu1 %1161 }
 0x24a   : > { %v1160_v34 = vpop.permute.xlu0 %1159  ;;  %v1600_v22 = vsel %vm1574_vm9, %v1567_v38, %v1162_v32 }
 0x24b   : > { %v4039_v2 = vpop.f32.mrb[10].mxu0  ;;  %v1599_v20 = vsel %vm1574_vm9, %v1566_v60, %v1160_v34 }
 0x24c   : > { %v1902_v43 = vadd.f32 %v4039_v2, %v5733_v21  ;;  %v1896_v48 = vpop.f32.mrb[11].mxu0 }
 0x24d   : > { %v1897_v57 = vadd.f32 %v5733_v21, %v1896_v48  ;;  %v1264_v39 = vpop.permute.xlu1 %1263  ;;  %v4607_v48 = vld [vmem:[#allocation2 + $0x138] sm:$0xff] }
 0x24e   : > { %v2016_v37 = vmax.f32 %v1902_v43, 0.0  ;;  %v1262_v11 = vpop.permute.xlu0 %1261  ;;  %v1633_v6 = vsel %vm1607_vm10, %v1600_v22, %v1264_v39 }
 0x24f   : > { %v2015_v15 = vmax.f32 %v1897_v57, 0.0  ;;  %v1632_v46 = vsel %vm1607_vm10, %v1599_v20, %v1262_v11  ;;  %v6325_v57 = vld [vmem:[%s7527_s2] ss:$0 sm:$0xff] }
 0x250   : > { %2103 = vst [vmem:[#allocation3 + $0x99] sm:$0xff] %v2016_v37  ;;  %v4609_v20 = vld [vmem:[#allocation2 + $0x140] sm:$0xff] }
 0x251   : > { %2102 = vst [vmem:[#allocation3 + $0x91] sm:$0xff] %v2015_v15  ;;  %v588_v21 = vpop.permute.xlu1 %587 }
 0x252   : > { %v1363_v40 = vpop.permute.xlu0 %1362  ;;  %v1436_v62 = vsel %vm225_vm0, %v4607_v48, %v588_v21 }
 0x253   : > { %v1665_v18 = vsel %vm1640_vm11, %v1632_v46, %v1363_v40 }
 0x254   : > { %4058 = vmatprep.mubr.msk.f32.mxu0 %vm1679_vm12, %v1665_v18 }
 0x255   : > { %v590_v49 = vpop.permute.xlu1 %589 }
 0x256   : > { %v1365_v47 = vpop.permute.xlu0 %1364  ;;  %v1437_v21 = vsel %vm225_vm0, %v4609_v20, %v590_v49 }
 0x257   : > { %v1666_v50 = vsel %vm1640_vm11, %v1633_v6, %v1365_v47 }
 0x258   : > { %4059 = vmatmul.mubr.msk.f32.gmra.mrb[24].mxu0 %vm1679_vm12, %v1666_v50  ;;  %v6306_v30 = vld [vmem:[#allocation3 + $0x90] sm:$0xff]  ;;  %v6314_v14 = vld [vmem:[#allocation3 + $0x98] sm:$0xff] }
 0x259   : > { %2974 = vmatprep.mubr.f32.mxu1 %v6306_v30  ;;  %v767_v10 = vpop.permute.xlu1 %766  ;;  %v2513_v50 = vrot.slane %v6306_v30, 2 }
 0x25a   : > { %2975 = vmatmul.mubr.f32.gmra.mrb[20].mxu1 %v6310_v13  ;;  %v765_v23 = vpop.permute.xlu0 %764  ;;  %v1470_v46 = vsel %vm1442_vm5, %v1437_v21, %v767_v10  ;;  %v2514_v10 = vrot.slane %v6314_v14, 2 }
 0x25b   : > { %2979 = vmatprep.mubr.f32.mxu1 %v6314_v14  ;;  %v1469_v37 = vsel %vm1442_vm5, %v1436_v62, %v765_v23 }
 0x25d   : > { %v865_v3 = vpop.permute.xlu1 %864 }
 0x25e   : > { %2980 = vmatmul.mubr.f32.gmra.mrb[22].mxu1 %v6318_v9  ;;  %v863_v61 = vpop.permute.xlu0 %862  ;;  %v1503_v18 = vsel %vm1475_vm6, %v1470_v46, %v865_v3  ;;  %v6346_v3 = vld [vmem:[#allocation3 + $0xa0] sm:$0x3] }
 0x25f   : > { %v1502_v15 = vsel %vm1475_vm6, %v1469_v37, %v863_v61 }
 0x261   : > { %v967_v51 = vpop.permute.xlu1 %966 }
 0x262   : > { %v965_v32 = vpop.permute.xlu0 %964  ;;  %v1536_v28 = vsel %vm1508_vm7, %v1503_v18, %v967_v51 }
 0x263   : > { %v1535_v60 = vsel %vm1508_vm7, %v1502_v15, %v965_v32 }
 0x265   : > { %v1068_v34 = vpop.permute.xlu1 %1067 }
 0x266   : > { %v1066_v2 = vpop.permute.xlu0 %1065  ;;  %v1569_v49 = vsel %vm1541_vm8, %v1536_v28, %v1068_v34  ;;  %v6354_v34 = vsel %vm631_vm2, %v2513_v50, %v2514_v10 }
 0x267   : > { %v1568_v42 = vsel %vm1541_vm8, %v1535_v60, %v1066_v2  ;;  %v2516_v2 = vrot.slane %v6346_v3, 2 }
 0x269   : > { %v1166_v54 = vpop.permute.xlu1 %1165  ;;  %v6362_v48 = vsel %vm631_vm2, %v2514_v10, %v2516_v2 }
 0x26a   : > { %v1164_v31 = vpop.permute.xlu0 %1163  ;;  %v1602_v6 = vsel %vm1574_vm9, %v1569_v49, %v1166_v54  ;;  %7601 = vst [vmem:[#allocation4_spill] sm:$0xff] %v6362_v48 }
 0x26b   : > { %v4042_v43 = vpop.f32.mrb[12].mxu0  ;;  %v1601_v40 = vsel %vm1574_vm9, %v1568_v42, %v1164_v31 }
 0x26c   : > { %v1912_v39 = vadd.f32 %v6325_v57, %v4042_v43  ;;  %v1906_v4 = vpop.f32.mrb[13].mxu0 }
 0x26d   : > { %v1907_v11 = vadd.f32 %v6325_v57, %v1906_v4  ;;  %v1268_v7 = vpop.permute.xlu1 %1267 }
 0x26e   : > { %v2018_v44 = vmax.f32 %v1912_v39, 0.0  ;;  %v1266_v53 = vpop.permute.xlu0 %1265  ;;  %v1635_v33 = vsel %vm1607_vm10, %v1602_v6, %v1268_v7 }
 0x26f   : > { %v2017_v5 = vmax.f32 %v1907_v11, 0.0  ;;  %v1634_v38 = vsel %vm1607_vm10, %v1601_v40, %v1266_v53 }
 0x270   : > { %2105 = vst [vmem:[#allocation3 + $0xb1] sm:$0xff] %v2018_v44 }
 0x271   : > { %2104 = vst [vmem:[#allocation3 + $0xa9] sm:$0xff] %v2017_v5  ;;  %v592_v24 = vpop.permute.xlu1 %591 }
 0x272   : > { %v1367_v22 = vpop.permute.xlu0 %1366  ;;  %v1438_v53 = vsel %vm225_vm0, %v5826_v12, %v592_v24 }
 0x273   : > { %v1667_v26 = vsel %vm1640_vm11, %v1634_v38, %v1367_v22 }
 0x274   : > { %4061 = vmatprep.mubr.msk.f32.mxu0 %vm1679_vm12, %v1667_v26 }
 0x275   : > { %v594_v47 = vpop.permute.xlu1 %593 }
 0x276   : > { %v1369_v23 = vpop.permute.xlu0 %1368  ;;  %v1439_v28 = vsel %vm225_vm0, %v5824_v19, %v594_v47 }
 0x277   : > { %v1668_v61 = vsel %vm1640_vm11, %v1635_v33, %v1369_v23 }
 0x278   : > { %4062 = vmatmul.mubr.msk.f32.gmra.mrb[26].mxu0 %vm1679_vm12, %v1668_v61  ;;  %v6350_v51 = vld [vmem:[#allocation3 + $0xa8] sm:$0xff]  ;;  %v6358_v31 = vld [vmem:[#allocation3 + $0xb0] sm:$0xff] }
 0x279   : > { %2984 = vmatprep.mubr.f32.mxu1 %v6350_v51  ;;  %v771_v32 = vpop.permute.xlu1 %770  ;;  %v2519_v2 = vrot.slane %v6358_v31, 2 }
 0x27a   : > { %2985 = vmatmul.mubr.f32.gmra.mrb[24].mxu1 %v6354_v34  ;;  %v769_v54 = vpop.permute.xlu0 %768  ;;  %v1472_v24 = vsel %vm1442_vm5, %v1439_v28, %v771_v32  ;;  %v2518_v32 = vrot.slane %v6350_v51, 2 }
 0x27b   : > { %2989 = vmatprep.mubr.f32.mxu1 %v6358_v31  ;;  %v1471_v20 = vsel %vm1442_vm5, %v1438_v53, %v769_v54 }
 0x27d   : > { %v869_v43 = vpop.permute.xlu1 %868 }
 0x27e   : > { %2990 = vmatmul.mubr.f32.gmra.mrb[26].mxu1 %v6362_v48  ;;  %v867_v62 = vpop.permute.xlu0 %866  ;;  %v1505_v6 = vsel %vm1475_vm6, %v1472_v24, %v869_v43 }
 0x27f   : > { %v1504_v46 = vsel %vm1475_vm6, %v1471_v20, %v867_v62  ;;  %v6387_v62 = vld [vmem:[#allocation3 + $0xb8] sm:$0x3]  ;;  %v2242_v20 = vld [vmem:[%s7528_s3 + $0x200] sm:$0xff] }
 0x281   : > { %v971_v39 = vpop.permute.xlu1 %970 }
 0x282   : > { %v969_v4 = vpop.permute.xlu0 %968  ;;  %v1538_v33 = vsel %vm1508_vm7, %v1505_v6, %v971_v39 }
 0x283   : > { %v1537_v38 = vsel %vm1508_vm7, %v1504_v46, %v969_v4 }
 0x285   : > { %v1072_v37 = vpop.permute.xlu1 %1071 }
 0x286   : > { %v1070_v11 = vpop.permute.xlu0 %1069  ;;  %v1571_v19 = vsel %vm1541_vm8, %v1538_v33, %v1072_v37 }
 0x287   : > { %v1570_v12 = vsel %vm1541_vm8, %v1537_v38, %v1070_v11  ;;  %v6395_v11 = vsel %vm631_vm2, %v2518_v32, %v2519_v2 }
 0x288   : > { %7602 = vst [vmem:[#allocation5_spill] sm:$0xff] %v6395_v11 }
 0x289   : > { %v1170_v7 = vpop.permute.xlu1 %1169 }
 0x28a   : > { %v1168_v15 = vpop.permute.xlu0 %1167  ;;  %v1604_v47 = vsel %vm1574_vm9, %v1571_v19, %v1170_v7  ;;  %v2521_v7 = vrot.slane %v6387_v62, 2 }
 0x28b   : > { %v4045_v44 = vpop.f32.mrb[14].mxu0  ;;  %v1603_v26 = vsel %vm1574_vm9, %v1570_v12, %v1168_v15 }
 0x28c   : > { %v1922_v60 = vadd.f32 %v6325_v57, %v4045_v44  ;;  %v1916_v5 = vpop.f32.mrb[15].mxu0 }
 0x28d   : > { %v1917_v21 = vadd.f32 %v6325_v57, %v1916_v5  ;;  %v1272_v42 = vpop.permute.xlu1 %1271 }
 0x28e   : > { %v2020_v40 = vmax.f32 %v1922_v60, 0.0  ;;  %v1270_v18 = vpop.permute.xlu0 %1269  ;;  %v1637_v54 = vsel %vm1607_vm10, %v1604_v47, %v1272_v42  ;;  %v6403_v60 = vsel %vm631_vm2, %v2519_v2, %v2521_v7 }
 0x28f   : > { %v2019_v22 = vmax.f32 %v1917_v21, 0.0  ;;  %v1636_v50 = vsel %vm1607_vm10, %v1603_v26, %v1270_v18  ;;  %7603 = vst [vmem:[#allocation6_spill] sm:$0xff] %v6403_v60  ;;  %v2243_v21 = vld [vmem:[%s7528_s3 + $0x208] sm:$0xff]  ;;  %v2245_v18 = vld [vmem:[%s7528_s3 + $0x218] sm:$0xff] }
 0x290   : > { %2107 = vst [vmem:[#allocation3 + $0xc9] sm:$0xff] %v2020_v40  ;;  %v4255_v42 = vpack.c.bf16 %v2243_v21, %v2242_v20  ;;  %v2244_v40 = vld [vmem:[%s7528_s3 + $0x210] sm:$0xff] }
 0x291   : > { %2106 = vst [vmem:[#allocation3 + $0xc1] sm:$0xff] %v2019_v22  ;;  %v596_v49 = vpop.permute.xlu1 %595  ;;  %v4258_v22 = vpack.c.bf16 %v2245_v18, %v2244_v40  ;;  %v2247_v40 = vld [vmem:[%s7528_s3 + $0x228] sm:$0xff] }
 0x292   : > { %v1371_v10 = vpop.permute.xlu0 %1370  ;;  %4256 = vmatpush1.bf16.msra.mxu1 %v4255_v42 }
 0x293   : > { %v1669_v23 = vsel %vm1640_vm11, %v1636_v50, %v1371_v10  ;;  %4257 = vmatprep.subr.bf16.mxu1 %v7531_v36 }
 0x294   : > { %4064 = vmatprep.mubr.msk.f32.mxu0 %vm1679_vm12, %v1669_v23  ;;  %v1440_v23 = vsel %vm225_vm0, %v5918_v16, %v596_v49  ;;  %v4610_v49 = vld [vmem:[#allocation3] sm:$0xff] }
 0x295   : > { %v598_v61 = vpop.permute.xlu1 %597 }
 0x296   : > { %v1373_v43 = vpop.permute.xlu0 %1372  ;;  %4259 = vmatpush1.bf16.msra.mxu1 %v4258_v22  ;;  %v1441_v50 = vsel %vm225_vm0, %v5916_v55, %v598_v61 }
 0x297   : > { %v1670_v39 = vsel %vm1640_vm11, %v1637_v54, %v1373_v43  ;;  %4260 = vmatprep.subr.bf16.mxu1 %v7531_v36 }
 0x298   : > { %4065 = vmatmul.mubr.msk.f32.gmra.mrb[28].mxu0 %vm1679_vm12, %v1670_v39  ;;  %v6391_v4 = vld [vmem:[#allocation3 + $0xc0] sm:$0xff]  ;;  %v6399_v44 = vld [vmem:[#allocation3 + $0xc8] sm:$0xff] }
 0x299   : > { %2994 = vmatprep.mubr.f32.mxu1 %v6391_v4  ;;  %v775_v37 = vpop.permute.xlu1 %774 }
 0x29a   : > { %2995 = vmatmul.mubr.f32.gmra.mrb[28].mxu1 %v6395_v11  ;;  %v773_v15 = vpop.permute.xlu0 %772  ;;  %v1474_v19 = vsel %vm1442_vm5, %v1441_v50, %v775_v37  ;;  %v2371_v37 = vrot.slane %v4610_v49, 1 }
 0x29b   : > { %2999 = vmatprep.mubr.f32.mxu1 %v6399_v44  ;;  %v1473_v32 = vsel %vm1442_vm5, %v1440_v23, %v773_v15  ;;  %v2274_v23 = vld [vmem:[%s7528_s3 + $0x300] sm:$0xff] }
 0x29d   : > { %v873_v53 = vpop.permute.xlu1 %872 }
 0x29e   : > { %3000 = vmatmul.mubr.f32.gmra.mrb[30].mxu1 %v6403_v60  ;;  %v871_v5 = vpop.permute.xlu0 %870  ;;  %v1507_v2 = vsel %vm1475_vm6, %v1474_v19, %v873_v53  ;;  %v2275_v19 = vld [vmem:[%s7528_s3 + $0x308] sm:$0xff]  ;;  %v2409_v60 = vrot.slane %v6387_v62, 1 }
 0x29f   : > { %v1506_v39 = vsel %vm1475_vm6, %v1473_v32, %v871_v5  ;;  %v6462_v32 = vld [vmem:[#allocation3 + $0xd0] sm:$0x3] }
 0x2a1   : > { %v975_v46 = vpop.permute.xlu1 %974 }
 0x2a2   : > { %v973_v38 = vpop.permute.xlu0 %972  ;;  %v1540_v55 = vsel %vm1508_vm7, %v1507_v2, %v975_v46  ;;  %v2246_v46 = vld [vmem:[%s7528_s3 + $0x220] sm:$0xff] }
 0x2a3   : > { %v1539_v20 = vsel %vm1508_vm7, %v1506_v39, %v973_v38 }
 0x2a5   : > { %v1076_v28 = vpop.permute.xlu1 %1075 }
 0x2a6   : > { %v1074_v12 = vpop.permute.xlu0 %1073  ;;  %v1573_v16 = vsel %vm1541_vm8, %v1540_v55, %v1076_v28  ;;  %v4261_v28 = vpack.c.bf16 %v2247_v40, %v2246_v46  ;;  %v2526_v55 = vrot.slane %v6462_v32, 2  ;;  %v4614_v46 = vld [vmem:[#allocation3 + $0x28] sm:$0x3] }
 0x2a7   : > { %v1572_v21 = vsel %vm1541_vm8, %v1539_v20, %v1074_v12  ;;  %v2248_v12 = vld [vmem:[%s7528_s3 + $0x230] sm:$0xff]  ;;  %v2379_v40 = vrot.slane %v4614_v46, 1  ;;  %v6555_v46 = vld [vmem:[#allocation3 + $0x50] sm:$0xff] }
 0x2a8   : > { %4262 = vmatpush1.bf16.msra.mxu1 %v4261_v28  ;;  %v2279_v28 = vld [vmem:[%s7528_s3 + $0x328] sm:$0xff] }
 0x2a9   : > { %v1174_v24 = vpop.permute.xlu1 %1173  ;;  %4263 = vmatprep.subr.bf16.mxu1 %v7531_v36 }
 0x2aa   : > { %v1172_v26 = vpop.permute.xlu0 %1171  ;;  %v4048_v6 = vpop.f32.mrb[16].mxu0  ;;  %v1606_v15 = vsel %vm1574_vm9, %v1573_v16, %v1174_v24  ;;  %v2249_v24 = vld [vmem:[%s7528_s3 + $0x238] sm:$0xff]  ;;  %v4612_v16 = vld [vmem:[#allocation3 + $0x18] sm:$0xff] }
 0x2ab   : > { %v1932_v10 = vadd.f32 %v6325_v57, %v4048_v6  ;;  %v1926_v33 = vpop.f32.mrb[17].mxu0  ;;  %v1605_v53 = vsel %vm1574_vm9, %v1572_v21, %v1172_v26  ;;  %v4611_v6 = vld [vmem:[#allocation3 + $0x10] sm:$0x3]  ;;  %v4613_v21 = vld [vmem:[#allocation3 + $0x20] sm:$0xff] }
 0x2ac   : > { %v1927_v47 = vadd.f32 %v6325_v57, %v1926_v33  ;;  %v2374_v50 = vrot.slane %v4611_v6, 1  ;;  %v2524_v33 = vrot.slane %v6399_v44, 2 }
 0x2ad   : > { %v2022_v54 = vmax.f32 %v1932_v10, 0.0  ;;  %v1276_v43 = vpop.permute.xlu1 %1275  ;;  %v2523_v10 = vrot.slane %v6391_v4, 2 }
 0x2ae   : > { %v2021_v61 = vmax.f32 %v1927_v47, 0.0  ;;  %v1274_v7 = vpop.permute.xlu0 %1273  ;;  %v1639_v5 = vsel %vm1607_vm10, %v1606_v15, %v1276_v43  ;;  %v4264_v47 = vpack.c.bf16 %v2249_v24, %v2248_v12  ;;  %v6468_v43 = vpack.c.bf16 %v2275_v19, %v2274_v23  ;;  %v2253_v23 = vld [vmem:[%s7528_s3 + $0x258] sm:$0xff]  ;;  %v2280_v19 = vld [vmem:[%s7528_s3 + $0x330] sm:$0xff] }
 0x2af   : > { %2109 = vst [vmem:[#allocation3 + $0xe1] sm:$0xff] %v2022_v54  ;;  %v1638_v18 = vsel %vm1607_vm10, %v1605_v53, %v1274_v7  ;;  %v2375_v54 = vsel %vm454_vm3, %v2371_v37, %v2374_v50  ;;  %v6472_v39 = vsel %vm631_vm2, %v2523_v10, %v2524_v33  ;;  %v2277_v7 = vld [vmem:[%s7528_s3 + $0x318] sm:$0xff]  ;;  %v2377_v15 = vrot.slane %v4613_v21, 1  ;;  %v6520_v50 = vld [vmem:[#allocation3 + $0x38] sm:$0xff] }
 0x2b0   : > { %2108 = vst [vmem:[#allocation3 + $0xd9] sm:$0xff] %v2021_v61  ;;  %7604 = vst [vmem:[#allocation7_spill] sm:$0xff] %v6472_v39  ;;  %4265 = vmatpush1.bf16.msra.mxu1 %v4264_v47  ;;  %v2276_v61 = vld [vmem:[%s7528_s3 + $0x310] sm:$0xff]  ;;  %v2382_v10 = vrot.slane %v6520_v50, 1 }
 0x2b1   : > { %v1377_v42 = vpop.permute.xlu1 %1376  ;;  %v6486_v53 = vpack.c.bf16 %v2277_v7, %v2276_v61  ;;  %4266 = vmatprep.subr.bf16.mxu1 %v7531_v36  ;;  %v6515_v24 = vsel %vm454_vm3, %v2377_v15, %v2379_v40  ;;  %v4617_v7 = vld [vmem:[#allocation3 + $0x40] sm:$0x3]  ;;  %v2387_v40 = vrot.slane %v6555_v46, 1 }
 0x2b2   : > { %v1672_v38 = vsel %vm1640_vm11, %v1639_v5, %v1377_v42  ;;  %v1375_v22 = vpop.permute.xlu0 %1374  ;;  %v6490_v5 = vsel %vm631_vm2, %v2524_v33, %v2526_v55  ;;  %v2252_v33 = vld [vmem:[%s7528_s3 + $0x250] sm:$0xff] }
 0x2b3   : > { %v1671_v26 = vsel %vm1640_vm11, %v1638_v18, %v1375_v22  ;;  %7605 = vst [vmem:[#allocation8_spill] sm:$0xff] %v6490_v5  ;;  %v2250_v18 = vld [vmem:[%s7528_s3 + $0x240] sm:$0xff]  ;;  %v4270_v47 = vpack.c.bf16 %v2253_v23, %v2252_v33 }
 0x2b4   : > { %4067 = vmatprep.mubr.msk.f32.mxu0 %vm1679_vm12, %v1671_v26  ;;  %v6517_v26 = vld [vmem:[#allocation3 + $0x30] sm:$0xff] }
 0x2b5   : > { %4068 = vmatmul.mubr.msk.f32.gmra.mrb[30].mxu0 %vm1679_vm12, %v1672_v38  ;;  %v2251_v38 = vld [vmem:[%s7528_s3 + $0x248] sm:$0xff]  ;;  %v2381_v6 = vrot.slane %v6517_v26, 1 }
 0x2b6   : > { %2699 = vmatprep.mubr.f32.mxu0 %v2371_v37  ;;  %v2376_v37 = vrot.slane %v4612_v16, 1  ;;  %v4267_v22 = vpack.c.bf16 %v2251_v38, %v2250_v18 }
 0x2b7   : > { %v6465_v2 = vld [vmem:[#allocation3 + $0xd8] sm:$0xff]  ;;  %v6482_v20 = vld [vmem:[#allocation3 + $0xe0] sm:$0xff]  ;;  %v6542_v61 = vsel %vm454_vm3, %v2381_v6, %v2382_v10 }
 0x2b8   : > { %3004 = vmatprep.mubr.f32.mxu1 %v6465_v2  ;;  %v6494_v42 = vsel %vm454_vm3, %v2376_v37, %v2377_v15  ;;  %4268 = vmatpush1.bf16.msra.mxu1 %v4267_v22 }
 0x2b9   : > { %2700 = vmatmul.mubr.f32.vlgmr.msra.gmra.mrb[32].mxu0 %v4610_v49  ;;  %3005 = vmatmul.mubr.f32.gmra.mrb[32].mxu1 %v6472_v39 }
 0x2ba   : > { %3009 = vmatprep.mubr.f32.mxu1 %v6482_v20  ;;  %2704 = vmatprep.mubr.f32.mxu0 %v2375_v54  ;;  %v2281_v54 = vld [vmem:[%s7528_s3 + $0x338] sm:$0xff] }
 0x2bb   : > { %4304 = vmatpush1.bf16.msra.mxu0 %v6468_v43  ;;  %4269 = vmatprep.subr.bf16.mxu1 %v7531_v36  ;;  %v6538_v55 = vpack.c.bf16 %v2281_v54, %v2280_v19  ;;  %v2391_v19 = vrot.slane %v6111_v29, 1  ;;  %v2254_v54 = vld [vmem:[%s7528_s3 + $0x260] sm:$0xff] }
 0x2bc   : > { %4305 = vmatprep.subr.bf16.mxu0 %v7531_v36  ;;  %4271 = vmatpush1.bf16.msra.mxu1 %v4270_v47  ;;  %v2392_v47 = vrot.slane %v6129_v56, 1 }
 0x2bd   : > { %2705 = vmatmul.mubr.f32.gmra.mrb[34].mxu0 %v4610_v49  ;;  %3010 = vmatmul.mubr.f32.gmra.mrb[34].mxu1 %v6490_v5  ;;  %v2278_v49 = vld [vmem:[%s7528_s3 + $0x320] sm:$0xff] }
 0x2be   : > { %2709 = vmatprep.mubr.f32.mxu0 %v6494_v42  ;;  %v6512_v12 = vpack.c.bf16 %v2279_v28, %v2278_v49  ;;  %4272 = vmatprep.subr.bf16.mxu1 %v7531_v36 }
 0x2bf   : > { %4307 = vmatpush1.bf16.msra.mxu0 %v6486_v53 }
 0x2c0   : > { %4308 = vmatprep.subr.bf16.mxu0 %v7531_v36 }
 0x2c1   : > { %2710 = vmatmul.mubr.f32.gmra.mrb[36].mxu0 %v4612_v16  ;;  %v2384_v16 = vrot.slane %v4617_v7, 1  ;;  %v2282_v7 = vld [vmem:[%s7528_s3 + $0x340] sm:$0xff] }
 0x2c2   : > { %2714 = vmatprep.mubr.f32.mxu0 %v6515_v24 }
 0x2c3   : > { %4310 = vmatpush1.bf16.msra.mxu0 %v6512_v12  ;;  %v6550_v37 = vsel %vm454_vm3, %v2382_v10, %v2384_v16  ;;  %v2389_v10 = vrot.slane %v6097_v63, 1  ;;  %v2255_v63 = vld [vmem:[%s7528_s3 + $0x268] sm:$0xff] }
 0x2c4   : > { %4311 = vmatprep.subr.bf16.mxu0 %v7531_v36  ;;  %v4273_v16 = vpack.c.bf16 %v2255_v63, %v2254_v54  ;;  %v6604_v54 = vsel %vm454_vm3, %v2391_v19, %v2392_v47  ;;  %v2394_v63 = vrot.slane %v6251_v27, 1 }
 0x2c5   : > { %2715 = vmatmul.mubr.f32.gmra.mrb[38].mxu0 %v4613_v21  ;;  %v6552_v21 = vld [vmem:[#allocation3 + $0x48] sm:$0xff]  ;;  %v6569_v23 = vsel %vm454_vm3, %v2387_v40, %v2389_v10  ;;  %v2284_v10 = vld [vmem:[%s7528_s3 + $0x350] sm:$0xff] }
 0x2c6   : > { %2719 = vmatprep.mubr.f32.mxu0 %v6542_v61  ;;  %v2386_v15 = vrot.slane %v6552_v21, 1  ;;  %4274 = vmatpush1.bf16.msra.mxu1 %v4273_v16 }
 0x2c7   : > { %4313 = vmatpush1.bf16.msra.mxu0 %v6538_v55  ;;  %4275 = vmatprep.subr.bf16.mxu1 %v7531_v36 }
 0x2c8   : > { %4314 = vmatprep.subr.bf16.mxu0 %v7531_v36  ;;  %v6563_v6 = vsel %vm454_vm3, %v2386_v15, %v2387_v40  ;;  %v2283_v15 = vld [vmem:[%s7528_s3 + $0x348] sm:$0xff]  ;;  %v2256_v40 = vld [vmem:[%s7528_s3 + $0x270] sm:$0xff] }
 0x2c9   : > { %2720 = vmatmul.mubr.f32.gmra.mrb[40].mxu0 %v6517_v26 }
 0x2ca   : > { %2724 = vmatprep.mubr.f32.mxu0 %v6550_v37  ;;  %v4051_v18 = vpop.f32.mrb[18].mxu0 }
 0x2cb   : > { %v1942_v38 = vadd.f32 %v6325_v57, %v4051_v18  ;;  %v1936_v49 = vpop.f32.mrb[19].mxu0  ;;  %v2257_v18 = vld [vmem:[%s7528_s3 + $0x278] sm:$0xff] }
 0x2cc   : > { %v1937_v22 = vadd.f32 %v6325_v57, %v1936_v49  ;;  %v2528_v49 = vrot.slane %v6465_v2, 2 }
 0x2cd   : > { %v2024_v28 = vmax.f32 %v1942_v38, 0.0  ;;  %2725 = vmatmul.mubr.f32.gmra.mrb[42].mxu0 %v6520_v50  ;;  %v6592_v38 = vpack.c.bf16 %v2283_v15, %v2282_v7  ;;  %v6607_v7 = vld [vmem:[#allocation3 + $0xe8] sm:$0x3] }
 0x2ce   : > { %v2023_v33 = vmax.f32 %v1937_v22, 0.0  ;;  %2729 = vmatprep.mubr.f32.mxu0 %v6563_v6  ;;  %v2529_v22 = vrot.slane %v6482_v20, 2  ;;  %v2531_v27 = vrot.slane %v6607_v7, 2 }
 0x2cf   : > { %2111 = vst [vmem:[#allocation3 + $0xf9] sm:$0xff] %v2024_v28  ;;  %v4276_v28 = vpack.c.bf16 %v2257_v18, %v2256_v40  ;;  %4316 = vmatpush1.bf16.msra.mxu0 %v6592_v38  ;;  %v6624_v40 = vsel %vm454_vm3, %v2392_v47, %v2394_v63 }
 0x2d0   : > { %2110 = vst [vmem:[#allocation3 + $0xf1] sm:$0xff] %v2023_v33  ;;  %v2285_v33 = vld [vmem:[%s7528_s3 + $0x358] sm:$0xff]  ;;  %4317 = vmatprep.subr.bf16.mxu0 %v7531_v36  ;;  %v6619_v19 = vsel %vm631_vm2, %v2528_v49, %v2529_v22  ;;  %v2399_v49 = vrot.slane %v6302_v58, 1  ;;  %v2259_v58 = vld [vmem:[%s7528_s3 + $0x288] sm:$0xff] }
 0x2d1   : > { %2730 = vmatmul.mubr.f32.gmra.mrb[44].mxu0 %v6552_v21  ;;  %v6615_v15 = vpack.c.bf16 %v2285_v33, %v2284_v10  ;;  %7606 = vst [vmem:[#allocation9_spill] sm:$0xff] %v6619_v19  ;;  %4277 = vmatpush1.bf16.msra.mxu1 %v4276_v28  ;;  %v2396_v10 = vrot.slane %v6258_v0, 1  ;;  %v2397_v33 = vrot.slane %v6268_v8, 1  ;;  %v2286_v28 = vld [vmem:[%s7528_s3 + $0x360] sm:$0xff] }
 0x2d2   : > { %2734 = vmatprep.mubr.f32.mxu0 %v6569_v23  ;;  %4278 = vmatprep.subr.bf16.mxu1 %v7531_v36 }
 0x2d3   : > { %4319 = vmatpush1.bf16.msra.mxu0 %v6615_v15  ;;  %v6641_v47 = vsel %vm454_vm3, %v2396_v10, %v2397_v33  ;;  %v6662_v10 = vsel %vm454_vm3, %v2397_v33, %v2399_v49  ;;  %v2260_v33 = vld [vmem:[%s7528_s3 + $0x290] sm:$0xff]  ;;  %v2261_v49 = vld [vmem:[%s7528_s3 + $0x298] sm:$0xff] }
 0x2d4   : > { %4320 = vmatprep.subr.bf16.mxu0 %v7531_v36  ;;  %v2401_v36 = vrot.slane %v6306_v30, 1 }
 0x2d5   : > { %2735 = vmatmul.mubr.f32.gmra.mrb[46].mxu0 %v6555_v46 }
 0x2d6   : > { %2739 = vmatprep.mubr.f32.mxu0 %v6604_v54  ;;  %v2156_v48 = vld [vmem:[#allocation3 + $0x100] sm:$0x3] }
 0x2d7   : > { %v6612_v16 = vld [vmem:[#allocation3 + $0xf0] sm:$0xff]  ;;  %v6627_v18 = vld [vmem:[#allocation3 + $0xf8] sm:$0xff] }
 0x2d8   : > { %3014 = vmatprep.mubr.f32.mxu1 %v6612_v16 }
 0x2d9   : > { %2740 = vmatmul.mubr.f32.gmra.mrb[48].mxu0 %v6111_v29  ;;  %3015 = vmatmul.mubr.f32.gmra.mrb[36].mxu1 %v6619_v19  ;;  %v6636_v29 = vsel %vm631_vm2, %v2529_v22, %v2531_v27  ;;  %v2287_v22 = vld [vmem:[%s7528_s3 + $0x368] sm:$0xff]  ;;  %v2288_v19 = vld [vmem:[%s7528_s3 + $0x370] sm:$0xff] }
 0x2da   : > { %2744 = vmatprep.mubr.f32.mxu0 %v6624_v40  ;;  %3019 = vmatprep.mubr.f32.mxu1 %v6627_v18  ;;  %7607 = vst [vmem:[#allocation10_spill] sm:$0xff] %v6636_v29  ;;  %v6655_v63 = vpack.c.bf16 %v2287_v22, %v2286_v28  ;;  %v2289_v28 = vld [vmem:[%s7528_s3 + $0x378] sm:$0xff]  ;;  %v7608_v22 = vmov 0.0|0.0  }
 0x2dc   : > { %4322 = vmatpush1.bf16.msra.mxu0 %v6655_v63 }
 0x2dd   : > { %2745 = vmatmul.mubr.f32.gmra.mrb[50].mxu0 %v6129_v56  ;;  %3020 = vmatmul.mubr.f32.gmra.mrb[38].mxu1 %v6636_v29  ;;  %v2258_v56 = vld [vmem:[%s7528_s3 + $0x280] sm:$0xff]  ;;  %v2402_v29 = vrot.slane %v6314_v14, 1 }
 0x2de   : > { %2749 = vmatprep.mubr.f32.mxu0 %v6641_v47  ;;  %v4279_v27 = vpack.c.bf16 %v2259_v58, %v2258_v56  ;;  %4323 = vmatprep.subr.bf16.mxu0 %v7608_v22  ;;  %v2290_v56 = vld [vmem:[%s7528_s3 + $0x380] sm:$0xff]  ;;  %v4282_v58 = vpack.c.bf16 %v2261_v49, %v2260_v33  ;;  %v2292_v33 = vld [vmem:[%s7528_s3 + $0x390] sm:$0xff]  ;;  %v2407_v49 = vrot.slane %v6358_v31, 1 }
 0x2e0   : > { %4280 = vmatpush1.bf16.msra.mxu1 %v4279_v27  ;;  %v2404_v27 = vrot.slane %v6346_v3, 1  ;;  %v2406_v3 = vrot.slane %v6350_v51, 1  ;;  %v6738_v62 = vsel %vm454_vm3, %v2407_v49, %v2409_v60  ;;  %v2297_v60 = vld [vmem:[%s7528_s3 + $0x3b8] sm:$0xff] }
 0x2e1   : > { %2750 = vmatmul.mubr.f32.gmra.mrb[52].mxu0 %v6258_v0  ;;  %v6674_v0 = vpack.c.bf16 %v2289_v28, %v2288_v19  ;;  %v2291_v19 = vld [vmem:[%s7528_s3 + $0x388] sm:$0xff]  ;;  %4281 = vmatprep.subr.bf16.mxu1 %v7608_v22  ;;  %v6692_v28 = vsel %vm454_vm3, %v2401_v36, %v2402_v29  ;;  %v2293_v36 = vld [vmem:[%s7528_s3 + $0x398] sm:$0xff] }
 0x2e2   : > { %2754 = vmatprep.mubr.f32.mxu0 %v6662_v10  ;;  %v6697_v5 = vpack.c.bf16 %v2291_v19, %v2290_v56  ;;  %v6715_v19 = vpack.c.bf16 %v2293_v36, %v2292_v33  ;;  %v2294_v33 = vld [vmem:[%s7528_s3 + $0x3a0] sm:$0xff]  ;;  %v2411_v36 = vrot.slane %v6391_v4, 1 }
 0x2e3   : > { %4325 = vmatpush1.bf16.msra.mxu0 %v6674_v0 }
 0x2e4   : > { %4326 = vmatprep.subr.bf16.mxu0 %v7608_v22  ;;  %4283 = vmatpush1.bf16.msra.mxu1 %v4282_v58  ;;  %7609 = vst [vmem:[#allocation11_spill] sm:$0xff] %v6715_v19 }
 0x2e5   : > { %2755 = vmatmul.mubr.f32.gmra.mrb[54].mxu0 %v6268_v8  ;;  %4284 = vmatprep.subr.bf16.mxu1 %v7608_v22  ;;  %v6709_v8 = vsel %vm454_vm3, %v2402_v29, %v2404_v27  ;;  %v6722_v27 = vsel %vm454_vm3, %v2406_v3, %v2407_v49  ;;  %v2412_v3 = vrot.slane %v6399_v44, 1 }
 0x2e6   : > { %2759 = vmatprep.mubr.f32.mxu0 %v6692_v28 }
 0x2e7   : > { %4328 = vmatpush1.bf16.msra.mxu0 %v6697_v5 }
 0x2e8   : > { %4329 = vmatprep.subr.bf16.mxu0 %v7608_v22 }
 0x2e9   : > { %2760 = vmatmul.mubr.f32.gmra.mrb[56].mxu0 %v6306_v30 }
 0x2ea   : > { %2764 = vmatprep.mubr.f32.mxu0 %v6709_v8  ;;  %v4054_v56 = vpop.f32.mrb[20].mxu0 }
 0x2eb   : > { %v1952_v58 = vadd.f32 %v6325_v57, %v4054_v56  ;;  %v1946_v39 = vpop.f32.mrb[21].mxu0  ;;  %4331 = vmatpush1.bf16.msra.mxu0 %v6715_v19  ;;  %v2262_v56 = vld [vmem:[%s7528_s3 + $0x2a0] sm:$0xff] }
 0x2ec   : > { %v1947_v30 = vadd.f32 %v6325_v57, %v1946_v39  ;;  %v2295_v39 = vld [vmem:[%s7528_s3 + $0x3a8] sm:$0xff]  ;;  %4332 = vmatprep.subr.bf16.mxu0 %v7608_v22 }
 0x2ed   : > { %v2026_v29 = vmax.f32 %v1952_v58, 0.0  ;;  %2765 = vmatmul.mubr.f32.gmra.mrb[58].mxu0 %v6314_v14  ;;  %v6734_v14 = vpack.c.bf16 %v2295_v39, %v2294_v33  ;;  %v2263_v58 = vld [vmem:[%s7528_s3 + $0x2a8] sm:$0xff]  ;;  %v2533_v33 = vrot.slane %v6612_v16, 2  ;;  %v2534_v39 = vrot.slane %v6627_v18, 2 }
 0x2ee   : > { %v2025_v11 = vmax.f32 %v1947_v30, 0.0  ;;  %2769 = vmatprep.mubr.f32.mxu0 %v6722_v27  ;;  %v2264_v30 = vld [vmem:[%s7528_s3 + $0x2b0] sm:$0xff] }
 0x2ef   : > { %2113 = vst [vmem:[#allocation3 + $0x111] sm:$0xff] %v2026_v29  ;;  %7610 = vst [vmem:[#allocation12_spill] sm:$0xff] %v6734_v14  ;;  %4334 = vmatpush1.bf16.msra.mxu0 %v6734_v14  ;;  %v2265_v29 = vld [vmem:[%s7528_s3 + $0x2b8] sm:$0xff]  ;;  %v2414_v14 = vrot.slane %v6462_v32, 1 }
 0x2f0   : > { %2112 = vst [vmem:[#allocation3 + $0x109] sm:$0xff] %v2025_v11  ;;  %v2296_v11 = vld [vmem:[%s7528_s3 + $0x3b0] sm:$0xff]  ;;  %4335 = vmatprep.subr.bf16.mxu0 %v7608_v22 }
 0x2f1   : > { %2770 = vmatmul.mubr.f32.gmra.mrb[60].mxu0 %v6350_v51  ;;  %v4285_v51 = vpack.c.bf16 %v2263_v58, %v2262_v56  ;;  %v6757_v49 = vpack.c.bf16 %v2297_v60, %v2296_v11  ;;  %v2298_v56 = vld [vmem:[%s7528_s3 + $0x3c0] sm:$0xff]  ;;  %v2299_v58 = vld [vmem:[%s7528_s3 + $0x3c8] sm:$0xff]  ;;  %v4288_v11 = vpack.c.bf16 %v2265_v29, %v2264_v30  ;;  %v6775_v60 = vsel %vm454_vm3, %v2411_v36, %v2412_v3 }
 0x2f2   : > { %2774 = vmatprep.mubr.f32.mxu0 %v6738_v62  ;;  %v6784_v19 = vpack.c.bf16 %v2299_v58, %v2298_v56  ;;  %v2536_v36 = vrot.slane %v2156_v48, 2  ;;  %v6792_v32 = vsel %vm454_vm3, %v2412_v3, %v2414_v14  ;;  %v2416_v29 = vrot.slane %v6465_v2, 1 }
 0x2f3   : > { %7611 = vst [vmem:[#allocation13_spill] sm:$0xff] %v6757_v49  ;;  %4286 = vmatpush1.bf16.msra.mxu1 %v4285_v51  ;;  %4337 = vmatpush1.bf16.msra.mxu0 %v6757_v49  ;;  %v2417_v56 = vrot.slane %v6482_v20, 1 }
 0x2f4   : > { %4287 = vmatprep.subr.bf16.mxu1 %v7608_v22  ;;  %4338 = vmatprep.subr.bf16.mxu0 %v7608_v22  ;;  %7613 = vst [vmem:[#allocation15_spill] sm:$0xff] %v6784_v19  ;;  %v6812_v3 = vsel %vm631_vm2, %v2534_v39, %v2536_v36 }
 0x2f5   : > { %2775 = vmatmul.mubr.f32.gmra.mrb[62].mxu0 %v6358_v31  ;;  %v6788_v31 = vsel %vm631_vm2, %v2533_v33, %v2534_v39  ;;  %v2300_v33 = vld [vmem:[%s7528_s3 + $0x3d0] sm:$0xff]  ;;  %7617 = vst [vmem:[#allocation19_spill] sm:$0xff] %v6812_v3  ;;  %v6817_v58 = vsel %vm454_vm3, %v2416_v29, %v2417_v56  ;;  %v2303_v39 = vld [vmem:[%s7528_s3 + $0x3e8] sm:$0xff] }
 0x2f6   : > { %2779 = vmatprep.mubr.f32.mxu0 %v6775_v60  ;;  %7614 = vst [vmem:[#allocation16_spill] sm:$0xff] %v6788_v31 }
 0x2f7   : > { %v6781_v51 = vld [vmem:[#allocation3 + $0x108] sm:$0xff]  ;;  %4289 = vmatpush1.bf16.msra.mxu1 %v4288_v11  ;;  %v6795_v30 = vld [vmem:[#allocation3 + $0x110] sm:$0xff]  ;;  %4340 = vmatpush1.bf16.msra.mxu0 %v6784_v19  ;;  %v2419_v11 = vrot.slane %v6607_v7, 1  ;;  %v2267_v7 = vld [vmem:[%s7528_s3 + $0x2c8] sm:$0xff] }
 0x2f8   : > { %7612 = vst [vmem:[#allocation14_spill] sm:$0xff] %v6781_v51  ;;  %3024 = vmatprep.mubr.f32.mxu1 %v6781_v51  ;;  %7615 = vst [vmem:[#allocation17_spill] sm:$0xff] %v6795_v30  ;;  %4290 = vmatprep.subr.bf16.mxu1 %v7608_v22 }
 0x2f9   : > { %2780 = vmatmul.mubr.f32.gmra.mrb[64].mxu0 %v6391_v4  ;;  %3025 = vmatmul.mubr.f32.gmra.mrb[40].mxu1 %v6788_v31  ;;  %v2301_v4 = vld [vmem:[%s7528_s3 + $0x3d8] sm:$0xff]  ;;  %v2422_v31 = vrot.slane %v6627_v18, 1 }
 0x2fa   : > { %2784 = vmatprep.mubr.f32.mxu0 %v6792_v32  ;;  %3029 = vmatprep.mubr.f32.mxu1 %v6795_v30  ;;  %v6808_v14 = vpack.c.bf16 %v2301_v4, %v2300_v33  ;;  %v2302_v33 = vld [vmem:[%s7528_s3 + $0x3e0] sm:$0xff]  ;;  %v6840_v4 = vsel %vm454_vm3, %v2417_v56, %v2419_v11  ;;  %v2424_v11 = vrot.slane %v2156_v48, 1  ;;  %v2426_v48 = vrot.slane %v6781_v51, 1 }
 0x2fb   : > { %4341 = vmatprep.subr.bf16.mxu0 %v7608_v22  ;;  %v6832_v36 = vpack.c.bf16 %v2303_v39, %v2302_v33  ;;  %v2304_v33 = vld [vmem:[%s7528_s3 + $0x3f0] sm:$0xff]  ;;  %v2305_v39 = vld [vmem:[%s7528_s3 + $0x3f8] sm:$0xff] }
 0x2fc   : > { %7616 = vst [vmem:[#allocation18_spill] sm:$0xff] %v6808_v14  ;;  %4343 = vmatpush1.bf16.msra.mxu0 %v6808_v14 }
 0x2fd   : > { %2785 = vmatmul.mubr.f32.gmra.mrb[66].mxu0 %v6399_v44  ;;  %3030 = vmatmul.mubr.f32.gmra.mrb[42].mxu1 %v6812_v3  ;;  %v2266_v44 = vld [vmem:[%s7528_s3 + $0x2c0] sm:$0xff]  ;;  %7618 = vst [vmem:[#allocation20_spill] sm:$0xff] %v6832_v36  ;;  %v2421_v3 = vrot.slane %v6612_v16, 1 }
 0x2fe   : > { %2789 = vmatprep.mubr.f32.mxu0 %v6817_v58  ;;  %4344 = vmatprep.subr.bf16.mxu0 %v7608_v22  ;;  %v4291_v29 = vpack.c.bf16 %v2267_v7, %v2266_v44  ;;  %v2268_v44 = vld [vmem:[%s7528_s3 + $0x2d0] sm:$0xff]  ;;  %v2269_v7 = vld [vmem:[%s7528_s3 + $0x2d8] sm:$0xff] }
 0x2ff   : > { %v6858_v56 = vsel %vm454_vm3, %v2421_v3, %v2422_v31  ;;  %v2427_v3 = vrot.slane %v6795_v30, 1 }
 0x300   : > { %4292 = vmatpush1.bf16.msra.mxu1 %v4291_v29  ;;  %4346 = vmatpush1.bf16.msra.mxu0 %v6832_v36  ;;  %v4294_v29 = vpack.c.bf16 %v2269_v7, %v2268_v44 }
 0x301   : > { %2790 = vmatmul.mubr.f32.gmra.mrb[68].mxu0 %v6465_v2  ;;  %v6852_v2 = vpack.c.bf16 %v2305_v39, %v2304_v33  ;;  %4293 = vmatprep.subr.bf16.mxu1 %v7608_v22  ;;  %v2159_v33 = vld [vmem:[#allocation3 + $0x118] sm:$0x3] }
 0x302   : > { %2794 = vmatprep.mubr.f32.mxu0 %v6840_v4  ;;  %4347 = vmatprep.subr.bf16.mxu0 %v7608_v22 }
 0x303   : > { %7619 = vst [vmem:[#allocation21_spill] sm:$0xff] %v6852_v2 }
 0x304   : > { %4349 = vmatpush1.bf16.msra.mxu0 %v6852_v2  ;;  %4295 = vmatpush1.bf16.msra.mxu1 %v4294_v29  ;;  %v2270_v29 = vld [vmem:[%s7528_s3 + $0x2e0] sm:$0xff] }
 0x305   : > { %2795 = vmatmul.mubr.f32.gmra.mrb[70].mxu0 %v6482_v20  ;;  %v6870_v20 = vsel %vm454_vm3, %v2422_v31, %v2424_v11  ;;  %4296 = vmatprep.subr.bf16.mxu1 %v7608_v22  ;;  %v6880_v31 = vsel %vm454_vm3, %v2426_v48, %v2427_v3  ;;  %v2429_v11 = vrot.slane %v2159_v33, 1  ;;  %v2539_v48 = vrot.slane %v6795_v30, 2 }
 0x306   : > { %2799 = vmatprep.mubr.f32.mxu0 %v6858_v56  ;;  %7620 = vst [vmem:[#allocation22_spill] sm:$0xff] %v6880_v31 }
 0x309   : > { %2800 = vmatmul.mubr.f32.gmra.mrb[72].mxu0 %v6612_v16 }
 0x30a   : > { %2804 = vmatprep.mubr.f32.mxu0 %v6870_v20 }
 0x30b   : > { %v4057_v39 = vpop.f32.mrb[22].mxu0 }
 0x30c   : > { %v1962_v36 = vadd.f32 %v6325_v57, %v4057_v39  ;;  %v1956_v2 = vpop.f32.mrb[23].mxu0  ;;  %v2271_v39 = vld [vmem:[%s7528_s3 + $0x2e8] sm:$0xff] }
 0x30d   : > { %v1957_v44 = vadd.f32 %v6325_v57, %v1956_v2  ;;  %2805 = vmatmul.mubr.f32.gmra.mrb[74].mxu0 %v6627_v18  ;;  %v4297_v19 = vpack.c.bf16 %v2271_v39, %v2270_v29  ;;  %v6891_v2 = vsel %vm454_vm3, %v2427_v3, %v2429_v11  ;;  %v2273_v3 = vld [vmem:[%s7528_s3 + $0x2f8] sm:$0xff] }
 0x30e   : > { %v2028_v7 = vmax.f32 %v1962_v36, 0.0  ;;  %2809 = vmatprep.mubr.f32.mxu0 %v6880_v31  ;;  %7621 = vst [vmem:[#allocation23_spill] sm:$0xff] %v6891_v2  ;;  %v2538_v36 = vrot.slane %v6781_v51, 2 }
 0x30f   : > { %v2027_v14 = vmax.f32 %v1957_v44, 0.0  ;;  %4298 = vmatpush1.bf16.msra.mxu1 %v4297_v19 }
 0x310   : > { %2115 = vst [vmem:[#allocation3 + $0x129] sm:$0xff] %v2028_v7  ;;  %4299 = vmatprep.subr.bf16.mxu1 %v7608_v22  ;;  %v2541_v7 = vrot.slane %v2159_v33, 2  ;;  %v6910_v39 = vsel %vm631_vm2, %v2538_v36, %v2539_v48 }
 0x311   : > { %2114 = vst [vmem:[#allocation3 + $0x121] sm:$0xff] %v2027_v14  ;;  %2810 = vmatmul.mubr.f32.gmra.mrb[76].mxu0 %v6781_v51  ;;  %v2272_v14 = vld [vmem:[%s7528_s3 + $0x2f0] sm:$0xff]  ;;  %7624 = vst [vmem:[#allocation26_spill] sm:$0xff] %v6910_v39 }
 0x312   : > { %2814 = vmatprep.mubr.f32.mxu0 %v6891_v2  ;;  %v4300_v29 = vpack.c.bf16 %v2273_v3, %v2272_v14  ;;  %v6925_v36 = vsel %vm631_vm2, %v2539_v48, %v2541_v7  ;;  %v2307_v48 = vld [vmem:[%s7528_s3 + $0x408] sm:$0xff] }
 0x313   : > { %7627 = vst [vmem:[#allocation29_spill] sm:$0xff] %v6925_v36 }
 0x314   : > { %4301 = vmatpush1.bf16.msra.mxu1 %v4300_v29 }
 0x315   : > { %2815 = vmatmul.mubr.f32.gmra.mrb[78].mxu0 %v6795_v30  ;;  %4382 = vmatprep.subr.bf16.mxu1 %v7608_v22 }
 0x317   : > { %v2162_v44 = vld [vmem:[#allocation3 + $0x130] sm:$0x3] }
 0x318   : > { %v6904_v19 = vld [vmem:[#allocation3 + $0x120] sm:$0xff]  ;;  %v6906_v11 = vld [vmem:[#allocation3 + $0x128] sm:$0xff]  ;;  %v2434_v51 = vrot.slane %v2162_v44, 1 }
 0x319   : > { %7622 = vst [vmem:[#allocation24_spill] sm:$0xff] %v6904_v19  ;;  %7623 = vst [vmem:[#allocation25_spill] sm:$0xff] %v6906_v11  ;;  %3034 = vmatprep.mubr.f32.mxu1 %v6904_v19  ;;  %v2431_v30 = vrot.slane %v6904_v19, 1  ;;  %v2432_v2 = vrot.slane %v6906_v11, 1 }
 0x31a   : > { %3035 = vmatmul.mubr.f32.gmra.mrb[44].mxu1 %v6910_v39 }
 0x31b   : > { %3039 = vmatprep.mubr.f32.mxu1 %v6906_v11  ;;  %v6917_v49 = vsel %vm454_vm3, %v2431_v30, %v2432_v2  ;;  %v6922_v33 = vsel %vm454_vm3, %v2432_v2, %v2434_v51  ;;  %v2306_v2 = vld [vmem:[%s7528_s3 + $0x400] sm:$0xff] }
 0x31c   : > { %7625 = vst [vmem:[#allocation27_spill] sm:$0xff] %v6917_v49  ;;  %2819 = vmatprep.mubr.f32.mxu0 %v6917_v49  ;;  %7626 = vst [vmem:[#allocation28_spill] sm:$0xff] %v6922_v33  ;;  %v6939_v7 = vpack.c.bf16 %v2307_v48, %v2306_v2 }
 0x31d   : > { %2820 = vmatmul.mubr.f32.gmra.mrb[80].mxu0 %v6904_v19 }
 0x31e   : > { %2824 = vmatprep.mubr.f32.mxu0 %v6922_v33  ;;  %3040 = vmatmul.mubr.f32.gmra.mrb[46].mxu1 %v6925_v36  ;;  %v2546_v36 = vrot.slane %v2162_v44, 2 }
 0x31f   : > { %4351 = vmatprep.subr.bf16.mxu0 %v6939_v7 }
 0x321   : > { %2825 = vmatmul.mubr.f32.gmra.mrb[82].mxu0 %v6906_v11 }
 0x32b   : > { %v4060_v30 = vpop.f32.mrb[24].mxu0 }
 0x32c   : > { %v1972_v14 = vadd.f32 %v6325_v57, %v4060_v30  ;;  %v1966_v3 = vpop.f32.mrb[25].mxu0  ;;  %v2543_v30 = vrot.slane %v6904_v19, 2 }
 0x32d   : > { %v1967_v29 = vadd.f32 %v6325_v57, %v1966_v3  ;;  %v2544_v57 = vrot.slane %v6906_v11, 2 }
 0x32e   : > { %v2030_v39 = vmax.f32 %v1972_v14, 0.0 }
 0x32f   : > { %v2029_v51 = vmax.f32 %v1967_v29, 0.0  ;;  %v6950_v33 = vsel %vm631_vm2, %v2543_v30, %v2544_v57  ;;  %v6965_v30 = vsel %vm631_vm2, %v2544_v57, %v2546_v36 }
 0x330   : > { %2117 = vst [vmem:[#allocation3 + $0x141] sm:$0xff] %v2030_v39  ;;  %7630 = vst [vmem:[#allocation32_spill] sm:$0xff] %v6950_v33 }
 0x331   : > { %2116 = vst [vmem:[#allocation3 + $0x139] sm:$0xff] %v2029_v51  ;;  %7633 = vst [vmem:[#allocation35_spill] sm:$0xff] %v6965_v30 }
 0x337   : > { %v2165_v14 = vld [vmem:[#allocation3 + $0x148] sm:$0x3] }
 0x338   : > { %v6944_v3 = vld [vmem:[#allocation3 + $0x138] sm:$0xff]  ;;  %v6946_v29 = vld [vmem:[#allocation3 + $0x140] sm:$0xff]  ;;  %v2439_v2 = vrot.slane %v2165_v14, 1  ;;  %v2551_v31 = vrot.slane %v2165_v14, 2 }
 0x339   : > { %7628 = vst [vmem:[#allocation30_spill] sm:$0xff] %v6944_v3  ;;  %7629 = vst [vmem:[#allocation31_spill] sm:$0xff] %v6946_v29  ;;  %3044 = vmatprep.mubr.f32.mxu1 %v6944_v3  ;;  %v2436_v39 = vrot.slane %v6944_v3, 1  ;;  %v2437_v51 = vrot.slane %v6946_v29, 1  ;;  %v2548_v57 = vrot.slane %v6944_v3, 2 }
 0x33a   : > { %3045 = vmatmul.mubr.f32.gmra.mrb[48].mxu1 %v6950_v33 }
 0x33b   : > { %3049 = vmatprep.mubr.f32.mxu1 %v6946_v29  ;;  %v6957_v48 = vsel %vm454_vm3, %v2436_v39, %v2437_v51  ;;  %v6962_v44 = vsel %vm454_vm3, %v2437_v51, %v2439_v2  ;;  %v6973_v39 = vld [vmem:[%s7527_s2] ss:$0 sm:$0xff] }
 0x33c   : > { %7631 = vst [vmem:[#allocation33_spill] sm:$0xff] %v6957_v48  ;;  %2829 = vmatprep.mubr.f32.mxu0 %v6957_v48  ;;  %7632 = vst [vmem:[#allocation34_spill] sm:$0xff] %v6962_v44 }
 0x33d   : > { %2830 = vmatmul.mubr.f32.gmra.mrb[84].mxu0 %v6944_v3 }
 0x33e   : > { %2834 = vmatprep.mubr.f32.mxu0 %v6962_v44  ;;  %3050 = vmatmul.mubr.f32.gmra.mrb[50].mxu1 %v6965_v30  ;;  %v2549_v44 = vrot.slane %v6946_v29, 2 }
 0x341   : > { %2835 = vmatmul.mubr.f32.gmra.mrb[86].mxu0 %v6946_v29 }
 0x34b   : > { %v4063_v33 = vpop.f32.mrb[26].mxu0 }
 0x34c   : > { %v1982_v48 = vadd.f32 %v6973_v39, %v4063_v33  ;;  %v1976_v11 = vpop.f32.mrb[27].mxu0  ;;  %v6985_v33 = vsel %vm631_vm2, %v2548_v57, %v2549_v44 }
 0x34d   : > { %v1977_v51 = vadd.f32 %v6973_v39, %v1976_v11  ;;  %7636 = vst [vmem:[#allocation38_spill] sm:$0xff] %v6985_v33 }
 0x34e   : > { %v2032_v2 = vmax.f32 %v1982_v48, 0.0 }
 0x34f   : > { %v2031_v36 = vmax.f32 %v1977_v51, 0.0 }
 0x350   : > { %2119 = vst [vmem:[#allocation3 + $0x159] sm:$0xff] %v2032_v2 }
 0x351   : > { %2118 = vst [vmem:[#allocation3 + $0x151] sm:$0xff] %v2031_v36  ;;  %v7000_v36 = vsel %vm631_vm2, %v2549_v44, %v2551_v31 }
 0x352   : > { %7639 = vst [vmem:[#allocation41_spill] sm:$0xff] %v7000_v36 }
 0x357   : > { %v2168_v30 = vld [vmem:[#allocation3 + $0x160] sm:$0x3] }
 0x358   : > { %v6979_v19 = vld [vmem:[#allocation3 + $0x150] sm:$0xff]  ;;  %v6981_v49 = vld [vmem:[#allocation3 + $0x158] sm:$0xff]  ;;  %v2444_v51 = vrot.slane %v2168_v30, 1 }
 0x359   : > { %7634 = vst [vmem:[#allocation36_spill] sm:$0xff] %v6979_v19  ;;  %7635 = vst [vmem:[#allocation37_spill] sm:$0xff] %v6981_v49  ;;  %3054 = vmatprep.mubr.f32.mxu1 %v6979_v19  ;;  %v2441_v11 = vrot.slane %v6979_v19, 1  ;;  %v2442_v48 = vrot.slane %v6981_v49, 1  ;;  %v2554_v31 = vrot.slane %v6981_v49, 2 }
 0x35a   : > { %3055 = vmatmul.mubr.f32.gmra.mrb[52].mxu1 %v6985_v33 }
 0x35b   : > { %3059 = vmatprep.mubr.f32.mxu1 %v6981_v49  ;;  %v6992_v2 = vsel %vm454_vm3, %v2441_v11, %v2442_v48  ;;  %v6997_v14 = vsel %vm454_vm3, %v2442_v48, %v2444_v51  ;;  %v2553_v48 = vrot.slane %v6979_v19, 2 }
 0x35c   : > { %7637 = vst [vmem:[#allocation39_spill] sm:$0xff] %v6992_v2  ;;  %2839 = vmatprep.mubr.f32.mxu0 %v6992_v2  ;;  %7638 = vst [vmem:[#allocation40_spill] sm:$0xff] %v6997_v14 }
 0x35d   : > { %2840 = vmatmul.mubr.f32.gmra.mrb[88].mxu0 %v6979_v19 }
 0x35e   : > { %2844 = vmatprep.mubr.f32.mxu0 %v6997_v14  ;;  %3060 = vmatmul.mubr.f32.gmra.mrb[54].mxu1 %v7000_v36  ;;  %v2556_v36 = vrot.slane %v2168_v30, 2 }
 0x361   : > { %2845 = vmatmul.mubr.f32.gmra.mrb[90].mxu0 %v6981_v49 }
 0x36b   : > { %v4066_v57 = vpop.f32.mrb[28].mxu0 }
 0x36c   : > { %v1992_v11 = vadd.f32 %v6973_v39, %v4066_v57  ;;  %v1986_v29 = vpop.f32.mrb[29].mxu0  ;;  %v7017_v57 = vsel %vm631_vm2, %v2553_v48, %v2554_v31  ;;  %v2308_v48 = vld [vmem:[%s7528_s3 + $0x410] sm:$0xff] }
 0x36d   : > { %v1987_v3 = vadd.f32 %v6973_v39, %v1986_v29 }
 0x36e   : > { %v2034_v2 = vmax.f32 %v1992_v11, 0.0  ;;  %v7033_v11 = vsel %vm631_vm2, %v2554_v31, %v2556_v36  ;;  %v2310_v36 = vld [vmem:[%s7528_s3 + $0x420] sm:$0xff]  ;;  %v2311_v31 = vld [vmem:[%s7528_s3 + $0x428] sm:$0xff] }
 0x36f   : > { %v2033_v33 = vmax.f32 %v1987_v3, 0.0  ;;  %7642 = vst [vmem:[#allocation44_spill] sm:$0xff] %v7033_v11 }
 0x370   : > { %2121 = vst [vmem:[#allocation3 + $0x171] sm:$0xff] %v2034_v2 }
 0x371   : > { %2120 = vst [vmem:[#allocation3 + $0x169] sm:$0xff] %v2033_v33 }
 0x377   : > { %v7009_v44 = vld [vmem:[#allocation3 + $0x178] sm:$0x3] }
 0x378   : > { %v7011_v51 = vld [vmem:[#allocation3 + $0x168] sm:$0xff]  ;;  %v7013_v14 = vld [vmem:[#allocation3 + $0x170] sm:$0xff]  ;;  %v2449_v33 = vrot.slane %v7009_v44, 1 }
 0x379   : > { %3064 = vmatprep.mubr.f32.mxu1 %v7011_v51  ;;  %v2446_v3 = vrot.slane %v7011_v51, 1  ;;  %v2447_v29 = vrot.slane %v7013_v14, 1 }
 0x37a   : > { %3065 = vmatmul.mubr.f32.gmra.mrb[56].mxu1 %v7017_v57 }
 0x37b   : > { %3069 = vmatprep.mubr.f32.mxu1 %v7013_v14  ;;  %v7025_v2 = vsel %vm454_vm3, %v2446_v3, %v2447_v29  ;;  %v7030_v30 = vsel %vm454_vm3, %v2447_v29, %v2449_v33  ;;  %v2309_v3 = vld [vmem:[%s7528_s3 + $0x418] sm:$0xff]  ;;  %v4358_v33 = vpack.c.bf16 %v2311_v31, %v2310_v36 }
 0x37c   : > { %7640 = vst [vmem:[#allocation42_spill] sm:$0xff] %v7025_v2  ;;  %2849 = vmatprep.mubr.f32.mxu0 %v7025_v2  ;;  %7641 = vst [vmem:[#allocation43_spill] sm:$0xff] %v7030_v30  ;;  %v4354_v29 = vpack.c.bf16 %v2309_v3, %v2308_v48  ;;  %v2312_v48 = vld [vmem:[%s7528_s3 + $0x430] sm:$0xff]  ;;  %v2313_v3 = vld [vmem:[%s7528_s3 + $0x438] sm:$0xff] }
 0x37d   : > { %2850 = vmatmul.mubr.f32.gmra.mrb[92].mxu0 %v7011_v51  ;;  %v4362_v36 = vpack.c.bf16 %v2313_v3, %v2312_v48  ;;  %v2558_v48 = vrot.slane %v7011_v51, 2 }
 0x37e   : > { %2854 = vmatprep.mubr.f32.mxu0 %v7030_v30  ;;  %3070 = vmatmul.mubr.f32.gmra.mrb[58].mxu1 %v7033_v11  ;;  %v2314_v11 = vld [vmem:[%s7528_s3 + $0x440] sm:$0xff] }
 0x381   : > { %2855 = vmatmul.mubr.f32.gmra.mrb[94].mxu0 %v7013_v14 }
 0x382   : > { %3374 = vmatprep.mubr.f32.mxu0 %v6542_v61 }
 0x385   : > { %3375 = vmatmul.mubr.f32.vlgmr.msra.gmra.mrb[96].mxu0 %v6517_v26 }
 0x386   : > { %3379 = vmatprep.mubr.f32.mxu0 %v6550_v37  ;;  %4353 = vmatpush3.bf16.msra.mxu0 %v6939_v7 }
 0x387   : > { %4355 = vmatprep.subr.bf16.mxu0 %v4354_v29 }
 0x388   : > { %v4069_v49 = vpop.f32.mrb[30].mxu0 }
 0x389   : > { %v2002_v19 = vadd.f32 %v6973_v39, %v4069_v49  ;;  %v1996_v30 = vpop.f32.mrb[31].mxu0  ;;  %3380 = vmatmul.mubr.f32.gmra.mrb[98].mxu0 %v6520_v50  ;;  %v2315_v49 = vld [vmem:[%s7528_s3 + $0x448] sm:$0xff] }
 0x38a   : > { %v1997_v26 = vadd.f32 %v6973_v39, %v1996_v30  ;;  %3384 = vmatprep.mubr.f32.mxu0 %v6563_v6  ;;  %4357 = vmatpush3.bf16.msra.mxu0 %v4354_v29  ;;  %v2316_v29 = vld [vmem:[%s7528_s3 + $0x450] sm:$0xff] }
 0x38b   : > { %v2036_v7 = vmax.f32 %v2002_v19, 0.0  ;;  %4359 = vmatprep.subr.bf16.mxu0 %v4358_v33  ;;  %v4366_v19 = vpack.c.bf16 %v2315_v49, %v2314_v11  ;;  %v2319_v49 = vld [vmem:[%s7528_s3 + $0x468] sm:$0xff] }
 0x38c   : > { %v2035_v31 = vmax.f32 %v1997_v26, 0.0  ;;  %v7064_v2 = vpop.f32.mrb[32].mxu0  ;;  %v4621_v26 = vld [vmem:[#allocation3 + $0x60] sm:$0xff] }
 0x38d   : > { %2123 = vst [vmem:[#allocation3 + $0x189] sm:$0xff] %v2036_v7  ;;  %3385 = vmatmul.mubr.f32.gmra.mrb[100].mxu0 %v6552_v21  ;;  %v2703_v50 = vpop.f32.mrb[33].mxu0  ;;  %v2317_v21 = vld [vmem:[%s7528_s3 + $0x458] sm:$0xff] }
 0x38e   : > { %2122 = vst [vmem:[#allocation3 + $0x181] sm:$0xff] %v2035_v31  ;;  %3389 = vmatprep.mubr.f32.mxu0 %v6569_v23  ;;  %4361 = vmatpush3.bf16.msra.mxu0 %v4358_v33  ;;  %v2559_v33 = vrot.slane %v7013_v14, 2  ;;  %v2318_v31 = vld [vmem:[%s7528_s3 + $0x460] sm:$0xff]  ;;  %v2561_v50 = vrot.slane %v7009_v44, 2  ;;  %v2320_v44 = vld [vmem:[%s7528_s3 + $0x470] sm:$0xff] }
 0x38f   : > { %4363 = vmatprep.subr.bf16.mxu0 %v4362_v36 }
 0x390   : > { %v7074_v39 = vpop.f32.mrb[34].mxu0 }
 0x391   : > { %3390 = vmatmul.mubr.f32.gmra.mrb[102].mxu0 %v6555_v46  ;;  %v2708_v30 = vpop.f32.mrb[35].mxu0  ;;  %v4370_v46 = vpack.c.bf16 %v2317_v21, %v2316_v29  ;;  %v4374_v21 = vpack.c.bf16 %v2319_v49, %v2318_v31 }
 0x392   : > { %3394 = vmatprep.mubr.f32.mxu0 %v6604_v54  ;;  %4365 = vmatpush3.bf16.msra.mxu0 %v4362_v36  ;;  %v7099_v36 = vsel %vm631_vm2, %v2558_v48, %v2559_v33  ;;  %v7110_v48 = vsel %vm631_vm2, %v2559_v33, %v2561_v50 }
 0x393   : > { %4367 = vmatprep.subr.bf16.mxu0 %v4366_v19 }
 0x394   : > { %v7086_v11 = vpop.f32.mrb[36].mxu0 }
 0x395   : > { %v2713_v3 = vpop.f32.mrb[37].mxu0  ;;  %3395 = vmatmul.mubr.f32.gmra.mrb[104].mxu0 %v4621_v26  ;;  %v7088_v7 = vld [vmem:[#allocation3 + $0x180] sm:$0xff]  ;;  %v7103_v30 = vld [vmem:[#allocation3 + $0x188] sm:$0xff] }
 0x396   : > { %3074 = vmatprep.mubr.f32.mxu1 %v7088_v7  ;;  %3399 = vmatprep.mubr.f32.mxu0 %v6624_v40  ;;  %v4622_v26 = vld [vmem:[#allocation3 + $0x68] sm:$0xff] }
 0x397   : > { %3075 = vmatmul.mubr.f32.gmra.mrb[60].mxu1 %v7099_v36  ;;  %4369 = vmatpush3.bf16.msra.mxu0 %v4366_v19  ;;  %v2321_v19 = vld [vmem:[%s7528_s3 + $0x478] sm:$0xff] }
 0x398   : > { %v7105_v29 = vpop.f32.mrb[38].mxu0  ;;  %3079 = vmatprep.mubr.f32.mxu1 %v7103_v30  ;;  %4371 = vmatprep.subr.bf16.mxu0 %v4370_v46  ;;  %v4378_v33 = vpack.c.bf16 %v2321_v19, %v2320_v44  ;;  %v4627_v44 = vld [vmem:[#allocation3 + $0xa8] sm:$0xff]  ;;  %v4628_v19 = vld [vmem:[#allocation3 + $0xb0] sm:$0xff] }
 0x399   : > { %v2718_v3 = vpop.f32.mrb[39].mxu0  ;;  %3400 = vmatmul.mubr.f32.gmra.mrb[106].mxu0 %v4622_v26  ;;  %v4624_v26 = vld [vmem:[#allocation3 + $0x80] sm:$0xff] }
 0x39a   : > { %3404 = vmatprep.mubr.f32.mxu0 %v6641_v47  ;;  %v4623_v3 = vld [vmem:[#allocation3 + $0x78] sm:$0xff] }
 0x39b   : > { %3080 = vmatmul.mubr.f32.gmra.mrb[62].mxu1 %v7110_v48  ;;  %4373 = vmatpush3.bf16.msra.mxu0 %v4370_v46 }
 0x39c   : > { %v7119_v31 = vpop.f32.mrb[40].mxu0  ;;  %3149 = vmatprep.mubr.f32.mxu1 %v5858_v25  ;;  %4375 = vmatprep.subr.bf16.mxu0 %v4374_v21 }
 0x39d   : > { %v2723_v49 = vpop.f32.mrb[41].mxu0  ;;  %3405 = vmatmul.mubr.f32.gmra.mrb[108].mxu0 %v4623_v3  ;;  %v4630_v3 = vld [vmem:[#allocation3 + $0xc8] sm:$0xff] }
 0x39e   : > { %3409 = vmatprep.mubr.f32.mxu0 %v6662_v10  ;;  %v4629_v49 = vld [vmem:[#allocation3 + $0xc0] sm:$0xff] }
 0x39f   : > { %3150 = vmatmul.mubr.f32.vlgmr.msra.gmra.mrb[0].mxu1 %v6494_v42  ;;  %4377 = vmatpush3.bf16.msra.mxu0 %v4374_v21  ;;  %v4625_v42 = vld [vmem:[#allocation3 + $0x90] sm:$0xff]  ;;  %v4626_v21 = vld [vmem:[#allocation3 + $0x98] sm:$0xff] }
 0x3a0   : > { %4398 = vmatpush1.bf16.msra.mxu1 %v6468_v43  ;;  %v7125_v46 = vpop.f32.mrb[42].mxu0  ;;  %3154 = vmatprep.mubr.f32.mxu1 %v5871_v35 }
 0x3a1   : > { %v2728_v50 = vpop.f32.mrb[43].mxu0  ;;  %3410 = vmatmul.mubr.f32.gmra.mrb[110].mxu0 %v4624_v26  ;;  %4383 = vmatprep.subr.bf16.mxu1 %v7608_v22 }
 0x3a2   : > { %3414 = vmatprep.mubr.f32.mxu0 %v6692_v28  ;;  %4379 = vmatprep.subr.bf16.mxu0 %v4378_v33  ;;  %v4632_v50 = vld [vmem:[#allocation3 + $0xe0] sm:$0xff] }
 0x3a3   : > { %3155 = vmatmul.mubr.f32.gmra.mrb[2].mxu1 %v6515_v24  ;;  %4381 = vmatpush3.bf16.msra.mxu0 %v4378_v33  ;;  %v4631_v33 = vld [vmem:[#allocation3 + $0xd8] sm:$0xff] }
 0x3a4   : > { %v7131_v25 = vpop.f32.mrb[44].mxu0  ;;  %3159 = vmatprep.mubr.f32.mxu1 %v5960_v59  ;;  %4399 = vmatpush1.bf16.msra.mxu1 %v6486_v53 }
 0x3a5   : > { %v2733_v43 = vpop.f32.mrb[45].mxu0  ;;  %3415 = vmatmul.mubr.f32.gmra.mrb[112].mxu0 %v4625_v42  ;;  %4384 = vmatprep.subr.bf16.mxu1 %v7608_v22 }
 0x3a6   : > { %3419 = vmatprep.mubr.f32.mxu0 %v6709_v8  ;;  %v7644_v43 = vld [vmem:[#allocation4_spill] sm:$0xff] }
 0x3a7   : > { %3160 = vmatmul.mubr.f32.gmra.mrb[4].mxu1 %v6542_v61 }
 0x3a8   : > { %v7138_v35 = vpop.f32.mrb[46].mxu0  ;;  %3164 = vmatprep.mubr.f32.mxu1 %v5982_v41  ;;  %4400 = vmatpush1.bf16.msra.mxu1 %v6512_v12 }
 0x3a9   : > { %v2738_v24 = vpop.f32.mrb[47].mxu0  ;;  %3420 = vmatmul.mubr.f32.gmra.mrb[114].mxu0 %v4626_v21  ;;  %4385 = vmatprep.subr.bf16.mxu1 %v7608_v22  ;;  %v7647_v21 = vld [vmem:[#allocation5_spill] sm:$0xff] }
 0x3aa   : > { %3424 = vmatprep.mubr.f32.mxu0 %v6722_v27  ;;  %v7646_v24 = vld [vmem:[#allocation22_spill] sm:$0xff] }
 0x3ab   : > { %3165 = vmatmul.mubr.f32.gmra.mrb[6].mxu1 %v6550_v37 }
 0x3ac   : > { %v7145_v53 = vpop.f32.mrb[48].mxu0  ;;  %3169 = vmatprep.mubr.f32.mxu1 %v6122_v1  ;;  %4401 = vmatpush1.bf16.msra.mxu1 %v6538_v55 }
 0x3ad   : > { %v2743_v61 = vpop.f32.mrb[49].mxu0  ;;  %3425 = vmatmul.mubr.f32.gmra.mrb[116].mxu0 %v4627_v44  ;;  %4386 = vmatprep.subr.bf16.mxu1 %v7608_v22  ;;  %v7649_v44 = vld [vmem:[#allocation14_spill] sm:$0xff] }
 0x3ae   : > { %3429 = vmatprep.mubr.f32.mxu0 %v6738_v62 }
 0x3af   : > { %3170 = vmatmul.mubr.f32.gmra.mrb[8].mxu1 %v6563_v6 }
 0x3b0   : > { %v7152_v12 = vpop.f32.mrb[50].mxu0  ;;  %3174 = vmatprep.mubr.f32.mxu1 %v6146_v45  ;;  %4402 = vmatpush1.bf16.msra.mxu1 %v6592_v38 }
 0x3b1   : > { %v2748_v37 = vpop.f32.mrb[51].mxu0  ;;  %3430 = vmatmul.mubr.f32.gmra.mrb[118].mxu0 %v4628_v19  ;;  %4387 = vmatprep.subr.bf16.mxu1 %v7608_v22  ;;  %v7651_v19 = vld [vmem:[#allocation6_spill] sm:$0xff] }
 0x3b2   : > { %3434 = vmatprep.mubr.f32.mxu0 %v6775_v60  ;;  %v7650_v37 = vld [vmem:[#allocation23_spill] sm:$0xff] }
 0x3b3   : > { %3175 = vmatmul.mubr.f32.gmra.mrb[10].mxu1 %v6569_v23 }
 0x3b4   : > { %v7159_v55 = vpop.f32.mrb[52].mxu0  ;;  %3179 = vmatprep.mubr.f32.mxu1 %v6263_v17  ;;  %4403 = vmatpush1.bf16.msra.mxu1 %v6615_v15 }
 0x3b5   : > { %v2753_v6 = vpop.f32.mrb[53].mxu0  ;;  %3435 = vmatmul.mubr.f32.gmra.mrb[120].mxu0 %v4629_v49  ;;  %4388 = vmatprep.subr.bf16.mxu1 %v7608_v22  ;;  %v7653_v49 = vld [vmem:[#allocation17_spill] sm:$0xff] }
 0x3b6   : > { %3439 = vmatprep.mubr.f32.mxu0 %v6792_v32 }
 0x3b7   : > { %3180 = vmatmul.mubr.f32.gmra.mrb[12].mxu1 %v6604_v54 }
 0x3b8   : > { %v7166_v38 = vpop.f32.mrb[54].mxu0  ;;  %3184 = vmatprep.mubr.f32.mxu1 %v6275_v52  ;;  %4404 = vmatpush1.bf16.msra.mxu1 %v6655_v63 }
 0x3b9   : > { %v2758_v23 = vpop.f32.mrb[55].mxu0  ;;  %3440 = vmatmul.mubr.f32.gmra.mrb[122].mxu0 %v4630_v3  ;;  %4389 = vmatprep.subr.bf16.mxu1 %v7608_v22 }
 0x3ba   : > { %3444 = vmatprep.mubr.f32.mxu0 %v6817_v58  ;;  %v7654_v23 = vld [vmem:[#allocation27_spill] sm:$0xff] }
 0x3bb   : > { %3185 = vmatmul.mubr.f32.gmra.mrb[14].mxu1 %v6624_v40 }
 0x3bc   : > { %v7173_v15 = vpop.f32.mrb[56].mxu0  ;;  %3189 = vmatprep.mubr.f32.mxu1 %v6310_v13  ;;  %4405 = vmatpush1.bf16.msra.mxu1 %v6674_v0 }
 0x3bd   : > { %v2763_v54 = vpop.f32.mrb[57].mxu0  ;;  %3445 = vmatmul.mubr.f32.gmra.mrb[124].mxu0 %v4631_v33  ;;  %4390 = vmatprep.subr.bf16.mxu1 %v7608_v22 }
 0x3be   : > { %3449 = vmatprep.mubr.f32.mxu0 %v6840_v4  ;;  %v7655_v54 = vld [vmem:[#allocation7_spill] sm:$0xff] }
 0x3bf   : > { %3190 = vmatmul.mubr.f32.gmra.mrb[16].mxu1 %v6641_v47  ;;  %v7643_v47 = vld [vmem:[#allocation11_spill] sm:$0xff] }
 0x3c0   : > { %v7180_v63 = vpop.f32.mrb[58].mxu0  ;;  %3194 = vmatprep.mubr.f32.mxu1 %v6318_v9  ;;  %4406 = vmatpush1.bf16.msra.mxu1 %v6697_v5 }
 0x3c1   : > { %v2768_v40 = vpop.f32.mrb[59].mxu0  ;;  %3450 = vmatmul.mubr.f32.gmra.mrb[126].mxu0 %v4632_v50  ;;  %4391 = vmatprep.subr.bf16.mxu1 %v7608_v22  ;;  %v7658_v50 = vld [vmem:[#allocation28_spill] sm:$0xff] }
 0x3c2   : > { %3454 = vmatprep.mubr.f32.mxu0 %v6858_v56  ;;  %v7657_v40 = vld [vmem:[#allocation24_spill] sm:$0xff] }
 0x3c3   : > { %3195 = vmatmul.mubr.f32.gmra.mrb[18].mxu1 %v6662_v10  ;;  %v7645_v10 = vld [vmem:[#allocation12_spill] sm:$0xff] }
 0x3c4   : > { %v7187_v0 = vpop.f32.mrb[60].mxu0  ;;  %3199 = vmatprep.mubr.f32.mxu1 %v6354_v34  ;;  %4407 = vmatpush1.bf16.msra.mxu1 %v7643_v47 }
 0x3c5   : > { %v2773_v26 = vpop.f32.mrb[61].mxu0  ;;  %3455 = vmatmul.mubr.f32.gmra.mrb[128].mxu0 %v6612_v16  ;;  %4392 = vmatprep.subr.bf16.mxu1 %v7608_v22 }
 0x3c6   : > { %3459 = vmatprep.mubr.f32.mxu0 %v6870_v20  ;;  %v7659_v26 = vld [vmem:[#allocation8_spill] sm:$0xff] }
 0x3c7   : > { %3200 = vmatmul.mubr.f32.gmra.mrb[20].mxu1 %v6692_v28  ;;  %v7648_v28 = vld [vmem:[#allocation13_spill] sm:$0xff] }
 0x3c8   : > { %v7195_v5 = vpop.f32.mrb[62].mxu0  ;;  %3204 = vmatprep.mubr.f32.mxu1 %v7644_v43  ;;  %4408 = vmatpush1.bf16.msra.mxu1 %v7645_v10 }
 0x3c9   : > { %v2778_v42 = vpop.f32.mrb[63].mxu0  ;;  %3460 = vmatmul.mubr.f32.gmra.mrb[130].mxu0 %v6627_v18  ;;  %4393 = vmatprep.subr.bf16.mxu1 %v7608_v22 }
 0x3ca   : > { %3464 = vmatprep.mubr.f32.mxu0 %v7646_v24  ;;  %v7661_v42 = vld [vmem:[#allocation25_spill] sm:$0xff] }
 0x3cb   : > { %3205 = vmatmul.mubr.f32.gmra.mrb[22].mxu1 %v6709_v8  ;;  %v7652_v8 = vld [vmem:[#allocation15_spill] sm:$0xff] }
 0x3cc   : > { %v7203_v16 = vpop.f32.mrb[64].mxu0  ;;  %3209 = vmatprep.mubr.f32.mxu1 %v7647_v21  ;;  %4409 = vmatpush1.bf16.msra.mxu1 %v7648_v28 }
 0x3cd   : > { %v2783_v61 = vpop.f32.mrb[65].mxu0  ;;  %3465 = vmatmul.mubr.f32.gmra.mrb[132].mxu0 %v7649_v44  ;;  %4394 = vmatprep.subr.bf16.mxu1 %v7608_v22 }
 0x3ce   : > { %3469 = vmatprep.mubr.f32.mxu0 %v7650_v37  ;;  %v7662_v61 = vld [vmem:[#allocation9_spill] sm:$0xff] }
 0x3cf   : > { %3210 = vmatmul.mubr.f32.gmra.mrb[24].mxu1 %v6722_v27  ;;  %v7656_v27 = vld [vmem:[#allocation18_spill] sm:$0xff] }
 0x3d0   : > { %v7211_v18 = vpop.f32.mrb[66].mxu0  ;;  %3214 = vmatprep.mubr.f32.mxu1 %v7651_v19  ;;  %4410 = vmatpush1.bf16.msra.mxu1 %v7652_v8 }
 0x3d1   : > { %v2788_v6 = vpop.f32.mrb[67].mxu0  ;;  %3470 = vmatmul.mubr.f32.gmra.mrb[134].mxu0 %v7653_v49  ;;  %4395 = vmatprep.subr.bf16.mxu1 %v7608_v22  ;;  %v7676_v49 = vld [vmem:[#allocation44_spill] sm:$0xff] }
 0x3d2   : > { %3474 = vmatprep.mubr.f32.mxu0 %v7654_v23  ;;  %v7665_v6 = vld [vmem:[#allocation16_spill] sm:$0xff] }
 0x3d3   : > { %3215 = vmatmul.mubr.f32.gmra.mrb[26].mxu1 %v6738_v62  ;;  %v7660_v62 = vld [vmem:[#allocation20_spill] sm:$0xff] }
 0x3d4   : > { %v7219_v3 = vpop.f32.mrb[68].mxu0  ;;  %3219 = vmatprep.mubr.f32.mxu1 %v7655_v54  ;;  %4411 = vmatpush1.bf16.msra.mxu1 %v7656_v27  ;;  %v2606_v27 = vrot.slane %v7103_v30, 2 }
 0x3d5   : > { %v2793_v33 = vpop.f32.mrb[69].mxu0  ;;  %3475 = vmatmul.mubr.f32.gmra.mrb[136].mxu0 %v7657_v40  ;;  %4396 = vmatprep.subr.bf16.mxu1 %v7608_v22  ;;  %v7678_v40 = vld [vmem:[#allocation42_spill] sm:$0xff] }
 0x3d6   : > { %3479 = vmatprep.mubr.f32.mxu0 %v7658_v50  ;;  %v2174_v33 = vld [vmem:[#allocation3 + $0x190] sm:$0x3] }
 0x3d7   : > { %3220 = vmatmul.mubr.f32.gmra.mrb[28].mxu1 %v6775_v60  ;;  %v7663_v60 = vld [vmem:[#allocation21_spill] sm:$0xff] }
 0x3d8   : > { %v7227_v47 = vpop.f32.mrb[70].mxu0  ;;  %3224 = vmatprep.mubr.f32.mxu1 %v7659_v26  ;;  %4412 = vmatpush1.bf16.msra.mxu1 %v7660_v62  ;;  %v2177_v62 = vld [vmem:[#allocation3 + $0x1a8] sm:$0x3] }
 0x3d9   : > { %v2798_v10 = vpop.f32.mrb[71].mxu0  ;;  %3480 = vmatmul.mubr.f32.gmra.mrb[138].mxu0 %v7661_v42  ;;  %4397 = vmatprep.subr.bf16.mxu1 %v7608_v22  ;;  %v7664_v22 = vld [vmem:[#allocation10_spill] sm:$0xff] }
 0x3da   : > { %4102 = vmatprep.mubr.f32.mxu0 %v5960_v59 }
 0x3db   : > { %3225 = vmatmul.mubr.f32.gmra.mrb[30].mxu1 %v6792_v32 }
 0x3dc   : > { %v7235_v28 = vpop.f32.mrb[72].mxu0  ;;  %3229 = vmatprep.mubr.f32.mxu1 %v7662_v61  ;;  %4413 = vmatpush1.bf16.msra.mxu1 %v7663_v60  ;;  %v2598_v60 = vrot.slane %v7088_v7, 1 }
 0x3dd   : > { %v2803_v44 = vpop.f32.mrb[73].mxu0  ;;  %4103 = vmatmul.mubr.f32.vlgmr.msra.gmra.mrb[140].mxu0 %v5982_v41 }
 0x3de   : > { %4105 = vmatprep.mubr.f32.mxu0 %v6122_v1  ;;  %v2625_v44 = vrot.slane %v2177_v62, 2 }
 0x3df   : > { %3230 = vmatmul.mubr.f32.gmra.mrb[32].mxu1 %v6817_v58  ;;  %v7666_v58 = vld [vmem:[#allocation19_spill] sm:$0xff] }
 0x3e0   : > { %v7242_v8 = vpop.f32.mrb[74].mxu0  ;;  %3234 = vmatprep.mubr.f32.mxu1 %v7664_v22 }
 0x3e1   : > { %v2808_v59 = vpop.f32.mrb[75].mxu0  ;;  %4106 = vmatmul.mubr.f32.gmra.mrb[142].mxu0 %v6146_v45 }
 0x3e2   : > { %4108 = vmatprep.mubr.f32.mxu0 %v6263_v17  ;;  %v7667_v17 = vld [vmem:[#allocation26_spill] sm:$0xff] }
 0x3e3   : > { %3235 = vmatmul.mubr.f32.gmra.mrb[34].mxu1 %v6840_v4 }
 0x3e4   : > { %v7248_v32 = vpop.f32.mrb[76].mxu0  ;;  %3239 = vmatprep.mubr.f32.mxu1 %v7665_v6 }
 0x3e5   : > { %v2813_v41 = vpop.f32.mrb[77].mxu0  ;;  %4109 = vmatmul.mubr.f32.gmra.mrb[144].mxu0 %v6275_v52 }
 0x3e6   : > { %4111 = vmatprep.mubr.f32.mxu0 %v6310_v13  ;;  %v7668_v13 = vld [vmem:[#allocation29_spill] sm:$0xff] }
 0x3e7   : > { %3240 = vmatmul.mubr.f32.gmra.mrb[36].mxu1 %v6858_v56 }
 0x3e8   : > { %v7254_v1 = vpop.f32.mrb[78].mxu0  ;;  %3244 = vmatprep.mubr.f32.mxu1 %v7666_v58 }
 0x3e9   : > { %v2818_v45 = vpop.f32.mrb[79].mxu0  ;;  %4112 = vmatmul.mubr.f32.gmra.mrb[146].mxu0 %v6318_v9 }
 0x3ea   : > { %4114 = vmatprep.mubr.f32.mxu0 %v6354_v34  ;;  %v7669_v34 = vld [vmem:[#allocation32_spill] sm:$0xff] }
 0x3eb   : > { %3245 = vmatmul.mubr.f32.gmra.mrb[38].mxu1 %v6870_v20  ;;  %v7670_v20 = vld [vmem:[#allocation35_spill] sm:$0xff] }
 0x3ec   : > { %3249 = vmatprep.mubr.f32.mxu1 %v7667_v17 }
 0x3ed   : > { %4115 = vmatmul.mubr.f32.gmra.mrb[148].mxu0 %v7644_v43  ;;  %v7671_v43 = vld [vmem:[#allocation38_spill] sm:$0xff] }
 0x3ee   : > { %4117 = vmatprep.mubr.f32.mxu0 %v7647_v21  ;;  %v7673_v21 = vld [vmem:[#allocation41_spill] sm:$0xff] }
 0x3ef   : > { %3250 = vmatmul.mubr.f32.gmra.mrb[40].mxu1 %v7646_v24  ;;  %v7672_v24 = vld [vmem:[#allocation33_spill] sm:$0xff] }
 0x3f0   : > { %v7264_v52 = vpop.f32.mrb[80].mxu0  ;;  %3254 = vmatprep.mubr.f32.mxu1 %v7668_v13 }
 0x3f1   : > { %v2823_v4 = vpop.f32.mrb[81].mxu0  ;;  %4118 = vmatmul.mubr.f32.gmra.mrb[150].mxu0 %v7651_v19  ;;  %v7675_v19 = vld [vmem:[#allocation39_spill] sm:$0xff] }
 0x3f2   : > { %4120 = vmatprep.mubr.f32.mxu0 %v7655_v54  ;;  %v2605_v54 = vrot.slane %v7088_v7, 2  ;;  %v7681_v4 = vld [vmem:[#allocation31_spill] sm:$0xff] }
 0x3f3   : > { %3255 = vmatmul.mubr.f32.gmra.mrb[42].mxu1 %v7650_v37  ;;  %v7674_v37 = vld [vmem:[#allocation34_spill] sm:$0xff] }
 0x3f4   : > { %v7270_v9 = vpop.f32.mrb[82].mxu0  ;;  %3259 = vmatprep.mubr.f32.mxu1 %v7669_v34 }
 0x3f5   : > { %v2828_v56 = vpop.f32.mrb[83].mxu0  ;;  %4121 = vmatmul.mubr.f32.gmra.mrb[152].mxu0 %v7659_v26 }
 0x3f6   : > { %4123 = vmatprep.mubr.f32.mxu0 %v7662_v61  ;;  %v2607_v61 = vsel %vm631_vm2, %v2605_v54, %v2606_v27  ;;  %v7683_v56 = vld [vmem:[#allocation37_spill] sm:$0xff] }
 0x3f7   : > { %3260 = vmatmul.mubr.f32.gmra.mrb[44].mxu1 %v7654_v23  ;;  %v7677_v23 = vld [vmem:[#allocation40_spill] sm:$0xff] }
 0x3f8   : > { %3264 = vmatprep.mubr.f32.mxu1 %v7670_v20 }
 0x3f9   : > { %4124 = vmatmul.mubr.f32.gmra.mrb[154].mxu0 %v7664_v22  ;;  %v7679_v22 = vld [vmem:[#allocation43_spill] sm:$0xff] }
 0x3fa   : > { %4126 = vmatprep.mubr.f32.mxu0 %v7665_v6 }
 0x3fb   : > { %3265 = vmatmul.mubr.f32.gmra.mrb[46].mxu1 %v7658_v50  ;;  %v4633_v50 = vld [vmem:[#allocation3] sm:$0xff] }
 0x3fc   : > { %3269 = vmatprep.mubr.f32.mxu1 %v7671_v43  ;;  %v2622_v26 = vrot.slane %v4633_v50, 2 }
 0x3fd   : > { %4127 = vmatmul.mubr.f32.gmra.mrb[156].mxu0 %v7666_v58 }
 0x3fe   : > { %4129 = vmatprep.mubr.f32.mxu0 %v7667_v17  ;;  %v2626_v45 = vsel %vm631_vm2, %v2622_v26, %v2625_v44 }
 0x3ff   : > { %3270 = vmatmul.mubr.f32.gmra.mrb[48].mxu1 %v7672_v24 }
 0x400   : > { %3274 = vmatprep.mubr.f32.mxu1 %v7673_v21 }
 0x401   : > { %4130 = vmatmul.mubr.f32.gmra.mrb[158].mxu0 %v7668_v13  ;;  %v7680_v13 = vld [vmem:[#allocation30_spill] sm:$0xff] }
 0x402   : > { %4132 = vmatprep.mubr.f32.mxu0 %v7669_v34  ;;  %v7682_v34 = vld [vmem:[#allocation36_spill] sm:$0xff] }
 0x403   : > { %3275 = vmatmul.mubr.f32.gmra.mrb[50].mxu1 %v7674_v37 }
 0x404   : > { %3279 = vmatprep.mubr.f32.mxu1 %v7017_v57 }
 0x405   : > { %4133 = vmatmul.mubr.f32.gmra.mrb[160].mxu0 %v7670_v20 }
 0x406   : > { %4135 = vmatprep.mubr.f32.mxu0 %v7671_v43 }
 0x407   : > { %3280 = vmatmul.mubr.f32.gmra.mrb[52].mxu1 %v7675_v19 }
 0x408   : > { %3284 = vmatprep.mubr.f32.mxu1 %v7676_v49 }
 0x409   : > { %4136 = vmatmul.mubr.f32.gmra.mrb[162].mxu0 %v7673_v21 }
 0x40a   : > { %4138 = vmatprep.mubr.f32.mxu0 %v7017_v57  ;;  %v2608_v57 = vrot.slane %v2174_v33, 2 }
 0x40b   : > { %3285 = vmatmul.mubr.f32.gmra.mrb[54].mxu1 %v7677_v23 }
 0x40c   : > { %3289 = vmatprep.mubr.f32.mxu1 %v7099_v36  ;;  %v2609_v6 = vsel %vm631_vm2, %v2606_v27, %v2608_v57 }
 0x40d   : > { %4139 = vmatmul.mubr.f32.gmra.mrb[164].mxu0 %v7676_v49 }
 0x40e   : > { %4141 = vmatprep.mubr.f32.mxu0 %v7099_v36  ;;  %v2599_v36 = vrot.slane %v7103_v30, 1 }
 0x40f   : > { %3290 = vmatmul.mubr.f32.gmra.mrb[56].mxu1 %v7678_v40 }
 0x410   : > { %v7302_v10 = vpop.f32.mrb[84].mxu0  ;;  %3294 = vmatprep.mubr.f32.mxu1 %v7110_v48  ;;  %v2600_v58 = vsel %vm454_vm3, %v2598_v60, %v2599_v36 }
 0x411   : > { %v2833_v42 = vpop.f32.mrb[85].mxu0  ;;  %4142 = vmatmul.mubr.f32.gmra.mrb[166].mxu0 %v7110_v48  ;;  %v2601_v48 = vrot.slane %v2174_v33, 1 }
 0x412   : > { %4144 = vmatprep.mubr.f32.mxu0 %v2607_v61 }
 0x413   : > { %3295 = vmatmul.mubr.f32.gmra.mrb[58].mxu1 %v7679_v22  ;;  %v2602_v17 = vsel %vm454_vm3, %v2599_v36, %v2601_v48 }
 0x414   : > { %v7310_v59 = vpop.f32.mrb[86].mxu0  ;;  %3299 = vmatprep.mubr.f32.mxu1 %v2607_v61 }
 0x415   : > { %v2838_v41 = vpop.f32.mrb[87].mxu0  ;;  %4145 = vmatmul.mubr.f32.gmra.mrb[168].mxu0 %v2609_v6 }
 0x416   : > { %4147 = vmatprep.mubr.f32.mxu0 %v2622_v26 }
 0x417   : > { %3300 = vmatmul.mubr.f32.gmra.mrb[60].mxu1 %v2600_v58 }
 0x418   : > { %3304 = vmatprep.mubr.f32.mxu1 %v2609_v6 }
 0x419   : > { %4148 = vmatmul.mubr.f32.gmra.mrb[170].mxu0 %v2626_v45 }
 0x41b   : > { %3305 = vmatmul.mubr.f32.gmra.mrb[62].mxu1 %v2602_v17 }
 0x41c   : > { %3484 = vmatprep.mubr.f32.mxu1 %v7672_v24 }
 0x41f   : > { %3485 = vmatmul.mubr.f32.vlgmr.msra.gmra.mrb[44].mxu1 %v7680_v13 }
 0x420   : > { %3489 = vmatprep.mubr.f32.mxu1 %v7674_v37  ;;  %v2615_v37 = vrot.slane %v4633_v50, 1 }
 0x423   : > { %3490 = vmatmul.mubr.f32.gmra.mrb[46].mxu1 %v7681_v4 }
 0x424   : > { %3494 = vmatprep.mubr.f32.mxu1 %v7675_v19  ;;  %v2618_v19 = vrot.slane %v2177_v62, 1 }
 0x427   : > { %3495 = vmatmul.mubr.f32.gmra.mrb[48].mxu1 %v7682_v34 }
 0x428   : > { %3499 = vmatprep.mubr.f32.mxu1 %v7677_v23 }
 0x42b   : > { %3500 = vmatmul.mubr.f32.gmra.mrb[50].mxu1 %v7683_v56 }
 0x42c   : > { %3504 = vmatprep.mubr.f32.mxu1 %v7678_v40 }
 0x42f   : > { %3505 = vmatmul.mubr.f32.gmra.mrb[52].mxu1 %v7011_v51  ;;  %v2619_v51 = vsel %vm454_vm3, %v2615_v37, %v2618_v19 }
 0x430   : > { %v7326_v20 = vpop.f32.mrb[88].mxu0  ;;  %3509 = vmatprep.mubr.f32.mxu1 %v7679_v22 }
 0x431   : > { %v2843_v43 = vpop.f32.mrb[89].mxu0 }
 0x433   : > { %3510 = vmatmul.mubr.f32.gmra.mrb[54].mxu1 %v7013_v14 }
 0x434   : > { %v7330_v24 = vpop.f32.mrb[90].mxu0  ;;  %3514 = vmatprep.mubr.f32.mxu1 %v2600_v58 }
 0x435   : > { %v2848_v21 = vpop.f32.mrb[91].mxu0 }
 0x437   : > { %3515 = vmatmul.mubr.f32.gmra.mrb[56].mxu1 %v7088_v7 }
 0x438   : > { %3519 = vmatprep.mubr.f32.mxu1 %v2602_v17 }
 0x43b   : > { %3520 = vmatmul.mubr.f32.gmra.mrb[58].mxu1 %v7103_v30 }
 0x43c   : > { %3524 = vmatprep.mubr.f32.mxu1 %v2615_v37 }
 0x43f   : > { %3525 = vmatmul.mubr.f32.gmra.mrb[60].mxu1 %v4633_v50 }
 0x440   : > { %3529 = vmatprep.mubr.f32.mxu1 %v2619_v51 }
 0x443   : > { %3530 = vmatmul.mubr.f32.gmra.mrb[62].mxu1 %v4633_v50  ;;  %v7342_v50 = vld [vmem:[%s7529_s4] ss:$0 sm:$0xff] }
 0x444   : > { %v2702_v22 = vadd.f32 %v7342_v50, %v7064_v2  ;;  %v2707_v17 = vadd.f32 %v7342_v50, %v7074_v39  ;;  %v2712_v37 = vadd.f32 %v7342_v50, %v7086_v11  ;;  %v2717_v39 = vadd.f32 %v7342_v50, %v7105_v29 }
 0x445   : > { %v2722_v11 = vadd.f32 %v7342_v50, %v7119_v31  ;;  %v2727_v29 = vadd.f32 %v7342_v50, %v7125_v46  ;;  %v2732_v31 = vadd.f32 %v7342_v50, %v7131_v25  ;;  %v2737_v46 = vadd.f32 %v7342_v50, %v7138_v35 }
 0x446   : > { %v2742_v25 = vadd.f32 %v7342_v50, %v7145_v53  ;;  %v2747_v35 = vadd.f32 %v7342_v50, %v7152_v12  ;;  %v2752_v53 = vadd.f32 %v7342_v50, %v7159_v55  ;;  %v2757_v12 = vadd.f32 %v7342_v50, %v7166_v38 }
 0x447   : > { %v2762_v55 = vadd.f32 %v7342_v50, %v7173_v15  ;;  %v2767_v38 = vadd.f32 %v7342_v50, %v7180_v63  ;;  %v2772_v15 = vadd.f32 %v7342_v50, %v7187_v0  ;;  %v2777_v63 = vadd.f32 %v7342_v50, %v7195_v5 }
 0x448   : > { %v2782_v0 = vadd.f32 %v7342_v50, %v7203_v16 }
 0x450   : > { %v7335_v49 = vpop.f32.mrb[92].mxu0 }
 0x451   : > { %v2853_v14 = vpop.f32.mrb[93].mxu0 }
 0x454   : > { %v7337_v23 = vpop.f32.mrb[94].mxu0 }
 0x455   : > { %v2858_v54 = vpop.f32.mrb[95].mxu0 }
 0x458   : > { %v3376_v27 = vpop.f32.mrb[96].mxu0 }
 0x459   : > { %v3378_v33 = vpop.f32.mrb[97].mxu0 }
 0x45c   : > { %v3381_v40 = vpop.f32.mrb[98].mxu0 }
 0x45d   : > { %v3383_v7 = vpop.f32.mrb[99].mxu0 }
 0x460   : > { %v3386_v26 = vpop.f32.mrb[100].mxu0 }
 0x461   : > { %v3388_v62 = vpop.f32.mrb[101].mxu0 }
 0x464   : > { %v3391_v57 = vpop.f32.mrb[102].mxu0 }
 0x465   : > { %v3393_v30 = vpop.f32.mrb[103].mxu0 }
 0x468   : > { %v3396_v42 = vpop.f32.mrb[104].mxu0 }
 0x469   : > { %v3398_v61 = vpop.f32.mrb[105].mxu0 }
 0x46c   : > { %v3401_v60 = vpop.f32.mrb[106].mxu0 }
 0x46d   : > { %v3403_v36 = vpop.f32.mrb[107].mxu0 }
 0x470   : > { %v3406_v44 = vpop.f32.mrb[108].mxu0 }
 0x471   : > { %v3408_v6 = vpop.f32.mrb[109].mxu0 }
 0x472   : > { %v3151_v41 = vpop.f32.mrb[0].mxu1 }
 0x473   : > { %v4415_v58 = vadd.f32 %v3151_v41, %v2702_v22  ;;  %v3153_v48 = vpop.f32.mrb[1].mxu1 }
 0x474   : > { %v3411_v45 = vpop.f32.mrb[110].mxu0 }
 0x475   : > { %v3413_v13 = vpop.f32.mrb[111].mxu0  ;;  %v7348_v4 = vadd.f32 %v4415_v58, %v3376_v27 }
 0x476   : > { %v3156_v34 = vpop.f32.mrb[2].mxu1 }
 0x477   : > { %v4418_v56 = vadd.f32 %v3156_v34, %v2707_v17  ;;  %v3158_v43 = vpop.f32.mrb[3].mxu1 }
 0x478   : > { %v3416_v21 = vpop.f32.mrb[112].mxu0 }
 0x479   : > { %v3418_v19 = vpop.f32.mrb[113].mxu0  ;;  %v7352_v2 = vadd.f32 %v4418_v56, %v3381_v40 }
 0x47a   : > { %v3161_v51 = vpop.f32.mrb[4].mxu1 }
 0x47b   : > { %v4421_v14 = vadd.f32 %v3161_v51, %v2712_v37  ;;  %v3163_v54 = vpop.f32.mrb[5].mxu1 }
 0x47c   : > { %v3421_v33 = vpop.f32.mrb[114].mxu0 }
 0x47d   : > { %v3423_v7 = vpop.f32.mrb[115].mxu0  ;;  %v7356_v27 = vadd.f32 %v4421_v14, %v3386_v26 }
 0x47e   : > { %v3166_v62 = vpop.f32.mrb[6].mxu1 }
 0x47f   : > { %v4424_v30 = vadd.f32 %v3166_v62, %v2717_v39  ;;  %v3168_v61 = vpop.f32.mrb[7].mxu1 }
 0x480   : > { %v3426_v36 = vpop.f32.mrb[116].mxu0 }
 0x481   : > { %v3428_v22 = vpop.f32.mrb[117].mxu0  ;;  %v7360_v40 = vadd.f32 %v4424_v30, %v3391_v57 }
 0x482   : > { %v3171_v6 = vpop.f32.mrb[8].mxu1 }
 0x483   : > { %v4427_v41 = vadd.f32 %v3171_v6, %v2722_v11  ;;  %v3173_v58 = vpop.f32.mrb[9].mxu1 }
 0x484   : > { %v3431_v48 = vpop.f32.mrb[118].mxu0 }
 0x485   : > { %v3433_v17 = vpop.f32.mrb[119].mxu0  ;;  %v7364_v26 = vadd.f32 %v4427_v41, %v3396_v42 }
 0x486   : > { %v3176_v13 = vpop.f32.mrb[10].mxu1 }
 0x487   : > { %v4430_v34 = vadd.f32 %v3176_v13, %v2727_v29  ;;  %v3178_v56 = vpop.f32.mrb[11].mxu1 }
 0x488   : > { %v3436_v43 = vpop.f32.mrb[120].mxu0 }
 0x489   : > { %v3438_v37 = vpop.f32.mrb[121].mxu0  ;;  %v7368_v57 = vadd.f32 %v4430_v34, %v3401_v60 }
 0x48a   : > { %v3181_v19 = vpop.f32.mrb[12].mxu1 }
 0x48b   : > { %v4433_v51 = vadd.f32 %v3181_v19, %v2732_v31  ;;  %v3183_v14 = vpop.f32.mrb[13].mxu1 }
 0x48c   : > { %v3441_v54 = vpop.f32.mrb[122].mxu0 }
 0x48d   : > { %v3443_v39 = vpop.f32.mrb[123].mxu0  ;;  %v7372_v42 = vadd.f32 %v4433_v51, %v3406_v44 }
 0x48e   : > { %v3186_v7 = vpop.f32.mrb[14].mxu1 }
 0x48f   : > { %v4436_v62 = vadd.f32 %v3186_v7, %v2737_v46  ;;  %v3188_v30 = vpop.f32.mrb[15].mxu1 }
 0x490   : > { %v3446_v61 = vpop.f32.mrb[124].mxu0 }
 0x491   : > { %v3448_v11 = vpop.f32.mrb[125].mxu0  ;;  %v7376_v60 = vadd.f32 %v4436_v62, %v3411_v45 }
 0x492   : > { %v3191_v22 = vpop.f32.mrb[16].mxu1 }
 0x493   : > { %v4439_v6 = vadd.f32 %v3191_v22, %v2742_v25  ;;  %v3193_v41 = vpop.f32.mrb[17].mxu1 }
 0x494   : > { %v3451_v58 = vpop.f32.mrb[126].mxu0 }
 0x495   : > { %v3453_v29 = vpop.f32.mrb[127].mxu0  ;;  %v7380_v44 = vadd.f32 %v4439_v6, %v3416_v21 }
 0x496   : > { %v3196_v17 = vpop.f32.mrb[18].mxu1 }
 0x497   : > { %v4442_v13 = vadd.f32 %v3196_v17, %v2747_v35  ;;  %v3198_v34 = vpop.f32.mrb[19].mxu1 }
 0x498   : > { %v3456_v56 = vpop.f32.mrb[128].mxu0 }
 0x499   : > { %v3458_v31 = vpop.f32.mrb[129].mxu0  ;;  %v7384_v45 = vadd.f32 %v4442_v13, %v3421_v33 }
 0x49a   : > { %v3201_v37 = vpop.f32.mrb[20].mxu1 }
 0x49b   : > { %v4445_v19 = vadd.f32 %v3201_v37, %v2752_v53  ;;  %v3203_v51 = vpop.f32.mrb[21].mxu1 }
 0x49c   : > { %v7386_v14 = vpop.f32.mrb[130].mxu0 }
 0x49d   : > { %v3463_v21 = vpop.f32.mrb[131].mxu0  ;;  %v7390_v46 = vadd.f32 %v4445_v19, %v3426_v36 }
 0x49e   : > { %v3206_v39 = vpop.f32.mrb[22].mxu1 }
 0x49f   : > { %v4448_v7 = vadd.f32 %v3206_v39, %v2757_v12  ;;  %v3208_v62 = vpop.f32.mrb[23].mxu1 }
 0x4a0   : > { %v7392_v30 = vpop.f32.mrb[132].mxu0 }
 0x4a1   : > { %v3468_v33 = vpop.f32.mrb[133].mxu0  ;;  %v7396_v25 = vadd.f32 %v4448_v7, %v3431_v48 }
 0x4a2   : > { %v3211_v11 = vpop.f32.mrb[24].mxu1 }
 0x4a3   : > { %v4451_v22 = vadd.f32 %v3211_v11, %v2762_v55  ;;  %v3213_v6 = vpop.f32.mrb[25].mxu1 }
 0x4a4   : > { %v7398_v41 = vpop.f32.mrb[134].mxu0 }
 0x4a5   : > { %v3473_v36 = vpop.f32.mrb[135].mxu0  ;;  %v7402_v35 = vadd.f32 %v4451_v22, %v3436_v43 }
 0x4a6   : > { %v3216_v29 = vpop.f32.mrb[26].mxu1 }
 0x4a7   : > { %v4454_v17 = vadd.f32 %v3216_v29, %v2767_v38  ;;  %v3218_v13 = vpop.f32.mrb[27].mxu1 }
 0x4a8   : > { %v7404_v34 = vpop.f32.mrb[136].mxu0 }
 0x4a9   : > { %v3478_v48 = vpop.f32.mrb[137].mxu0  ;;  %v7408_v53 = vadd.f32 %v4454_v17, %v3441_v54 }
 0x4aa   : > { %v3221_v31 = vpop.f32.mrb[28].mxu1 }
 0x4ab   : > { %v4457_v37 = vadd.f32 %v3221_v31, %v2772_v15  ;;  %v3223_v19 = vpop.f32.mrb[29].mxu1 }
 0x4ac   : > { %v7410_v51 = vpop.f32.mrb[138].mxu0 }
 0x4ad   : > { %v3483_v43 = vpop.f32.mrb[139].mxu0  ;;  %v7414_v12 = vadd.f32 %v4457_v37, %v3446_v61 }
 0x4ae   : > { %v3226_v21 = vpop.f32.mrb[30].mxu1 }
 0x4af   : > { %v4460_v39 = vadd.f32 %v3226_v21, %v2777_v63  ;;  %v3228_v7 = vpop.f32.mrb[31].mxu1 }
 0x4b0   : > { %v4104_v62 = vpop.f32.mrb[140].mxu0 }
 0x4b1   : > { %v3607_v54 = vadd.f32 %v7352_v2, %v4104_v62  ;;  %v3601_v55 = vpop.f32.mrb[141].mxu0  ;;  %v7419_v33 = vadd.f32 %v4460_v39, %v3451_v58  ;;  %v2787_v58 = vadd.f32 %v7342_v50, %v7211_v18  ;;  %v2792_v18 = vadd.f32 %v7342_v50, %v7219_v3 }
 0x4b2   : > { %v3602_v5 = vadd.f32 %v7348_v4, %v3601_v55  ;;  %v3231_v61 = vpop.f32.mrb[32].mxu1  ;;  %v2797_v3 = vadd.f32 %v7342_v50, %v7227_v47  ;;  %v2802_v47 = vadd.f32 %v7342_v50, %v7235_v28  ;;  %v2807_v28 = vadd.f32 %v7342_v50, %v7242_v8 }
 0x4b3   : > { %v3761_v11 = vmax.f32 %v3607_v54, 0.0  ;;  %v4463_v22 = vadd.f32 %v3231_v61, %v2782_v0  ;;  %v3233_v6 = vpop.f32.mrb[33].mxu1 }
 0x4b4   : > { %v3760_v16 = vmax.f32 %v3602_v5, 0.0  ;;  %v4107_v2 = vpop.f32.mrb[142].mxu0 }
 0x4b5   : > { %3793 = vst [vmem:[%s7426_s25 + $0x8] sm:$0xff] %v3761_v11  ;;  %v3617_v38 = vadd.f32 %v7360_v40, %v4107_v2  ;;  %v3611_v36 = vpop.f32.mrb[143].mxu0  ;;  %v7433_v29 = vadd.f32 %v4463_v22, %v3456_v56 }
 0x4b6   : > { %3792 = vst [vmem:[%s7426_s25] sm:$0xff] %v3760_v16  ;;  %v3612_v4 = vadd.f32 %v7356_v27, %v3611_v36  ;;  %v3236_v17 = vpop.f32.mrb[34].mxu1 }
 0x4b7   : > { %v3763_v13 = vmax.f32 %v3617_v38, 0.0  ;;  %v4466_v15 = vadd.f32 %v3236_v17, %v2787_v58  ;;  %v3238_v48 = vpop.f32.mrb[35].mxu1 }
 0x4b8   : > { %v3762_v31 = vmax.f32 %v3612_v4, 0.0  ;;  %v4110_v37 = vpop.f32.mrb[144].mxu0 }
 0x4b9   : > { %3795 = vst [vmem:[%s7426_s25 + $0x18] sm:$0xff] %v3763_v13  ;;  %v3627_v40 = vadd.f32 %v7368_v57, %v4110_v37  ;;  %v3621_v19 = vpop.f32.mrb[145].mxu0  ;;  %v7442_v56 = vadd.f32 %v4466_v15, %v7386_v14 }
 0x4ba   : > { %3794 = vst [vmem:[%s7426_s25 + $0x10] sm:$0xff] %v3762_v31  ;;  %v3622_v27 = vadd.f32 %v7364_v26, %v3621_v19  ;;  %v3241_v63 = vpop.f32.mrb[36].mxu1 }
 0x4bb   : > { %v3765_v43 = vmax.f32 %v3627_v40, 0.0  ;;  %v4469_v21 = vadd.f32 %v3241_v63, %v2792_v18  ;;  %v3243_v39 = vpop.f32.mrb[37].mxu1 }
 0x4bc   : > { %v3764_v7 = vmax.f32 %v3622_v27, 0.0  ;;  %v4113_v62 = vpop.f32.mrb[146].mxu0 }
 0x4bd   : > { %3797 = vst [vmem:[%s7426_s25 + $0x28] sm:$0xff] %v3765_v43  ;;  %v3637_v57 = vadd.f32 %v7376_v60, %v4113_v62  ;;  %v3631_v0 = vpop.f32.mrb[147].mxu0  ;;  %v7451_v14 = vadd.f32 %v4469_v21, %v7392_v30 }
 0x4be   : > { %3796 = vst [vmem:[%s7426_s25 + $0x20] sm:$0xff] %v3764_v7  ;;  %v3632_v26 = vadd.f32 %v7372_v42, %v3631_v0  ;;  %v3246_v54 = vpop.f32.mrb[38].mxu1 }
 0x4bf   : > { %v3767_v55 = vmax.f32 %v3637_v57, 0.0  ;;  %v4472_v5 = vadd.f32 %v3246_v54, %v2797_v3  ;;  %v3248_v61 = vpop.f32.mrb[39].mxu1 }
 0x4c0   : > { %v3766_v11 = vmax.f32 %v3632_v26, 0.0  ;;  %v4116_v22 = vpop.f32.mrb[148].mxu0 }
 0x4c1   : > { %3799 = vst [vmem:[%s7426_s25 + $0x38] sm:$0xff] %v3767_v55  ;;  %v3647_v60 = vadd.f32 %v7384_v45, %v4116_v22  ;;  %v3641_v6 = vpop.f32.mrb[149].mxu0  ;;  %v4473_v30 = vadd.f32 %v4472_v5, %v7398_v41 }
 0x4c2   : > { %3798 = vst [vmem:[%s7426_s25 + $0x30] sm:$0xff] %v3766_v11  ;;  %v3642_v42 = vadd.f32 %v7380_v44, %v3641_v6  ;;  %v3251_v16 = vpop.f32.mrb[40].mxu1 }
 0x4c3   : > { %v3769_v2 = vmax.f32 %v3647_v60, 0.0  ;;  %v4475_v58 = vadd.f32 %v3251_v16, %v2802_v47  ;;  %v3253_v38 = vpop.f32.mrb[41].mxu1 }
 0x4c4   : > { %v3768_v36 = vmax.f32 %v3642_v42, 0.0  ;;  %v4119_v4 = vpop.f32.mrb[150].mxu0 }
 0x4c5   : > { %3801 = vst [vmem:[%s7426_s25 + $0x48] sm:$0xff] %v3769_v2  ;;  %v3657_v45 = vadd.f32 %v7396_v25, %v4119_v4  ;;  %v3651_v17 = vpop.f32.mrb[151].mxu0  ;;  %v4476_v41 = vadd.f32 %v4475_v58, %v7404_v34 }
 0x4c6   : > { %3800 = vst [vmem:[%s7426_s25 + $0x40] sm:$0xff] %v3768_v36  ;;  %v3652_v44 = vadd.f32 %v7390_v46, %v3651_v17  ;;  %v3256_v13 = vpop.f32.mrb[42].mxu1  ;;  %v2812_v36 = vadd.f32 %v7342_v50, %v7248_v32  ;;  %v2817_v17 = vadd.f32 %v7342_v50, %v7254_v1 }
 0x4c7   : > { %v3771_v15 = vmax.f32 %v3657_v45, 0.0  ;;  %v4478_v48 = vadd.f32 %v3256_v13, %v2807_v28  ;;  %v3258_v31 = vpop.f32.mrb[43].mxu1 }
 0x4c8   : > { %v3770_v37 = vmax.f32 %v3652_v44, 0.0  ;;  %v4122_v18 = vpop.f32.mrb[152].mxu0  ;;  %v2822_v31 = vadd.f32 %v7342_v50, %v7264_v52  ;;  %v2832_v52 = vadd.f32 %v7342_v50, %v7302_v10  ;;  %v2842_v10 = vadd.f32 %v7342_v50, %v7326_v20 }
 0x4c9   : > { %3803 = vst [vmem:[%s7426_s25 + $0x58] sm:$0xff] %v3771_v15  ;;  %v3667_v8 = vadd.f32 %v7408_v53, %v4122_v18  ;;  %v3661_v40 = vpop.f32.mrb[153].mxu0  ;;  %v4479_v25 = vadd.f32 %v4478_v48, %v7410_v51  ;;  %v2852_v20 = vadd.f32 %v7342_v50, %v7335_v49 }
 0x4ca   : > { %3802 = vst [vmem:[%s7426_s25 + $0x50] sm:$0xff] %v3770_v37  ;;  %v3662_v34 = vadd.f32 %v7402_v35, %v3661_v40 }
 0x4cb   : > { %v3773_v46 = vmax.f32 %v3667_v8, 0.0 }
 0x4cc   : > { %v3772_v19 = vmax.f32 %v3662_v34, 0.0  ;;  %v4125_v27 = vpop.f32.mrb[154].mxu0 }
 0x4cd   : > { %3805 = vst [vmem:[%s7426_s25 + $0x68] sm:$0xff] %v3773_v46  ;;  %v3677_v63 = vadd.f32 %v7419_v33, %v4125_v27  ;;  %v3671_v43 = vpop.f32.mrb[155].mxu0 }
 0x4ce   : > { %3804 = vst [vmem:[%s7426_s25 + $0x60] sm:$0xff] %v3772_v19  ;;  %v3672_v53 = vadd.f32 %v7414_v12, %v3671_v43 }
 0x4cf   : > { %v3775_v21 = vmax.f32 %v3677_v63, 0.0 }
 0x4d0   : > { %v3774_v39 = vmax.f32 %v3672_v53, 0.0  ;;  %v4128_v7 = vpop.f32.mrb[156].mxu0 }
 0x4d1   : > { %3807 = vst [vmem:[%s7426_s25 + $0x78] sm:$0xff] %v3775_v21  ;;  %v3687_v51 = vadd.f32 %v7442_v56, %v4128_v7  ;;  %v3681_v35 = vpop.f32.mrb[157].mxu0 }
 0x4d2   : > { %3806 = vst [vmem:[%s7426_s25 + $0x70] sm:$0xff] %v3774_v39  ;;  %v3682_v62 = vadd.f32 %v7433_v29, %v3681_v35 }
 0x4d3   : > { %v3777_v3 = vmax.f32 %v3687_v51, 0.0 }
 0x4d4   : > { %v3776_v57 = vmax.f32 %v3682_v62, 0.0  ;;  %v4131_v33 = vpop.f32.mrb[158].mxu0 }
 0x4d5   : > { %3809 = vst [vmem:[%s7426_s25 + $0x88] sm:$0xff] %v3777_v3  ;;  %v3697_v0 = vadd.f32 %v4473_v30, %v4131_v33  ;;  %v3691_v26 = vpop.f32.mrb[159].mxu0 }
 0x4d6   : > { %3808 = vst [vmem:[%s7426_s25 + $0x80] sm:$0xff] %v3776_v57  ;;  %v3692_v12 = vadd.f32 %v7451_v14, %v3691_v26 }
 0x4d7   : > { %v3779_v54 = vmax.f32 %v3697_v0, 0.0 }
 0x4d8   : > { %v3778_v55 = vmax.f32 %v3692_v12, 0.0  ;;  %v4134_v5 = vpop.f32.mrb[160].mxu0 }
 0x4d9   : > { %3811 = vst [vmem:[%s7426_s25 + $0x98] sm:$0xff] %v3779_v54  ;;  %v3707_v56 = vadd.f32 %v4479_v25, %v4134_v5  ;;  %v3701_v61 = vpop.f32.mrb[161].mxu0  ;;  %v2827_v25 = vadd.f32 %v7342_v50, %v7270_v9  ;;  %v2837_v9 = vadd.f32 %v7342_v50, %v7310_v59  ;;  %v2847_v59 = vadd.f32 %v7342_v50, %v7330_v24 }
 0x4da   : > { %3810 = vst [vmem:[%s7426_s25 + $0x90] sm:$0xff] %v3778_v55  ;;  %v3702_v11 = vadd.f32 %v4476_v41, %v3701_v61  ;;  %v2857_v24 = vadd.f32 %v7342_v50, %v7337_v23 }
 0x4db   : > { %v3781_v29 = vmax.f32 %v3707_v56, 0.0 }
 0x4dc   : > { %v3780_v22 = vmax.f32 %v3702_v11, 0.0  ;;  %v4137_v47 = vpop.f32.mrb[162].mxu0 }
 0x4dd   : > { %3813 = vst [vmem:[%s7426_s25 + $0xa8] sm:$0xff] %v3781_v29  ;;  %v3711_v60 = vpop.f32.mrb[163].mxu0 }
 0x4de   : > { %3812 = vst [vmem:[%s7426_s25 + $0xa0] sm:$0xff] %v3780_v22 }
 0x4e0   : > { %v4140_v6 = vpop.f32.mrb[164].mxu0 }
 0x4e1   : > { %v3721_v30 = vpop.f32.mrb[165].mxu0 }
 0x4e4   : > { %v4143_v42 = vpop.f32.mrb[166].mxu0 }
 0x4e5   : > { %v3731_v16 = vpop.f32.mrb[167].mxu0 }
 0x4e8   : > { %v4146_v14 = vpop.f32.mrb[168].mxu0 }
 0x4e9   : > { %v3741_v2 = vpop.f32.mrb[169].mxu0 }
 0x4ec   : > { %v7489_v58 = vpop.f32.mrb[170].mxu0 }
 0x4ed   : > { %v3751_v38 = vpop.f32.mrb[171].mxu0 }
 0x4f2   : > { %v3486_v4 = vpop.f32.mrb[44].mxu1 }
 0x4f3   : > { %v4481_v28 = vadd.f32 %v3486_v4, %v2812_v36  ;;  %v3488_v45 = vpop.f32.mrb[45].mxu1 }
 0x4f5   : > { %v3712_v41 = vadd.f32 %v4481_v28, %v3711_v60 }
 0x4f6   : > { %v3491_v44 = vpop.f32.mrb[46].mxu1 }
 0x4f7   : > { %v3782_v13 = vmax.f32 %v3712_v41, 0.0  ;;  %v4483_v15 = vadd.f32 %v3491_v44, %v2817_v17  ;;  %v3493_v48 = vpop.f32.mrb[47].mxu1 }
 0x4f9   : > { %3814 = vst [vmem:[%s7426_s25 + $0xb0] sm:$0xff] %v3782_v13  ;;  %v3717_v37 = vadd.f32 %v4483_v15, %v4137_v47 }
 0x4fa   : > { %v3496_v18 = vpop.f32.mrb[48].mxu1 }
 0x4fb   : > { %v3783_v32 = vmax.f32 %v3717_v37, 0.0  ;;  %v4485_v8 = vadd.f32 %v3496_v18, %v2822_v31  ;;  %v3498_v40 = vpop.f32.mrb[49].mxu1 }
 0x4fd   : > { %3815 = vst [vmem:[%s7426_s25 + $0xb8] sm:$0xff] %v3783_v32  ;;  %v3722_v1 = vadd.f32 %v4485_v8, %v3721_v30 }
 0x4fe   : > { %v3501_v34 = vpop.f32.mrb[50].mxu1 }
 0x4ff   : > { %v3784_v46 = vmax.f32 %v3722_v1, 0.0  ;;  %v4487_v19 = vadd.f32 %v3501_v34, %v2827_v25  ;;  %v3503_v27 = vpop.f32.mrb[51].mxu1 }
 0x501   : > { %3816 = vst [vmem:[%s7426_s25 + $0xc0] sm:$0xff] %v3784_v46  ;;  %v3727_v63 = vadd.f32 %v4487_v19, %v4140_v6 }
 0x502   : > { %v3506_v43 = vpop.f32.mrb[52].mxu1 }
 0x503   : > { %v3785_v53 = vmax.f32 %v3727_v63, 0.0  ;;  %v4489_v21 = vadd.f32 %v3506_v43, %v2832_v52  ;;  %v3508_v39 = vpop.f32.mrb[53].mxu1 }
 0x505   : > { %3817 = vst [vmem:[%s7426_s25 + $0xc8] sm:$0xff] %v3785_v53  ;;  %v3732_v7 = vadd.f32 %v4489_v21, %v3731_v16 }
 0x506   : > { %v3511_v51 = vpop.f32.mrb[54].mxu1 }
 0x507   : > { %v3786_v35 = vmax.f32 %v3732_v7, 0.0  ;;  %v4491_v62 = vadd.f32 %v3511_v51, %v2837_v9  ;;  %v3513_v3 = vpop.f32.mrb[55].mxu1 }
 0x509   : > { %3818 = vst [vmem:[%s7426_s25 + $0xd0] sm:$0xff] %v3786_v35  ;;  %v3737_v57 = vadd.f32 %v4491_v62, %v4143_v42 }
 0x50a   : > { %v3516_v33 = vpop.f32.mrb[56].mxu1 }
 0x50b   : > { %v3787_v0 = vmax.f32 %v3737_v57, 0.0  ;;  %v4493_v26 = vadd.f32 %v3516_v33, %v2842_v10  ;;  %v3518_v12 = vpop.f32.mrb[57].mxu1 }
 0x50d   : > { %3819 = vst [vmem:[%s7426_s25 + $0xd8] sm:$0xff] %v3787_v0  ;;  %v3742_v54 = vadd.f32 %v4493_v26, %v3741_v2 }
 0x50e   : > { %v3521_v55 = vpop.f32.mrb[58].mxu1 }
 0x50f   : > { %v3788_v5 = vmax.f32 %v3742_v54, 0.0  ;;  %v4495_v56 = vadd.f32 %v3521_v55, %v2847_v59  ;;  %v3523_v61 = vpop.f32.mrb[59].mxu1 }
 0x511   : > { %3820 = vst [vmem:[%s7426_s25 + $0xe0] sm:$0xff] %v3788_v5  ;;  %v3747_v11 = vadd.f32 %v4495_v56, %v4146_v14 }
 0x512   : > { %v3526_v29 = vpop.f32.mrb[60].mxu1 }
 0x513   : > { %v3789_v22 = vmax.f32 %v3747_v11, 0.0  ;;  %v4497_v47 = vadd.f32 %v3526_v29, %v2852_v20  ;;  %v3528_v60 = vpop.f32.mrb[61].mxu1 }
 0x515   : > { %3821 = vst [vmem:[%s7426_s25 + $0xe8] sm:$0xff] %v3789_v22  ;;  %v3752_v6 = vadd.f32 %v4497_v47, %v3751_v38 }
 0x516   : > { %v3531_v30 = vpop.f32.mrb[62].mxu1 }
 0x517   : > { %v3790_v42 = vmax.f32 %v3752_v6, 0.0  ;;  %v4499_v16 = vadd.f32 %v3531_v30, %v2857_v24  ;;  %v3533_v2 = vpop.f32.mrb[63].mxu1 }
 0x519   : > { %3822 = vst [vmem:[%s7426_s25 + $0xf0] sm:$0xff] %v3790_v42  ;;  %v3757_v36 = vadd.f32 %v4499_v16, %v7489_v58 }
 0x51b   : > { %v3791_v49 = vmax.f32 %v3757_v36, 0.0 }
 0x51d   : > { %3823 = vst [vmem:[%s7426_s25 + $0xf8] sm:$0xff] %v3791_v49 }
 0x51e PF: > { %s15_s18 = sadd.s32 1, %s4640_s18  }
 0x51f   : > { %p12_p4 = scmp.ge.s32.totalorder %s15_s18, 4  }
 0x521   :  { %14 = sbr.rel (!%p12_p4) target bundleno = 1 (0x1), region = 72 }

</bundles_post_ra>
